<compile_context>
chip_gen: v5e
topology: v5e:2x2
jax: 0.10.0
libtpu: 0.0.40
codegen_flags: <defaults>
</compile_context>

<pallas_src>
import functools

import jax
import jax.numpy as jnp
from jax.experimental import pallas as pl
from jax.experimental.pallas import tpu as pltpu


def _rbm_kernel(v_ref, wt_ref, w_ref, a_ref, b_ref, uh_ref, uv_ref, out_ref, *, k):
    Wt = wt_ref[...]                       # (V, H) bf16 — native for v @ W.T
    Wm = w_ref[...]                        # (H, V) bf16 — native for h @ W
    tb = v_ref.shape[0]
    V, H = Wt.shape

    # Hoist bias broadcasts out of the (unrolled) Gibbs chain.
    a_b = jnp.broadcast_to(a_ref[...], (tb, H))    # (tb, H) f32
    b_b = jnp.broadcast_to(b_ref[...], (tb, V))    # (tb, V) f32

    def v_to_h(v_bf, step):
        # p_h = sigmoid(v @ W.T + a); h = 1[p_h > u]  (== relu(sign(p - u)))
        pre = jnp.dot(v_bf, Wt, preferred_element_type=jnp.float32) + a_b
        p_h = jax.nn.sigmoid(pre)
        return jnp.where(p_h > uh_ref[step], 1.0, 0.0).astype(jnp.bfloat16)

    def h_to_v(h_bf, step):
        # p_v = sigmoid(h @ W + b); v = 1[p_v > u]
        pre = jnp.dot(h_bf, Wm, preferred_element_type=jnp.float32) + b_b
        p_v = jax.nn.sigmoid(pre)
        return jnp.where(p_v > uv_ref[step], 1.0, 0.0)   # f32 in {0, 1}

    h = v_to_h(v_ref[...], 0)
    v_out = None
    for step in range(k):                  # k is static and small -> unrolled
        v_out = h_to_v(h, step)
        if step + 1 < k:
            h = v_to_h(v_out.astype(jnp.bfloat16), step + 1)

    out_ref[...] = v_out.astype(out_ref.dtype)


def rbm_forward(v, W, a, b, *, k, key, block_b=128):
    """RBM forward (k-step Gibbs chain) on TPU via Pallas.

    v: (B, n_visible) f32; W: (n_hidden, n_visible); a: (1, n_hidden);
    b: (1, n_visible).  `key` drives the Bernoulli sampling uniforms.
    """
    B, V = v.shape
    H, V2 = W.shape
    assert V == V2 and a.shape == (1, H) and b.shape == (1, V)
    if k == 0:
        return v.astype(jnp.float32)

    # Batch tile: multiple of 8 sublanes, at most block_b; pad B up to it.
    tb = min(block_b, B)
    tb = ((tb + 7) // 8) * 8
    B_pad = ((B + tb - 1) // tb) * tb
    num_tiles = B_pad // tb

    v_p = v.astype(jnp.bfloat16)
    if B_pad != B:
        v_p = jnp.pad(v_p, ((0, B_pad - B), (0, 0)))

    kh, kv = jax.random.split(key)
    u_h = jax.random.uniform(kh, (k, B_pad, H), dtype=jnp.float32)
    u_v = jax.random.uniform(kv, (k, B_pad, V), dtype=jnp.float32)

    W_bf = W.astype(jnp.bfloat16)          # (H, V): used for h @ W
    Wt_bf = W.T.astype(jnp.bfloat16)       # (V, H): used for v @ W.T
    a_f = a.astype(jnp.float32)
    b_f = b.astype(jnp.float32)

    grid_spec = pl.GridSpec(
        grid=(num_tiles,),
        in_specs=[
            pl.BlockSpec((tb, V), lambda i: (i, 0)),        # v tile
            pl.BlockSpec((V, H), lambda i: (0, 0)),         # W.T (resident)
            pl.BlockSpec((H, V), lambda i: (0, 0)),         # W   (resident)
            pl.BlockSpec((1, H), lambda i: (0, 0)),         # a
            pl.BlockSpec((1, V), lambda i: (0, 0)),         # b
            pl.BlockSpec((k, tb, H), lambda i: (0, i, 0)),  # uniforms for h
            pl.BlockSpec((k, tb, V), lambda i: (0, i, 0)),  # uniforms for v
        ],
        out_specs=pl.BlockSpec((tb, V), lambda i: (i, 0)),
    )

    out = pl.pallas_call(
        functools.partial(_rbm_kernel, k=k),
        out_shape=jax.ShapeDtypeStruct((B_pad, V), jnp.float32),
        grid_spec=grid_spec,
        compiler_params=pltpu.CompilerParams(
            dimension_semantics=("parallel",)),
    )(v_p, Wt_bf, W_bf, a_f, b_f, u_h, u_v)

    return out[:B] if B_pad != B else out


if __name__ == "__main__":
    # Shapes consistent with RBM(n_visible, n_hidden, k); batch chosen large
    # enough (256) to fill MXU rows and exercise the parallel batch grid.
    B, N_VISIBLE, N_HIDDEN, K = 256, 256, 128, 2

    key = jax.random.PRNGKey(0)
    k_w, k_v, k_samp = jax.random.split(key, 3)

    # Parameter init mirroring __init__: W = randn * 0.1, a = b = 0.
    W = jax.random.normal(k_w, (N_HIDDEN, N_VISIBLE), dtype=jnp.float32) * 0.1
    a = jnp.zeros((1, N_HIDDEN), dtype=jnp.float32)
    b = jnp.zeros((1, N_VISIBLE), dtype=jnp.float32)

    # Binary visible input (typical RBM data).
    v = (jax.random.uniform(k_v, (B, N_VISIBLE)) > 0.5).astype(jnp.float32)

    out = rbm_forward(v, W, a, b, k=K, key=k_samp)
    out = jax.block_until_ready(out)

    assert out.shape == (B, N_VISIBLE)
    assert out.dtype == jnp.float32
    # Output of the Gibbs chain is a Bernoulli sample -> entries in {0, 1}.
    assert bool(jnp.all((out == 0.0) | (out == 1.0)))

    print("KERNEL_OK")
</pallas_src>

<mosaic_0001>
module attributes {stable_mosaic.version = 11 : i64} {
  func.func @_rbm_kernel(%arg0: i32, %arg1: memref<128x256xbf16, #tpu.memory_space<vmem>>, %arg2: memref<256x128xbf16, #tpu.memory_space<vmem>>, %arg3: memref<128x256xbf16, #tpu.memory_space<vmem>>, %arg4: memref<1x128xf32, #tpu.memory_space<vmem>>, %arg5: memref<1x256xf32, #tpu.memory_space<vmem>>, %arg6: memref<2x128x128xf32, #tpu.memory_space<vmem>>, %arg7: memref<2x128x256xf32, #tpu.memory_space<vmem>>, %arg8: memref<128x256xf32, #tpu.memory_space<vmem>>) attributes {dimension_semantics = [#tpu.dimension_semantics<parallel>], iteration_bounds = array<i64: 2>, scalar_prefetch = 0 : i64, scratch_operands = 0 : i64, tpu.core_type = #tpu.core_type<tc>, window_params = [{transform_indices = @transform_0, window_bounds = array<i64: 128, 256>}, {pipeline_mode = #tpu.pipeline_mode<synchronous>, transform_indices = @transform_1, window_bounds = array<i64: 256, 128>}, {pipeline_mode = #tpu.pipeline_mode<synchronous>, transform_indices = @transform_2, window_bounds = array<i64: 128, 256>}, {pipeline_mode = #tpu.pipeline_mode<synchronous>, transform_indices = @transform_3, window_bounds = array<i64: 1, 128>}, {pipeline_mode = #tpu.pipeline_mode<synchronous>, transform_indices = @transform_4, window_bounds = array<i64: 1, 256>}, {transform_indices = @transform_5, window_bounds = array<i64: 2, 128, 128>}, {transform_indices = @transform_6, window_bounds = array<i64: 2, 128, 256>}, {transform_indices = @transform_7, window_bounds = array<i64: 128, 256>}]} {
    %c0 = arith.constant 0 : index
    %c0_0 = arith.constant 0 : index
    %0 = vector.load %arg2[%c0, %c0_0] : memref<256x128xbf16, #tpu.memory_space<vmem>>, vector<256x128xbf16>
    %c0_1 = arith.constant 0 : index
    %c0_2 = arith.constant 0 : index
    %1 = vector.load %arg3[%c0_1, %c0_2] : memref<128x256xbf16, #tpu.memory_space<vmem>>, vector<128x256xbf16>
    %c0_3 = arith.constant 0 : index
    %c0_4 = arith.constant 0 : index
    %2 = vector.load %arg4[%c0_3, %c0_4] : memref<1x128xf32, #tpu.memory_space<vmem>>, vector<1x128xf32>
    %3 = vector.shape_cast %2 : vector<1x128xf32> to vector<1x128xf32>
    %4 = vector.broadcast %3 : vector<1x128xf32> to vector<128x128xf32>
    %c0_5 = arith.constant 0 : index
    %c0_6 = arith.constant 0 : index
    %5 = vector.load %arg5[%c0_5, %c0_6] : memref<1x256xf32, #tpu.memory_space<vmem>>, vector<1x256xf32>
    %6 = vector.shape_cast %5 : vector<1x256xf32> to vector<1x256xf32>
    %7 = vector.broadcast %6 : vector<1x256xf32> to vector<128x256xf32>
    %c0_7 = arith.constant 0 : index
    %c0_8 = arith.constant 0 : index
    %8 = vector.load %arg1[%c0_7, %c0_8] : memref<128x256xbf16, #tpu.memory_space<vmem>>, vector<128x256xbf16>
    %cst = arith.constant dense<0.000000e+00> : vector<128x128xf32>
    %9 = tpu.matmul %8, %0, %cst {dimension_numbers = #tpu.dot_dimension_numbers<[1], [0], [0], [1], [0, 0, 1, 1], [], []>} : vector<128x256xbf16>, vector<256x128xbf16>, vector<128x128xf32> -> vector<128x128xf32>
    %10 = arith.addf %9, %4 : vector<128x128xf32>
    %11 = arith.negf %10 : vector<128x128xf32>
    %12 = math.exp %11 : vector<128x128xf32>
    %cst_9 = arith.constant 1.000000e+00 : f32
    %13 = vector.broadcast %cst_9 : f32 to vector<128x128xf32>
    %14 = arith.addf %13, %12 : vector<128x128xf32>
    %15 = arith.divf %13, %14 : vector<128x128xf32>
    %c0_10 = arith.constant 0 : index
    %c0_11 = arith.constant 0 : index
    %c0_12 = arith.constant 0 : index
    %16 = vector.load %arg6[%c0_10, %c0_11, %c0_12] : memref<2x128x128xf32, #tpu.memory_space<vmem>>, vector<1x128x128xf32>
    %17 = vector.shape_cast %16 : vector<1x128x128xf32> to vector<128x128xf32>
    %18 = arith.cmpf ogt, %15, %17 : vector<128x128xf32>
    %cst_13 = arith.constant 1.000000e+00 : f32
    %cst_14 = arith.constant 0.000000e+00 : f32
    %19 = vector.broadcast %cst_13 : f32 to vector<128x128xf32>
    %20 = vector.broadcast %cst_14 : f32 to vector<128x128xf32>
    %21 = arith.select %18, %19, %20 : vector<128x128xi1>, vector<128x128xf32>
    %22 = arith.truncf %21 : vector<128x128xf32> to vector<128x128xbf16>
    %cst_15 = arith.constant dense<0.000000e+00> : vector<128x256xf32>
    %23 = tpu.matmul %22, %1, %cst_15 {dimension_numbers = #tpu.dot_dimension_numbers<[1], [0], [0], [1], [0, 0, 1, 1], [], []>} : vector<128x128xbf16>, vector<128x256xbf16>, vector<128x256xf32> -> vector<128x256xf32>
    %24 = arith.addf %23, %7 : vector<128x256xf32>
    %25 = arith.negf %24 : vector<128x256xf32>
    %26 = math.exp %25 : vector<128x256xf32>
    %cst_16 = arith.constant 1.000000e+00 : f32
    %27 = vector.broadcast %cst_16 : f32 to vector<128x256xf32>
    %28 = arith.addf %27, %26 : vector<128x256xf32>
    %29 = arith.divf %27, %28 : vector<128x256xf32>
    %c0_17 = arith.constant 0 : index
    %c0_18 = arith.constant 0 : index
    %c0_19 = arith.constant 0 : index
    %30 = vector.load %arg7[%c0_17, %c0_18, %c0_19] : memref<2x128x256xf32, #tpu.memory_space<vmem>>, vector<1x128x256xf32>
    %31 = vector.shape_cast %30 : vector<1x128x256xf32> to vector<128x256xf32>
    %32 = arith.cmpf ogt, %29, %31 : vector<128x256xf32>
    %cst_20 = arith.constant 1.000000e+00 : f32
    %cst_21 = arith.constant 0.000000e+00 : f32
    %33 = vector.broadcast %cst_20 : f32 to vector<128x256xf32>
    %34 = vector.broadcast %cst_21 : f32 to vector<128x256xf32>
    %35 = arith.select %32, %33, %34 : vector<128x256xi1>, vector<128x256xf32>
    %36 = arith.truncf %35 : vector<128x256xf32> to vector<128x256xbf16>
    %cst_22 = arith.constant dense<0.000000e+00> : vector<128x128xf32>
    %37 = tpu.matmul %36, %0, %cst_22 {dimension_numbers = #tpu.dot_dimension_numbers<[1], [0], [0], [1], [0, 0, 1, 1], [], []>} : vector<128x256xbf16>, vector<256x128xbf16>, vector<128x128xf32> -> vector<128x128xf32>
    %38 = arith.addf %37, %4 : vector<128x128xf32>
    %39 = arith.negf %38 : vector<128x128xf32>
    %40 = math.exp %39 : vector<128x128xf32>
    %cst_23 = arith.constant 1.000000e+00 : f32
    %41 = vector.broadcast %cst_23 : f32 to vector<128x128xf32>
    %42 = arith.addf %41, %40 : vector<128x128xf32>
    %43 = arith.divf %41, %42 : vector<128x128xf32>
    %c1 = arith.constant 1 : index
    %c0_24 = arith.constant 0 : index
    %c0_25 = arith.constant 0 : index
    %44 = vector.load %arg6[%c1, %c0_24, %c0_25] : memref<2x128x128xf32, #tpu.memory_space<vmem>>, vector<1x128x128xf32>
    %45 = vector.shape_cast %44 : vector<1x128x128xf32> to vector<128x128xf32>
    %46 = arith.cmpf ogt, %43, %45 : vector<128x128xf32>
    %cst_26 = arith.constant 1.000000e+00 : f32
    %cst_27 = arith.constant 0.000000e+00 : f32
    %47 = vector.broadcast %cst_26 : f32 to vector<128x128xf32>
    %48 = vector.broadcast %cst_27 : f32 to vector<128x128xf32>
    %49 = arith.select %46, %47, %48 : vector<128x128xi1>, vector<128x128xf32>
    %50 = arith.truncf %49 : vector<128x128xf32> to vector<128x128xbf16>
    %cst_28 = arith.constant dense<0.000000e+00> : vector<128x256xf32>
    %51 = tpu.matmul %50, %1, %cst_28 {dimension_numbers = #tpu.dot_dimension_numbers<[1], [0], [0], [1], [0, 0, 1, 1], [], []>} : vector<128x128xbf16>, vector<128x256xbf16>, vector<128x256xf32> -> vector<128x256xf32>
    %52 = arith.addf %51, %7 : vector<128x256xf32>
    %53 = arith.negf %52 : vector<128x256xf32>
    %54 = math.exp %53 : vector<128x256xf32>
    %cst_29 = arith.constant 1.000000e+00 : f32
    %55 = vector.broadcast %cst_29 : f32 to vector<128x256xf32>
    %56 = arith.addf %55, %54 : vector<128x256xf32>
    %57 = arith.divf %55, %56 : vector<128x256xf32>
    %c1_30 = arith.constant 1 : index
    %c0_31 = arith.constant 0 : index
    %c0_32 = arith.constant 0 : index
    %58 = vector.load %arg7[%c1_30, %c0_31, %c0_32] : memref<2x128x256xf32, #tpu.memory_space<vmem>>, vector<1x128x256xf32>
    %59 = vector.shape_cast %58 : vector<1x128x256xf32> to vector<128x256xf32>
    %60 = arith.cmpf ogt, %57, %59 : vector<128x256xf32>
    %cst_33 = arith.constant 1.000000e+00 : f32
    %cst_34 = arith.constant 0.000000e+00 : f32
    %61 = vector.broadcast %cst_33 : f32 to vector<128x256xf32>
    %62 = vector.broadcast %cst_34 : f32 to vector<128x256xf32>
    %63 = arith.select %60, %61, %62 : vector<128x256xi1>, vector<128x256xf32>
    %c0_35 = arith.constant 0 : index
    %c0_36 = arith.constant 0 : index
    %64 = vector.load %arg8[%c0_35, %c0_36] : memref<128x256xf32, #tpu.memory_space<vmem>>, vector<128x256xf32>
    tpu.vector_store %arg8[%c0_35, %c0_36], %63 {strides = array<i32>} : memref<128x256xf32, #tpu.memory_space<vmem>>, vector<128x256xf32>,
    return
  }
  func.func @transform_0(%arg0: i32) -> (i32, i32) {
    %c0_i32 = arith.constant 0 : i32
    %c0_i32_0 = arith.constant 0 : i32
    return %arg0, %c0_i32 : i32, i32
  }
  func.func @transform_1(%arg0: i32) -> (i32, i32) {
    %c0_i32 = arith.constant 0 : i32
    %c0_i32_0 = arith.constant 0 : i32
    %c0_i32_1 = arith.constant 0 : i32
    return %c0_i32, %c0_i32_0 : i32, i32
  }
  func.func @transform_2(%arg0: i32) -> (i32, i32) {
    %c0_i32 = arith.constant 0 : i32
    %c0_i32_0 = arith.constant 0 : i32
    %c0_i32_1 = arith.constant 0 : i32
    return %c0_i32, %c0_i32_0 : i32, i32
  }
  func.func @transform_3(%arg0: i32) -> (i32, i32) {
    %c0_i32 = arith.constant 0 : i32
    %c0_i32_0 = arith.constant 0 : i32
    %c0_i32_1 = arith.constant 0 : i32
    return %c0_i32, %c0_i32_0 : i32, i32
  }
  func.func @transform_4(%arg0: i32) -> (i32, i32) {
    %c0_i32 = arith.constant 0 : i32
    %c0_i32_0 = arith.constant 0 : i32
    %c0_i32_1 = arith.constant 0 : i32
    return %c0_i32, %c0_i32_0 : i32, i32
  }
  func.func @transform_5(%arg0: i32) -> (i32, i32, i32) {
    %c0_i32 = arith.constant 0 : i32
    %c0_i32_0 = arith.constant 0 : i32
    %c0_i32_1 = arith.constant 0 : i32
    return %c0_i32, %arg0, %c0_i32_0 : i32, i32, i32
  }
  func.func @transform_6(%arg0: i32) -> (i32, i32, i32) {
    %c0_i32 = arith.constant 0 : i32
    %c0_i32_0 = arith.constant 0 : i32
    %c0_i32_1 = arith.constant 0 : i32
    return %c0_i32, %arg0, %c0_i32_0 : i32, i32, i32
  }
  func.func @transform_7(%arg0: i32) -> (i32, i32) {
    %c0_i32 = arith.constant 0 : i32
    %c0_i32_0 = arith.constant 0 : i32
    return %arg0, %c0_i32 : i32, i32
  }
}

</mosaic_0001>

<bundles_post_ra>
// kernel: tpu_custom_call.1
= control target key start
LH: loop header
LB: loop body
LE: loop exit
PB: predicated region body
PF: predicated region fallthrough
CT: control target
= control target key end

     0   :  { %s6491_s0 = inlined_call_operand.hbm [shape: bf16[256,256], index: 0, kind: input, shape index: {}]   ;;  %s6492_s1 = inlined_call_operand.hbm [shape: bf16[256,128], index: 1, kind: input, shape index: {}]   ;;  %s6493_s2 = inlined_call_operand.hbm [shape: bf16[128,256], index: 2, kind: input, shape index: {}]   ;;  %s6494_s3 = inlined_call_operand.vmem [shape: f32[1,128], index: 3, kind: input, shape index: {}]   ;;  %s6495_s4 = inlined_call_operand.vmem [shape: f32[1,256], index: 4, kind: input, shape index: {}]   ;;  %s6496_s5 = inlined_call_operand.hbm [shape: f32[2,256,128], index: 5, kind: input, shape index: {}]   ;;  %s6497_s6 = inlined_call_operand.hbm [shape: f32[2,256,256], index: 6, kind: input, shape index: {}]   ;;  %s6498_s7 = inlined_call_operand.hbm [shape: f32[256,256], index: 7, kind: output, shape index: {}]  }
   0x1   :  { %6502 = sst [smem:[#allocation25_spill]] %s6492_s1 }
   0x2   :  { %6503 = sst [smem:[#allocation26_spill]] %s6493_s2 }
   0x3   :  { %12 = vsyncpa [#allocation3], 0 }
   0x4   :  { %14 = vsyncpa [#allocation3 + $0x1], 0 }
   0x5   :  { %15 = vsyncpa [#allocation6], 0 }
   0x6   :  { %16 = vsyncpa [#allocation9], 0 }
   0x7   :  { %18 = vsyncpa [#allocation9 + $0x1], 0 }
   0x8   :  { %19 = vsyncpa [#allocation4], 0 }
   0x9   :  { %21 = vsyncpa [#allocation4 + $0x1], 0  ;;  %s4755_s24 = smov 0   ;;  %s4757_s25 = smov 0  }
   0xa   :  { %s4759_s26 = smov 0   ;;  %s4761_s27 = smov 0  }
   0xb LB: > { %6504 = sst [smem:[#allocation22_spill]] %s4686_s26  ;;  %s4776_s28 = sadd.s32 4294967295, %s4690_s27   ;;  %s4690_s27 = sphi %s4761_s27, %s6616_s27   ;;  %s4686_s26 = sphi %s4759_s26, %s6618_s26   ;;  %s4682_s25 = sphi %s4757_s25, %s6620_s25   ;;  %s4678_s24 = sphi %s4755_s24, %s6619_s24  }
   0xc   : > { %s3521_s29 = sadd.s32 4294967294, %s4690_s27   ;;  %s4780_s30 = sadd.s32 1, %s4690_s27  }
   0xd   : > { %6505 = sst [smem:[#allocation23_spill]] %s4780_s30  ;;  %s34_s8 = sadd.s32 1, %s4686_s26 }
   0xe   : > { %s31_s9 = ssub.s32 %s4690_s27, %s4780_s30  ;;  %p41_p0 = scmp.ne.s32.totalorder %s4686_s26, %s4682_s25 }
   0xf   : > { %p32_p1 = scmp.eq.s32.totalorder %s31_s9, 0  ;;  %p42_p2 = scmp.eq.s32.totalorder %s4690_s27, 0 }
  0x10   : > { %p47_p3 = scmp.ne.s32.totalorder %s4682_s25, %s4678_s24  ;;  %p48_p4 = scmp.eq.s32.totalorder %s4776_s28, 0 }
  0x11   : > { %s4792_s10 = scalar_select %p32_p1, %s4686_s26, %s34_s8  }
  0x12   : > { %p4794_p5 = por %p42_p2, %p41_p0  ;;  %p4800_p6 = por %p48_p4, %p47_p3 }
  0x13   : > { %6506 = sst [smem:[#allocation24_spill]] %s4792_s10  ;;  %p207_p7 = scmp.eq.s32.totalorder %s4776_s28, 1 }
  0x14   : > { %p213_p8 = scmp.eq.s32.totalorder %s3521_s29, 1  ;;  %p3522_p9 = scmp.ge.s32.totalorder %s4690_s27, 1 }
  0x15   : > { %p220_p10 = scmp.lt.s32.totalorder %s4690_s27, 3  ;;  %p4807_p11 = por %p207_p7, %p41_p0 }
  0x16   : > { %p4811_p12 = por %p213_p8, %p47_p3  ;;  %s6512_s1 = sld [smem:[#allocation25_spill]] }
  0x17   : > { %p4815_p13 = pnand %p3522_p9, %p220_p10  ;;  %s4692_s19 = smov [#allocation5]  }
  0x18   : > { %s233_s20 = sshll.u32 %s4692_s19, 4  ;;  %s6513_s2 = sld [smem:[#allocation26_spill]]  ;;  %s234_s20 = int_to_ptr.vmem [resolvable:$true] %s233_s20 }
  0x19   : > { %p4071_p1 = pneg %p4815_p13  ;;  %s4693_s29 = smov 64  }
  0x1a   : > { %s4694_s8 = smov 4   ;;  %s4695_s9 = smov [#allocation7]  }
  0x1b   : > { %p4072_p0 = pnand %p4071_p1, %p48_p4  ;;  %s247_s16 = sshll.u32 %s4695_s9, 4  ;;  %s248_s16 = int_to_ptr.vmem [resolvable:$true] %s247_s16 }
  0x1c   : > { %s231_s18 = sshll.u32 %s6512_s1, 4  ;;  %s4696_s17 = smov 128   ;;  %s232_s18 = int_to_ptr.hbm [resolvable:$true] %s231_s18 }
  0x1d   : > { %4074 = dma.hbm_to_vmem [thread:$0]  (!%p4072_p0), %s232_s18, 2048, %s234_s20, [#allocation6], %s4693_s29, %s4693_s29, %s4694_s8  }
  0x1e   : > { %s245_s23 = sshll.u32 %s6513_s2, 4  ;;  %s4697_s1 = smov 8   ;;  %s246_s23 = int_to_ptr.hbm [resolvable:$true] %s245_s23 }
  0x1f   : > { %4077 = dma.hbm_to_vmem [thread:$0]  (!%p4072_p0), %s246_s23, 2048, %s248_s16, [#allocation6], %s4696_s17, %s4696_s17, %s4697_s1  }
  0x20   : > { %p3525_p2 = scmp.ge.s32.totalorder %s4690_s27, 2 }
  0x21   : > { %s4833_s19 = sand.u32 (!%p3525_p2), 1, %s4686_s26   ;;  %s3987_s21 = sshll.u32 (!%p3525_p2), %s4690_s27, 7 }
  0x22   : > { %263 = sbr.rel (%p3525_p2) target bundleno = 77 (0x4d), region = 32  ;;  %s3526_s18 = sshll.u32 (!%p3525_p2), %s4833_s19, 7 }
  0x23   : > { %s277_s29 = scalar_lea.hbm (!%p3525_p2), %s6491_s0, %s3987_s21  ;;  %s271_s1 = scalar_lea.vmem (!%p3525_p2), [#allocation2], %s3526_s18 }
  0x24   : > { %s278_s8 = sshll.u32 (!%p3525_p2), %s277_s29, 4  ;;  %s280_s23 = sshll.u32 (!%p3525_p2), %s271_s1, 4  ;;  %s279_s8 = int_to_ptr.hbm [resolvable:$true] %s278_s8  ;;  %s281_s23 = int_to_ptr.vmem [resolvable:$true] %s280_s23 }
  0x25   : > { %s268_s9 = scalar_lea.sflag (!%p3525_p2), [#allocation3], %s4833_s19  ;;  %s4588_s16 = sshra.s32 (!%p3525_p2), %s279_s8, 4  ;;  %s4589_s16 = int_to_ptr.hbm [resolvable:$true] %s4588_s16 }
  0x26   : > { %s4590_s17 = scalar_lea.hbm (!%p3525_p2), %s4589_s16, 128  ;;  %s4594_s26 = scalar_lea.hbm (!%p3525_p2), %s6491_s0, 256 }
  0x27   : > { %p4591_p3 = scmp.ne.s32.totalorder %s4589_s16, %s4590_s17  ;;  %p4595_p9 = scmp.lt.s32.totalorder %s4589_s16, %s6491_s0 }
  0x28   : > { %p4596_p10 = scmp.lt.s32.totalorder %s4594_s26, %s4590_s17 }
  0x29   : > { %p4592_p7 = pnand %p4591_p3, %p4794_p5 }
  0x2a   : > { %p4597_p1 = por %p4596_p10, %p4595_p9 }
  0x2b   : > { %p4593_p8 = pneg %p4592_p7 }
  0x2d   : > { %p4598_p0 = pnand %p4597_p1, %p4593_p8 }
  0x2f   : > { %4601 = shalt.err (!%p4598_p0)
}
  0x30   : > { %s4698_s18 = smov 128   ;;  %s4699_s22 = smov 8  }
  0x31   : > { %4045 = dma.hbm_to_vmem [thread:$0]  (%p4794_p5), %s279_s8, 2048, %s281_s23, %s268_s9, %s4698_s18, %s4698_s18, %s4699_s22  }
  0x32   : > { %s290_s2 = sand.u32 1, %s4690_s27   ;;  %s3530_s10 = sshll.u32 %s4833_s19, 8 }
  0x33   : > { %s299_s26 = scalar_lea.hbm %s6496_s5, %s3987_s21  ;;  %s294_s1 = scalar_lea.vmem [#allocation8], %s3530_s10 }
  0x34   : > { %s314_s16 = sshll.u32 %s294_s1, 4  ;;  %s312_s20 = sshll.u32 %s299_s26, 4  ;;  %s315_s16 = int_to_ptr.vmem [resolvable:$true] %s314_s16  ;;  %s313_s20 = int_to_ptr.hbm [resolvable:$true] %s312_s20 }
  0x35   : > { %s4046_s17 = scalar_select %p4794_p5, [#allocation0], [#allocation16] }
  0x36   : > { %s4700_s23 = smov 4096   ;;  %s4701_s9 = smov 2048  }
  0x37   : > { %s304_s8 = sld [smem:[%s4046_s17]]   ;;  %s4702_s18 = smov 16  }
  0x38   : > { %4047 = sst [smem:[#allocation13]] (%p4794_p5), %s4700_s23  ;;  %s4703_s21 = smov 128  }
  0x39   : > { %4048 = sst [smem:[#allocation13 + $0x1]] (%p4794_p5), %s4701_s9  ;;  %s4704_s29 = smov 8  }
  0x3a   : > { %4049 = sst [smem:[#allocation13 + $0x2]] (%p4794_p5), %s4702_s18  ;;  %s4870_s30 = scalar_lea.sflag [#allocation9], %s290_s2 }
  0x3b   : > { %4050 = sst [smem:[#allocation13 + $0x3]] (%p4794_p5), %s4703_s21  ;;  %s4705_s26 = smov [#allocation12]  }
  0x3c   : > { %4051 = sst [smem:[#allocation13 + $0x4]] (%p4794_p5), %s4703_s21 }
  0x3d   : > { %s3533_s22 = sshll.u32 %s304_s8, 26  ;;  %4052 = sst [smem:[#allocation13 + $0x5]] (%p4794_p5), %s4704_s29 }
  0x3e   : > { %s3534_s10 = sadd.s32 134217728, %s3533_s22 }
  0x3f   : > { %4053 = dma.general (%p4794_p5), %s313_s20, 4096, %s315_s16, %s4870_s30, %s4705_s26, [#allocation13], %s3534_s10, 0  }
  0x40   : > { %s3535_s1 = sshll.u32 %s4833_s19, 9  ;;  %s3990_s17 = sshll.u32 %s4690_s27, 8 }
  0x41   : > { %s347_s9 = scalar_lea.hbm %s6497_s6, %s3990_s17  ;;  %s341_s21 = scalar_lea.vmem [#allocation10], %s3535_s1 }
  0x42   : > { %s4054_s2 = scalar_select %p4794_p5, [#allocation0], [#allocation17] }
  0x43   : > { %s360_s18 = sshll.u32 %s347_s9, 4  ;;  %s362_s16 = sshll.u32 %s341_s21, 4  ;;  %s361_s18 = int_to_ptr.hbm [resolvable:$true] %s360_s18  ;;  %s363_s16 = int_to_ptr.vmem [resolvable:$true] %s362_s16 }
  0x44   : > { %s352_s20 = sld [smem:[%s4054_s2]]   ;;  %s4706_s22 = smov 8192  }
  0x45   : > { %4055 = sst [smem:[#allocation15]] (%p4794_p5), %s4706_s22  ;;  %s4707_s19 = smov 4096  }
  0x46   : > { %4056 = sst [smem:[#allocation15 + $0x1]] (%p4794_p5), %s4707_s19  ;;  %s4708_s10 = smov 16  }
  0x47   : > { %4057 = sst [smem:[#allocation15 + $0x2]] (%p4794_p5), %s4708_s10  ;;  %s4709_s29 = smov 256  }
  0x48   : > { %4058 = sst [smem:[#allocation15 + $0x3]] (%p4794_p5), %s4709_s29  ;;  %s4710_s17 = smov [#allocation14]  }
  0x49   : > { %4059 = sst [smem:[#allocation15 + $0x4]] (%p4794_p5), %s4709_s29 }
  0x4a   : > { %s3539_s26 = sshll.u32 %s352_s20, 26  ;;  %4060 = sst [smem:[#allocation15 + $0x5]] (%p4794_p5), %s4708_s10 }
  0x4b   : > { %s3540_s1 = sadd.s32 134217728, %s3539_s26 }
  0x4c   : > { %4061 = dma.general (%p4794_p5), %s361_s18, 8192, %s363_s16, %s4870_s30, %s4710_s17, [#allocation15], %s3540_s1, 0  }
  0x4d PF: > { %387 = sbr.rel (%p4815_p13) target bundleno = 941 (0x3ad), region = 48  ;;  %s4900_s8 = sand.u32 (!%p4815_p13), 1, %s4682_s25  }
  0x4e   : > { %s3542_s23 = sshll.u32 (!%p4815_p13), %s4900_s8, 7  ;;  %s390_s9 = scalar_lea.sflag (!%p4815_p13), [#allocation3], %s4900_s8 }
  0x4f   : > { %s4904_s2 = scalar_lea.vmem (!%p4815_p13), [#allocation2], %s3542_s23 }
  0x52   : > { %4661 = dma.done.wait (%p4800_p6), %s390_s9, 2048  }
  0x53   : > { %4663 = vsyncadd (%p4800_p6), %s390_s9, 4294965248 }
  0x54   : > { %4665 = dma.done.wait (%p48_p4), [#allocation6], 4096  }
  0x55   : > { %4667 = vsyncadd (%p48_p4), [#allocation6], 4294963200  ;;  %s409_s11 = sand.u32 1, %s4776_s28   ;;  %s3545_s15 = sshll.u32 %s4900_s8, 8 }
  0x56   : > { %s410_s30 = scalar_lea.sflag [#allocation9], %s409_s11  ;;  %s4918_s18 = scalar_lea.vmem [#allocation8], %s3545_s15 }
  0x57   : > { %4669 = dma.done.wait (%p4800_p6), %s410_s30, 12288  }
  0x58   : > { %4671 = vsyncadd (%p4800_p6), %s410_s30, 4294955008  ;;  %v3998_v0 = vld [vmem:[#allocation5 + $0x38] sm:$0xff]  ;;  %v3997_v2 = vld [vmem:[#allocation5 + $0x30] sm:$0xff]  ;;  %s3546_s22 = sshll.u32 %s4900_s8, 9  ;;  %s6008_s26 = scalar_lea.vmem [#allocation11], %s3545_s15 }
  0x59   : > { %v4006_v1 = vld [vmem:[#allocation5 + $0x78] sm:$0xff]  ;;  %719 = vmatpush.bf16.msra.mxu0 %v3998_v0  ;;  %v4005_v3 = vld [vmem:[#allocation5 + $0x70] sm:$0xff]  ;;  %v3996_v4 = vld [vmem:[#allocation5 + $0x28] sm:$0xff]  ;;  %s5233_s19 = scalar_lea.vmem [#allocation10], %s3546_s22  ;;  %s4040_s1 = sshll.u32 %s4776_s28, 8 }
  0x5a   : > { %768 = vmatpush.bf16.msra.mxu1 %v4006_v1  ;;  %v4004_v5 = vld [vmem:[#allocation5 + $0x68] sm:$0xff]  ;;  %v3995_v6 = vld [vmem:[#allocation5 + $0x20] sm:$0xff]  ;;  %v3994_v8 = vld [vmem:[#allocation5 + $0x18] sm:$0xff]  ;;  %s3382_s9 = scalar_lea.hbm %s6498_s7, %s4040_s1  ;;  %s3383_s28 = sshll.u32 %s6008_s26, 4  ;;  %s3384_s28 = int_to_ptr.vmem [resolvable:$true] %s3383_s28 }
  0x5b   : > { %v4003_v7 = vld [vmem:[#allocation5 + $0x60] sm:$0xff]  ;;  %v4002_v9 = vld [vmem:[#allocation5 + $0x58] sm:$0xff]  ;;  %v3993_v10 = vld [vmem:[#allocation5 + $0x10] sm:$0xff]  ;;  %s3370_s11 = scalar_lea.sflag [#allocation4], %s4900_s8  ;;  %s4636_s21 = scalar_lea.hbm %s6498_s7, 512 }
  0x5c   : > { %v4001_v11 = vld [vmem:[#allocation5 + $0x50] sm:$0xff]  ;;  %v3992_v12 = vld [vmem:[#allocation5 + $0x8] sm:$0xff]  ;;  %v3991_v14 = vld [vmem:[#allocation5] sm:$0xff] }
  0x5d   : > { %720 = vmatpush.bf16.msra.mxu0 %v3997_v2  ;;  %v4000_v13 = vld [vmem:[#allocation5 + $0x48] sm:$0xff]  ;;  %v3999_v15 = vld [vmem:[#allocation5 + $0x40] sm:$0xff]  ;;  %v3558_v22 = vld [vmem:[%s4904_s2 + $0x10] sm:$0xf] }
  0x5e   : > { %769 = vmatpush.bf16.msra.mxu1 %v4005_v3  ;;  %v3550_v16 = vld [vmem:[%s4904_s2] sm:$0xf]  ;;  %v4024_v17 = vld [vmem:[%s4904_s2 + $0x4] sm:$0xf0]  ;;  %v4023_v18 = vld [vmem:[%s4904_s2 + $0x4] sm:$0xf] }
  0x5f   : > { %v3552_v19 = vld [vmem:[%s4904_s2 + $0x8] sm:$0xf0]  ;;  %v3551_v20 = vor.u32 %v4024_v17, %v3550_v16  ;;  %v4026_v23 = vld [vmem:[%s4904_s2 + $0x14] sm:$0xf0]  ;;  %v4025_v24 = vld [vmem:[%s4904_s2 + $0x14] sm:$0xf] }
  0x60   : > { %v3555_v21 = vor.u32 %v4023_v18, %v3552_v19  ;;  %v3560_v25 = vld [vmem:[%s4904_s2 + $0x18] sm:$0xf0]  ;;  %v3559_v26 = vor.u32 %v4026_v23, %v3558_v22  ;;  %v3566_v28 = vld [vmem:[%s4904_s2 + $0x20] sm:$0xf]  ;;  %v4028_v29 = vld [vmem:[%s4904_s2 + $0x24] sm:$0xf0] }
  0x61   : > { %721 = vmatpush.bf16.msra.mxu0 %v3996_v4  ;;  %v3563_v27 = vor.u32 %v4025_v24, %v3560_v25  ;;  %v4027_v30 = vld [vmem:[%s4904_s2 + $0x24] sm:$0xf]  ;;  %v3568_v31 = vld [vmem:[%s4904_s2 + $0x28] sm:$0xf0]  ;;  %v3567_v32 = vor.u32 %v4028_v29, %v3566_v28  ;;  %v3574_v34 = vld [vmem:[%s4904_s2 + $0x30] sm:$0xf] }
  0x62   : > { %770 = vmatpush.bf16.msra.mxu1 %v4004_v5  ;;  %v3571_v33 = vor.u32 %v4027_v30, %v3568_v31  ;;  %v4030_v35 = vld [vmem:[%s4904_s2 + $0x34] sm:$0xf0]  ;;  %v4029_v36 = vld [vmem:[%s4904_s2 + $0x34] sm:$0xf]  ;;  %v3576_v37 = vld [vmem:[%s4904_s2 + $0x38] sm:$0xf0] }
  0x63   : > { %v3575_v38 = vor.u32 %v4030_v35, %v3574_v34  ;;  %v3579_v39 = vor.u32 %v4029_v36, %v3576_v37  ;;  %v3582_v40 = vld [vmem:[%s4904_s2 + $0x40] sm:$0xf]  ;;  %v4032_v41 = vld [vmem:[%s4904_s2 + $0x44] sm:$0xf0]  ;;  %v4031_v42 = vld [vmem:[%s4904_s2 + $0x44] sm:$0xf] }
  0x64   : > { %v3584_v43 = vld [vmem:[%s4904_s2 + $0x48] sm:$0xf0]  ;;  %v3583_v44 = vor.u32 %v4032_v41, %v3582_v40  ;;  %v3590_v46 = vld [vmem:[%s4904_s2 + $0x50] sm:$0xf]  ;;  %v4034_v47 = vld [vmem:[%s4904_s2 + $0x54] sm:$0xf0] }
  0x65   : > { %722 = vmatpush.bf16.msra.mxu0 %v3995_v6  ;;  %v3587_v45 = vor.u32 %v4031_v42, %v3584_v43  ;;  %v4033_v48 = vld [vmem:[%s4904_s2 + $0x54] sm:$0xf]  ;;  %v3592_v49 = vld [vmem:[%s4904_s2 + $0x58] sm:$0xf0]  ;;  %v3591_v50 = vor.u32 %v4034_v47, %v3590_v46  ;;  %v3598_v52 = vld [vmem:[%s4904_s2 + $0x60] sm:$0xf] }
  0x66   : > { %771 = vmatpush.bf16.msra.mxu1 %v4003_v7  ;;  %v3595_v51 = vor.u32 %v4033_v48, %v3592_v49  ;;  %v4036_v53 = vld [vmem:[%s4904_s2 + $0x64] sm:$0xf0]  ;;  %v4035_v54 = vld [vmem:[%s4904_s2 + $0x64] sm:$0xf]  ;;  %v3600_v55 = vld [vmem:[%s4904_s2 + $0x68] sm:$0xf0] }
  0x67   : > { %v3599_v56 = vor.u32 %v4036_v53, %v3598_v52  ;;  %v3603_v57 = vor.u32 %v4035_v54, %v3600_v55  ;;  %v3750_v58 = vld [vmem:[#allocation7 + $0x70] sm:$0xf]  ;;  %v4022_v59 = vld [vmem:[#allocation7 + $0x74] sm:$0xf0]  ;;  %v4021_v60 = vld [vmem:[#allocation7 + $0x74] sm:$0xf] }
  0x68   : > { %v4952_v61 = vor.u32 %v4022_v59, %v3750_v58  ;;  %v3752_v62 = vld [vmem:[#allocation7 + $0x78] sm:$0xf0]  ;;  %v3606_v63 = vld [vmem:[%s4904_s2 + $0x70] sm:$0xf]  ;;  %v3726_v18 = vld [vmem:[#allocation7 + $0x40] sm:$0xf] }
  0x69   : > { %723 = vmatpush.bf16.msra.mxu0 %v3994_v8  ;;  %v3736_v16 = vld [vmem:[#allocation7 + $0x58] sm:$0xf0]  ;;  %v4016_v19 = vld [vmem:[#allocation7 + $0x44] sm:$0xf0]  ;;  %v3728_v22 = vld [vmem:[#allocation7 + $0x48] sm:$0xf0] }
  0x6a   : > { %772 = vmatpush.bf16.msra.mxu1 %v4002_v9  ;;  %1257 = vmatpush.bf16.msra.mxu2 %v4952_v61  ;;  %v3718_v24 = vld [vmem:[#allocation7 + $0x30] sm:$0xf]  ;;  %v4014_v25 = vld [vmem:[#allocation7 + $0x34] sm:$0xf0]  ;;  %v3720_v28 = vld [vmem:[#allocation7 + $0x38] sm:$0xf0] }
  0x6b   : > { %v4987_v30 = vld [vmem:[%s6494_s3] ss:$0 sm:$0xff]  ;;  %v3712_v35 = vld [vmem:[#allocation7 + $0x28] sm:$0xf0]  ;;  %v3702_v40 = vld [vmem:[#allocation7 + $0x10] sm:$0xf] }
  0x6c   : > { %v3710_v31 = vld [vmem:[#allocation7 + $0x20] sm:$0xf]  ;;  %v4010_v41 = vld [vmem:[#allocation7 + $0x14] sm:$0xf0]  ;;  %v4009_v42 = vld [vmem:[#allocation7 + $0x14] sm:$0xf] }
  0x6d   : > { %724 = vmatpush.bf16.msra.mxu0 %v3993_v10  ;;  %v4998_v43 = vor.u32 %v4010_v41, %v3702_v40  ;;  %v3694_v48 = vld [vmem:[#allocation7] sm:$0xf]  ;;  %v4008_v49 = vld [vmem:[#allocation7 + $0x4] sm:$0xf0]  ;;  %v3696_v52 = vld [vmem:[#allocation7 + $0x8] sm:$0xf0] }
  0x6e   : > { %773 = vmatpush.bf16.msra.mxu1 %v4001_v11  ;;  %v1122_v40 = vld [vmem:[%s4918_s18 + $0x8] sm:$0xff] }
  0x71   : > { %725 = vmatpush.bf16.msra.mxu0 %v3992_v12 }
  0x72   : > { %774 = vmatpush.bf16.msra.mxu1 %v4000_v13 }
  0x75   : > { %726 = vmatpush.bf16.msra.mxu0 %v3991_v14 }
  0x76   : > { %775 = vmatpush.bf16.msra.mxu1 %v3999_v15 }
  0x78   : > { %727 = vmatmul.bf16.vlgmr.msra.gmra.mxu0 %v3551_v20  ;;  %v4015_v20 = vld [vmem:[#allocation7 + $0x44] sm:$0xf] }
  0x79   : > { %2075 = vmatpush.bf16.msrb.mxu0 %v3998_v0  ;;  %776 = vmatmul.bf16.vlgmr.msra.gmra.mxu1 %v3555_v21  ;;  %v4955_v0 = vor.u32 %v4021_v60, %v3752_v62  ;;  %v4974_v21 = vor.u32 %v4016_v19, %v3726_v18  ;;  %v4976_v23 = vor.u32 %v4015_v20, %v3728_v22 }
  0x7a   : > { %2124 = vmatpush.bf16.msrb.mxu1 %v4006_v1  ;;  %v4038_v1 = vld [vmem:[%s4904_s2 + $0x74] sm:$0xf0] }
  0x7b   : > { %1306 = vmatpush.bf16.msra.mxu3 %v4955_v0 }
  0x7d   : > { %2076 = vmatpush.bf16.msrb.mxu0 %v3997_v2  ;;  %v4037_v2 = vld [vmem:[%s4904_s2 + $0x74] sm:$0xf] }
  0x7e   : > { %2125 = vmatpush.bf16.msrb.mxu1 %v4005_v3  ;;  %v3608_v3 = vld [vmem:[%s4904_s2 + $0x78] sm:$0xf0]  ;;  %s3385_s2 = sshll.u32 %s3382_s9, 4  ;;  %s3386_s2 = int_to_ptr.hbm [resolvable:$true] %s3385_s2 }
  0x7f   : > { %s4630_s15 = sshra.s32 %s3386_s2, 4  ;;  %s4631_s15 = int_to_ptr.hbm [resolvable:$true] %s4630_s15 }
  0x80   : > { %s4632_s30 = scalar_lea.hbm %s4631_s15, 256  ;;  %p4637_p13 = scmp.lt.s32.totalorder %s4631_s15, %s6498_s7 }
  0x81   : > { %2077 = vmatpush.bf16.msrb.mxu0 %v3996_v4  ;;  %v3742_v4 = vld [vmem:[#allocation7 + $0x60] sm:$0xf]  ;;  %p4633_p4 = scmp.ne.s32.totalorder %s4631_s15, %s4632_s30  ;;  %p4638_p3 = scmp.lt.s32.totalorder %s4636_s21, %s4632_s30 }
  0x82   : > { %2126 = vmatpush.bf16.msrb.mxu1 %v4004_v5  ;;  %v4020_v5 = vld [vmem:[#allocation7 + $0x64] sm:$0xf0] }
  0x83   : > { %p4634_p5 = pnand %p4633_p4, %p4807_p11  ;;  %p4639_p7 = por %p4638_p3, %p4637_p13 }
  0x85   : > { %2078 = vmatpush.bf16.msrb.mxu0 %v3995_v6  ;;  %v4019_v6 = vld [vmem:[#allocation7 + $0x64] sm:$0xf]  ;;  %p4635_p6 = pneg %p4634_p5 }
  0x86   : > { %2127 = vmatpush.bf16.msrb.mxu1 %v4003_v7  ;;  %v4962_v7 = vor.u32 %v4020_v5, %v3742_v4 }
  0x87   : > { %p4640_p8 = pnand %p4639_p7, %p4635_p6 }
  0x88   : > { %732 = vmatmul.bf16.gmra.mxu0 %v3559_v26  ;;  %1258 = vmatpush.bf16.msra.mxu2 %v4962_v7  ;;  %v4013_v26 = vld [vmem:[#allocation7 + $0x34] sm:$0xf] }
  0x89   : > { %2079 = vmatpush.bf16.msrb.mxu0 %v3994_v8  ;;  %781 = vmatmul.bf16.gmra.mxu1 %v3563_v27  ;;  %v3744_v8 = vld [vmem:[#allocation7 + $0x68] sm:$0xf0]  ;;  %v4980_v27 = vor.u32 %v4014_v25, %v3718_v24  ;;  %v4982_v29 = vor.u32 %v4013_v26, %v3720_v28 }
  0x8a   : > { %2128 = vmatpush.bf16.msrb.mxu1 %v4002_v9  ;;  %v3607_v9 = vor.u32 %v4038_v1, %v3606_v63 }
  0x8d   : > { %2080 = vmatpush.bf16.msrb.mxu0 %v3993_v10  ;;  %v3611_v10 = vor.u32 %v4037_v2, %v3608_v3 }
  0x8e   : > { %2129 = vmatpush.bf16.msrb.mxu1 %v4001_v11  ;;  %v4964_v11 = vor.u32 %v4019_v6, %v3744_v8 }
  0x90   : > { %1307 = vmatpush.bf16.msra.mxu3 %v4964_v11 }
  0x91   : > { %2081 = vmatpush.bf16.msrb.mxu0 %v3992_v12  ;;  %v3734_v12 = vld [vmem:[#allocation7 + $0x50] sm:$0xf] }
  0x92   : > { %2130 = vmatpush.bf16.msrb.mxu1 %v4000_v13  ;;  %v4018_v13 = vld [vmem:[#allocation7 + $0x54] sm:$0xf0] }
  0x95   : > { %2082 = vmatpush.bf16.msrb.mxu0 %v3991_v14  ;;  %v4017_v14 = vld [vmem:[#allocation7 + $0x54] sm:$0xf] }
  0x96   : > { %2131 = vmatpush.bf16.msrb.mxu1 %v3999_v15  ;;  %v4968_v15 = vor.u32 %v4018_v13, %v3734_v12  ;;  %v4970_v17 = vor.u32 %v4017_v14, %v3736_v16 }
  0x98   : > { %737 = vmatmul.bf16.gmra.mxu0 %v3567_v32  ;;  %1259 = vmatpush.bf16.msra.mxu2 %v4968_v15  ;;  %v4012_v32 = vld [vmem:[#allocation7 + $0x24] sm:$0xf0] }
  0x99   : > { %786 = vmatmul.bf16.gmra.mxu1 %v3571_v33  ;;  %1308 = vmatpush.bf16.msra.mxu3 %v4970_v17  ;;  %v4011_v33 = vld [vmem:[#allocation7 + $0x24] sm:$0xf]  ;;  %v4991_v34 = vor.u32 %v4012_v32, %v3710_v31 }
  0x9a   : > { %v4993_v36 = vor.u32 %v4011_v33, %v3712_v35 }
  0x9c   : > { %1260 = vmatpush.bf16.msra.mxu2 %v4974_v21 }
  0x9d   : > { %1309 = vmatpush.bf16.msra.mxu3 %v4976_v23 }
  0xa0   : > { %1261 = vmatpush.bf16.msra.mxu2 %v4980_v27 }
  0xa1   : > { %1310 = vmatpush.bf16.msra.mxu3 %v4982_v29 }
  0xa4   : > { %1262 = vmatpush.bf16.msra.mxu2 %v4991_v34 }
  0xa5   : > { %1311 = vmatpush.bf16.msra.mxu3 %v4993_v36 }
  0xa8   : > { %742 = vmatmul.bf16.gmra.mxu0 %v3575_v38  ;;  %1263 = vmatpush.bf16.msra.mxu2 %v4998_v43 }
  0xa9   : > { %791 = vmatmul.bf16.gmra.mxu1 %v3579_v39 }
  0xb8   : > { %747 = vmatmul.bf16.gmra.mxu0 %v3583_v44  ;;  %v3704_v44 = vld [vmem:[#allocation7 + $0x18] sm:$0xf0] }
  0xb9   : > { %796 = vmatmul.bf16.gmra.mxu1 %v3587_v45  ;;  %v5000_v46 = vor.u32 %v4009_v42, %v3704_v44 }
  0xbb   : > { %1312 = vmatpush.bf16.msra.mxu3 %v5000_v46 }
  0xc8   : > { %752 = vmatmul.bf16.gmra.mxu0 %v3591_v50  ;;  %v5004_v50 = vor.u32 %v4008_v49, %v3694_v48  ;;  %v4711_v49 = vmov 1.0|1.0  }
  0xc9   : > { %801 = vmatmul.bf16.gmra.mxu1 %v3595_v51  ;;  %v4007_v51 = vld [vmem:[#allocation7 + $0x4] sm:$0xf] }
  0xca   : > { %v5006_v53 = vor.u32 %v4007_v51, %v3696_v52  ;;  %1264 = vmatpush.bf16.msra.mxu2 %v5004_v50 }
  0xcc   : > { %1313 = vmatpush.bf16.msra.mxu3 %v5006_v53 }
  0xce   : > { %2534 = vmatpush.bf16.msrb.mxu2 %v4952_v61 }
  0xd0   : > { %2583 = vmatpush.bf16.msrb.mxu3 %v4955_v0 }
  0xd2   : > { %2535 = vmatpush.bf16.msrb.mxu2 %v4962_v7 }
  0xd4   : > { %2584 = vmatpush.bf16.msrb.mxu3 %v4964_v11 }
  0xd6   : > { %2536 = vmatpush.bf16.msrb.mxu2 %v4968_v15 }
  0xd8   : > { %757 = vmatmul.bf16.gmra.mxu0 %v3599_v56  ;;  %2585 = vmatpush.bf16.msrb.mxu3 %v4970_v17 }
  0xd9   : > { %806 = vmatmul.bf16.gmra.mxu1 %v3603_v57 }
  0xda   : > { %2537 = vmatpush.bf16.msrb.mxu2 %v4974_v21 }
  0xdc   : > { %2586 = vmatpush.bf16.msrb.mxu3 %v4976_v23 }
  0xde   : > { %2538 = vmatpush.bf16.msrb.mxu2 %v4980_v27 }
  0xe0   : > { %2587 = vmatpush.bf16.msrb.mxu3 %v4982_v29 }
  0xe2   : > { %2539 = vmatpush.bf16.msrb.mxu2 %v4991_v34 }
  0xe4   : > { %2588 = vmatpush.bf16.msrb.mxu3 %v4993_v36 }
  0xe6   : > { %2540 = vmatpush.bf16.msrb.mxu2 %v4998_v43 }
  0xe8   : > { %762 = vmatmul.bf16.gmra.mxu0 %v3607_v9  ;;  %2589 = vmatpush.bf16.msrb.mxu3 %v5000_v46 }
  0xe9   : > { %811 = vmatmul.bf16.gmra.mxu1 %v3611_v10 }
  0xea   : > { %2541 = vmatpush.bf16.msrb.mxu2 %v5004_v50 }
  0xec   : > { %2590 = vmatpush.bf16.msrb.mxu3 %v5006_v53 }
  0xf5   : > { %v728_v37 = vpop.f32.mrf.mxu0 }
  0xf6   : > { %v777_v38 = vpop.f32.mrf.mxu1  ;;  %v729_v39 = vadd.f32 %v4987_v30, %v728_v37 }
  0xf8   : > { %v778_v45 = vadd.f32 %v777_v38, %v729_v39  ;;  %v1121_v39 = vld [vmem:[%s4918_s18] sm:$0xff] }
  0xfa   : > { %v3676_v47 = vmul.f32 -1.442695, %v778_v45 }
  0xfc   : > { %4143 = vpow2.f32 %v3676_v47 }
  0xfd   : > { %v730_v54 = vpop.f32.mrf.mxu0 }
  0xfe   : > { %v779_v55 = vpop.f32.mrf.mxu1  ;;  %v731_v56 = vadd.f32 %v4987_v30, %v730_v54 }
 0x100   : > { %v780_v57 = vadd.f32 %v779_v55, %v731_v56 }
 0x102   : > { %v4144_v58 = vpop.eup %4143  ;;  %v3677_v59 = vmul.f32 -1.442695, %v780_v57 }
 0x103   : > { %v865_v60 = vadd.f32 1.0, %v4144_v58 }
 0x104   : > { %4145 = vpow2.f32 %v3677_v59 }
 0x105   : > { %4147 = vrcp.f32 %v865_v60  ;;  %v733_v62 = vpop.f32.mrf.mxu0  ;;  %v892_v20 = vand.u32 2147483648, %v865_v60  ;;  %vm886_vm1 = vweird.f32 %v865_v60  ;;  %v890_v22 = vand.u32 2147483647, %v865_v60 }
 0x106   : > { %v782_v63 = vpop.f32.mrf.mxu1  ;;  %v734_v1 = vadd.f32 %v4987_v30, %v733_v62 }
 0x107   : > { %v893_v31 = vor.u32 1.1754944e-38, %v892_v20  ;;  %vm891_vm4 = vcmp.eq.f32.partialorder %v890_v22, 8.507059e+37 }
 0x108   : > { %v783_v61 = vadd.f32 %v782_v63, %v734_v1 }
 0x10a   : > { %v4146_v0 = vpop.eup %4145  ;;  %v3678_v2 = vmul.f32 -1.442695, %v783_v61 }
 0x10b   : > { %v4148_v3 = vpop.eup %4147  ;;  %v866_v4 = vadd.f32 1.0, %v4146_v0 }
 0x10c   : > { %4149 = vpow2.f32 %v3678_v2  ;;  %v882_v5 = vmul.f32 %v4148_v3, %v865_v60  ;;  %vm887_vm0 = vweird.f32 %v4148_v3 }
 0x10d   : > { %4151 = vrcp.f32 %v866_v4  ;;  %v735_v6 = vpop.f32.mrf.mxu0  ;;  %vm5030_vm2 = vmor %vm886_vm1, %vm887_vm0  ;;  %v905_v25 = vand.u32 2147483647, %v866_v4  ;;  %v907_v26 = vand.u32 2147483648, %v866_v4  ;;  %vm901_vm5 = vweird.f32 %v866_v4 }
 0x10e   : > { %v784_v7 = vpop.f32.mrf.mxu1  ;;  %v736_v8 = vadd.f32 %v4987_v30, %v735_v6  ;;  %v883_v9 = vsub.f32 1.0, %v882_v5 }
 0x10f   : > { %v908_v38 = vor.u32 1.1754944e-38, %v907_v26  ;;  %vm906_vm7 = vcmp.eq.f32.partialorder %v905_v25, 8.507059e+37 }
 0x110   : > { %v785_v10 = vadd.f32 %v784_v7, %v736_v8  ;;  %v884_v11 = vmul.f32 %v4148_v3, %v883_v9 }
 0x112   : > { %v4150_v12 = vpop.eup %4149  ;;  %v3679_v13 = vmul.f32 -1.442695, %v785_v10  ;;  %v885_v16 = vadd.f32 %v4148_v3, %v884_v11 }
 0x113   : > { %v4152_v14 = vpop.eup %4151  ;;  %v5024_v15 = vadd.f32 1.0, %v4150_v12 }
 0x114   : > { %4153 = vpow2.f32 %v3679_v13  ;;  %v897_v17 = vmul.f32 %v4152_v14, %v866_v4  ;;  %v889_v28 = vsel %vm5030_vm2, %v4148_v3, %v885_v16  ;;  %vm902_vm3 = vweird.f32 %v4152_v14  ;;  %v1123_v13 = vld [vmem:[%s4918_s18 + $0x10] sm:$0xff] }
 0x115   : > { %4155 = vrcp.f32 %v5024_v15  ;;  %v738_v18 = vpop.f32.mrf.mxu0  ;;  %v894_v37 = vsel %vm891_vm4, %v893_v31, %v889_v28  ;;  %vm903_vm6 = vmor %vm901_vm5, %vm902_vm3  ;;  %v922_v59 = vand.u32 2147483648, %v5024_v15  ;;  %vm916_vm12 = vweird.f32 %v5024_v15 }
 0x116   : > { %v787_v19 = vpop.f32.mrf.mxu1  ;;  %v739_v21 = vadd.f32 %v4987_v30, %v738_v18  ;;  %v898_v23 = vsub.f32 1.0, %v897_v17  ;;  %vm1137_vm8 = vcmp.gt.f32.partialorder %v894_v37, %v1121_v39  ;;  %v920_v62 = vand.u32 2147483647, %v5024_v15 }
 0x117   : > { %v923_v5 = vor.u32 1.1754944e-38, %v922_v59 }
 0x118   : > { %v788_v27 = vadd.f32 %v787_v19, %v739_v21  ;;  %v899_v29 = vmul.f32 %v4152_v14, %v898_v23  ;;  %vm921_vm15 = vcmp.eq.f32.partialorder %v920_v62, 8.507059e+37 }
 0x11a   : > { %v4154_v32 = vpop.eup %4153  ;;  %v3680_v33 = vmul.f32 -1.442695, %v788_v27  ;;  %v900_v34 = vadd.f32 %v4152_v14, %v899_v29 }
 0x11b   : > { %v4156_v35 = vpop.eup %4155  ;;  %v5038_v36 = vadd.f32 1.0, %v4154_v32 }
 0x11c   : > { %4157 = vpow2.f32 %v3680_v33  ;;  %v904_v41 = vsel %vm903_vm6, %v4152_v14, %v900_v34  ;;  %v912_v42 = vmul.f32 %v4156_v35, %v5024_v15  ;;  %vm917_vm11 = vweird.f32 %v4156_v35  ;;  %v1124_v14 = vld [vmem:[%s4918_s18 + $0x18] sm:$0xff] }
 0x11d   : > { %4159 = vrcp.f32 %v5038_v36  ;;  %v740_v43 = vpop.f32.mrf.mxu0  ;;  %v909_v45 = vsel %vm906_vm7, %v908_v38, %v904_v41  ;;  %vm5056_vm13 = vmor %vm916_vm12, %vm917_vm11  ;;  %v935_v61 = vand.u32 2147483647, %v5038_v36  ;;  %v937_v0 = vand.u32 2147483648, %v5038_v36 }
 0x11e   : > { %v789_v44 = vpop.f32.mrf.mxu1  ;;  %v741_v46 = vadd.f32 %v4987_v30, %v740_v43  ;;  %vm1138_vm9 = vcmp.gt.f32.partialorder %v909_v45, %v1122_v40  ;;  %v913_v47 = vsub.f32 1.0, %v912_v42  ;;  %vm931_vm0 = vweird.f32 %v5038_v36 }
 0x11f   : > { %vm3756_vm10 = vmpackc.low %vm1138_vm9, %vm1137_vm8  ;;  %v938_v12 = vor.u32 1.1754944e-38, %v937_v0  ;;  %vm936_vm2 = vcmp.eq.f32.partialorder %v935_v61, 8.507059e+37 }
 0x120   : > { %v790_v48 = vadd.f32 %v789_v44, %v741_v46  ;;  %3757 = vmatmul.msk.bf16.vlgmr.msra.gmra.mxu2 %vm3756_vm10, %v4711_v49  ;;  %3773 = vmatmul.msk.bf16.vlgmr.msra.gmra.mxu3 %vm3756_vm10, %v4711_v49  ;;  %v914_v50 = vmul.f32 %v4156_v35, %v913_v47 }
 0x122   : > { %v4158_v51 = vpop.eup %4157  ;;  %v3681_v52 = vmul.f32 -1.442695, %v790_v48  ;;  %v915_v55 = vadd.f32 %v4156_v35, %v914_v50 }
 0x123   : > { %v4160_v53 = vpop.eup %4159  ;;  %v5048_v54 = vadd.f32 1.0, %v4158_v51 }
 0x124   : > { %4161 = vpow2.f32 %v3681_v52  ;;  %v927_v56 = vmul.f32 %v4160_v53, %v5038_v36  ;;  %v919_v3 = vsel %vm5056_vm13, %v4156_v35, %v915_v55  ;;  %vm932_vm14 = vweird.f32 %v4160_v53  ;;  %v1125_v52 = vld [vmem:[%s4918_s18 + $0x20] sm:$0xff] }
 0x125   : > { %4163 = vrcp.f32 %v5048_v54  ;;  %v743_v57 = vpop.f32.mrf.mxu0  ;;  %v924_v11 = vsel %vm921_vm15, %v923_v5, %v919_v3  ;;  %vm933_vm1 = vmor %vm931_vm0, %vm932_vm14  ;;  %v952_v33 = vand.u32 2147483648, %v5048_v54  ;;  %vm946_vm7 = vweird.f32 %v5048_v54 }
 0x126   : > { %v792_v58 = vpop.f32.mrf.mxu1  ;;  %v744_v60 = vadd.f32 %v4987_v30, %v743_v57  ;;  %v928_v63 = vsub.f32 1.0, %v927_v56  ;;  %vm1139_vm3 = vcmp.gt.f32.partialorder %v924_v11, %v1123_v13  ;;  %v950_v35 = vand.u32 2147483647, %v5048_v54 }
 0x127   : > { %v953_v43 = vor.u32 1.1754944e-38, %v952_v33 }
 0x128   : > { %v793_v2 = vadd.f32 %v792_v58, %v744_v60  ;;  %v929_v4 = vmul.f32 %v4160_v53, %v928_v63  ;;  %vm951_vm10 = vcmp.eq.f32.partialorder %v950_v35, 8.507059e+37 }
 0x12a   : > { %v4162_v6 = vpop.eup %4161  ;;  %v3682_v7 = vmul.f32 -1.442695, %v793_v2  ;;  %v930_v8 = vadd.f32 %v4160_v53, %v929_v4 }
 0x12b   : > { %v4164_v9 = vpop.eup %4163  ;;  %v870_v10 = vadd.f32 1.0, %v4162_v6 }
 0x12c   : > { %4165 = vpow2.f32 %v3682_v7  ;;  %v934_v15 = vsel %vm933_vm1, %v4160_v53, %v930_v8  ;;  %v942_v16 = vmul.f32 %v4164_v9, %v5048_v54  ;;  %vm947_vm6 = vweird.f32 %v4164_v9  ;;  %v1126_v53 = vld [vmem:[%s4918_s18 + $0x28] sm:$0xff] }
 0x12d   : > { %4167 = vrcp.f32 %v870_v10  ;;  %v745_v17 = vpop.f32.mrf.mxu0  ;;  %v939_v19 = vsel %vm936_vm2, %v938_v12, %v934_v15  ;;  %vm5078_vm8 = vmor %vm946_vm7, %vm947_vm6  ;;  %v965_v38 = vand.u32 2147483647, %v870_v10  ;;  %v967_v39 = vand.u32 2147483648, %v870_v10 }
 0x12e   : > { %v794_v18 = vpop.f32.mrf.mxu1  ;;  %v746_v20 = vadd.f32 %v4987_v30, %v745_v17  ;;  %vm1140_vm4 = vcmp.gt.f32.partialorder %v939_v19, %v1124_v14  ;;  %v943_v21 = vsub.f32 1.0, %v942_v16  ;;  %vm961_vm11 = vweird.f32 %v870_v10 }
 0x12f   : > { %vm3758_vm5 = vmpackc.low %vm1140_vm4, %vm1139_vm3  ;;  %v968_v51 = vor.u32 1.1754944e-38, %v967_v39  ;;  %vm966_vm13 = vcmp.eq.f32.partialorder %v965_v38, 8.507059e+37 }
 0x130   : > { %v795_v22 = vadd.f32 %v794_v18, %v746_v20  ;;  %3759 = vmatmul.msk.bf16.gmra.mxu2 %vm3758_vm5, %v4711_v49  ;;  %3775 = vmatmul.msk.bf16.gmra.mxu3 %vm3758_vm5, %v4711_v49  ;;  %v944_v23 = vmul.f32 %v4164_v9, %v943_v21 }
 0x132   : > { %v4166_v24 = vpop.eup %4165  ;;  %v3683_v25 = vmul.f32 -1.442695, %v795_v22  ;;  %v945_v28 = vadd.f32 %v4164_v9, %v944_v23 }
 0x133   : > { %v4168_v26 = vpop.eup %4167  ;;  %v5071_v27 = vadd.f32 1.0, %v4166_v24 }
 0x134   : > { %4169 = vpow2.f32 %v3683_v25  ;;  %v957_v29 = vmul.f32 %v4168_v26, %v870_v10  ;;  %v949_v41 = vsel %vm5078_vm8, %v4164_v9, %v945_v28  ;;  %vm962_vm9 = vweird.f32 %v4168_v26  ;;  %v1127_v25 = vld [vmem:[%s4918_s18 + $0x30] sm:$0xff] }
 0x135   : > { %4171 = vrcp.f32 %v5071_v27  ;;  %v748_v31 = vpop.f32.mrf.mxu0  ;;  %v954_v50 = vsel %vm951_vm10, %v953_v43, %v949_v41  ;;  %vm963_vm12 = vmor %vm961_vm11, %vm962_vm9  ;;  %v982_v7 = vand.u32 2147483648, %v5071_v27  ;;  %vm976_vm2 = vweird.f32 %v5071_v27 }
 0x136   : > { %v797_v32 = vpop.f32.mrf.mxu1  ;;  %v749_v34 = vadd.f32 %v4987_v30, %v748_v31  ;;  %v958_v36 = vsub.f32 1.0, %v957_v29  ;;  %vm1141_vm14 = vcmp.gt.f32.partialorder %v954_v50, %v1125_v52  ;;  %v980_v9 = vand.u32 2147483647, %v5071_v27 }
 0x137   : > { %v983_v17 = vor.u32 1.1754944e-38, %v982_v7 }
 0x138   : > { %v798_v40 = vadd.f32 %v797_v32, %v749_v34  ;;  %v959_v42 = vmul.f32 %v4168_v26, %v958_v36  ;;  %vm981_vm5 = vcmp.eq.f32.partialorder %v980_v9, 8.507059e+37 }
 0x13a   : > { %v4170_v44 = vpop.eup %4169  ;;  %v3684_v45 = vmul.f32 -1.442695, %v798_v40  ;;  %v960_v46 = vadd.f32 %v4168_v26, %v959_v42 }
 0x13b   : > { %v4172_v47 = vpop.eup %4171  ;;  %v872_v48 = vadd.f32 1.0, %v4170_v44 }
 0x13c   : > { %4173 = vpow2.f32 %v3684_v45  ;;  %v964_v54 = vsel %vm963_vm12, %v4168_v26, %v960_v46  ;;  %v972_v55 = vmul.f32 %v4172_v47, %v5071_v27  ;;  %vm977_vm1 = vweird.f32 %v4172_v47  ;;  %v1128_v26 = vld [vmem:[%s4918_s18 + $0x38] sm:$0xff] }
 0x13d   : > { %4175 = vrcp.f32 %v872_v48  ;;  %v750_v56 = vpop.f32.mrf.mxu0  ;;  %v969_v58 = vsel %vm966_vm13, %v968_v51, %v964_v54  ;;  %vm5097_vm3 = vmor %vm976_vm2, %vm977_vm1  ;;  %v995_v12 = vand.u32 2147483647, %v872_v48  ;;  %v997_v13 = vand.u32 2147483648, %v872_v48 }
 0x13e   : > { %v799_v57 = vpop.f32.mrf.mxu1  ;;  %v751_v59 = vadd.f32 %v4987_v30, %v750_v56  ;;  %vm1142_vm15 = vcmp.gt.f32.partialorder %v969_v58, %v1126_v53  ;;  %v973_v60 = vsub.f32 1.0, %v972_v55  ;;  %vm991_vm6 = vweird.f32 %v872_v48 }
 0x13f   : > { %vm3760_vm0 = vmpackc.low %vm1142_vm15, %vm1141_vm14  ;;  %v998_v24 = vor.u32 1.1754944e-38, %v997_v13  ;;  %vm996_vm8 = vcmp.eq.f32.partialorder %v995_v12, 8.507059e+37 }
 0x140   : > { %v800_v62 = vadd.f32 %v799_v57, %v751_v59  ;;  %3761 = vmatmul.msk.bf16.gmra.mxu2 %vm3760_vm0, %v4711_v49  ;;  %3777 = vmatmul.msk.bf16.gmra.mxu3 %vm3760_vm0, %v4711_v49  ;;  %v974_v63 = vmul.f32 %v4172_v47, %v973_v60 }
 0x142   : > { %v4174_v1 = vpop.eup %4173  ;;  %v3685_v61 = vmul.f32 -1.442695, %v800_v62  ;;  %v975_v3 = vadd.f32 %v4172_v47, %v974_v63 }
 0x143   : > { %v4176_v0 = vpop.eup %4175  ;;  %v5090_v2 = vadd.f32 1.0, %v4174_v1 }
 0x144   : > { %4177 = vpow2.f32 %v3685_v61  ;;  %v987_v4 = vmul.f32 %v4176_v0, %v872_v48  ;;  %v979_v15 = vsel %vm5097_vm3, %v4172_v47, %v975_v3  ;;  %vm992_vm4 = vweird.f32 %v4176_v0  ;;  %v1129_v61 = vld [vmem:[%s4918_s18 + $0x40] sm:$0xff] }
 0x145   : > { %4179 = vrcp.f32 %v5090_v2  ;;  %v753_v5 = vpop.f32.mrf.mxu0  ;;  %v984_v23 = vsel %vm981_vm5, %v983_v17, %v979_v15  ;;  %vm993_vm7 = vmor %vm991_vm6, %vm992_vm4  ;;  %v1012_v45 = vand.u32 2147483648, %v5090_v2  ;;  %vm1006_vm13 = vweird.f32 %v5090_v2 }
 0x146   : > { %v802_v6 = vpop.f32.mrf.mxu1  ;;  %v754_v8 = vadd.f32 %v4987_v30, %v753_v5  ;;  %v988_v10 = vsub.f32 1.0, %v987_v4  ;;  %vm1143_vm9 = vcmp.gt.f32.partialorder %v984_v23, %v1127_v25  ;;  %v1010_v47 = vand.u32 2147483647, %v5090_v2 }
 0x147   : > { %v1013_v56 = vor.u32 1.1754944e-38, %v1012_v45 }
 0x148   : > { %v803_v14 = vadd.f32 %v802_v6, %v754_v8  ;;  %v989_v16 = vmul.f32 %v4176_v0, %v988_v10  ;;  %vm1011_vm0 = vcmp.eq.f32.partialorder %v1010_v47, 8.507059e+37 }
 0x14a   : > { %v4178_v18 = vpop.eup %4177  ;;  %v3686_v19 = vmul.f32 -1.442695, %v803_v14  ;;  %v990_v20 = vadd.f32 %v4176_v0, %v989_v16 }
 0x14b   : > { %v4180_v21 = vpop.eup %4179  ;;  %v874_v22 = vadd.f32 1.0, %v4178_v18 }
 0x14c   : > { %4181 = vpow2.f32 %v3686_v19  ;;  %v994_v27 = vsel %vm993_vm7, %v4176_v0, %v990_v20  ;;  %v1002_v28 = vmul.f32 %v4180_v21, %v5090_v2  ;;  %vm1007_vm12 = vweird.f32 %v4180_v21  ;;  %v1130_v0 = vld [vmem:[%s4918_s18 + $0x48] sm:$0xff] }
 0x14d   : > { %4183 = vrcp.f32 %v874_v22  ;;  %v755_v29 = vpop.f32.mrf.mxu0  ;;  %v999_v32 = vsel %vm996_vm8, %v998_v24, %v994_v27  ;;  %vm5116_vm14 = vmor %vm1006_vm13, %vm1007_vm12  ;;  %v1025_v51 = vand.u32 2147483647, %v874_v22  ;;  %v1027_v52 = vand.u32 2147483648, %v874_v22 }
 0x14e   : > { %v804_v31 = vpop.f32.mrf.mxu1  ;;  %v756_v33 = vadd.f32 %v4987_v30, %v755_v29  ;;  %vm1144_vm10 = vcmp.gt.f32.partialorder %v999_v32, %v1128_v26  ;;  %v1003_v34 = vsub.f32 1.0, %v1002_v28  ;;  %vm1021_vm1 = vweird.f32 %v874_v22 }
 0x14f   : > { %vm3762_vm11 = vmpackc.low %vm1144_vm10, %vm1143_vm9  ;;  %v1028_v1 = vor.u32 1.1754944e-38, %v1027_v52  ;;  %vm1026_vm3 = vcmp.eq.f32.partialorder %v1025_v51, 8.507059e+37 }
 0x150   : > { %v805_v35 = vadd.f32 %v804_v31, %v756_v33  ;;  %3763 = vmatmul.msk.bf16.gmra.mxu2 %vm3762_vm11, %v4711_v49  ;;  %3779 = vmatmul.msk.bf16.gmra.mxu3 %vm3762_vm11, %v4711_v49  ;;  %v1004_v36 = vmul.f32 %v4180_v21, %v1003_v34 }
 0x152   : > { %v4182_v37 = vpop.eup %4181  ;;  %v3687_v38 = vmul.f32 -1.442695, %v805_v35  ;;  %v1005_v41 = vadd.f32 %v4180_v21, %v1004_v36 }
 0x153   : > { %v4184_v39 = vpop.eup %4183  ;;  %v5109_v40 = vadd.f32 1.0, %v4182_v37 }
 0x154   : > { %4185 = vpow2.f32 %v3687_v38  ;;  %v1017_v42 = vmul.f32 %v4184_v39, %v874_v22  ;;  %v1009_v54 = vsel %vm5116_vm14, %v4180_v21, %v1005_v41  ;;  %vm1022_vm15 = vweird.f32 %v4184_v39  ;;  %v1131_v38 = vld [vmem:[%s4918_s18 + $0x50] sm:$0xff] }
 0x155   : > { %4187 = vrcp.f32 %v5109_v40  ;;  %v758_v43 = vpop.f32.mrf.mxu0  ;;  %v1014_v63 = vsel %vm1011_vm0, %v1013_v56, %v1009_v54  ;;  %vm1023_vm2 = vmor %vm1021_vm1, %vm1022_vm15  ;;  %v1042_v19 = vand.u32 2147483648, %v5109_v40  ;;  %vm1036_vm8 = vweird.f32 %v5109_v40 }
 0x156   : > { %v807_v44 = vpop.f32.mrf.mxu1  ;;  %v759_v46 = vadd.f32 %v4987_v30, %v758_v43  ;;  %v1018_v48 = vsub.f32 1.0, %v1017_v42  ;;  %vm1145_vm4 = vcmp.gt.f32.partialorder %v1014_v63, %v1129_v61  ;;  %v1040_v21 = vand.u32 2147483647, %v5109_v40 }
 0x157   : > { %v1043_v29 = vor.u32 1.1754944e-38, %v1042_v19 }
 0x158   : > { %v808_v53 = vadd.f32 %v807_v44, %v759_v46  ;;  %v1019_v55 = vmul.f32 %v4184_v39, %v1018_v48  ;;  %vm1041_vm11 = vcmp.eq.f32.partialorder %v1040_v21, 8.507059e+37 }
 0x15a   : > { %v4186_v57 = vpop.eup %4185  ;;  %v3688_v58 = vmul.f32 -1.442695, %v808_v53  ;;  %v1020_v59 = vadd.f32 %v4184_v39, %v1019_v55 }
 0x15b   : > { %v4188_v60 = vpop.eup %4187  ;;  %v876_v62 = vadd.f32 1.0, %v4186_v57 }
 0x15c   : > { %4189 = vpow2.f32 %v3688_v58  ;;  %v1024_v2 = vsel %vm1023_vm2, %v4184_v39, %v1020_v59  ;;  %v1032_v3 = vmul.f32 %v4188_v60, %v5109_v40  ;;  %vm1037_vm7 = vweird.f32 %v4188_v60  ;;  %v1132_v39 = vld [vmem:[%s4918_s18 + $0x58] sm:$0xff] }
 0x15d   : > { %4191 = vrcp.f32 %v876_v62  ;;  %v760_v4 = vpop.f32.mrf.mxu0  ;;  %v1029_v6 = vsel %vm1026_vm3, %v1028_v1, %v1024_v2  ;;  %vm5135_vm9 = vmor %vm1036_vm8, %vm1037_vm7  ;;  %v1055_v24 = vand.u32 2147483647, %v876_v62  ;;  %v1057_v25 = vand.u32 2147483648, %v876_v62 }
 0x15e   : > { %v809_v5 = vpop.f32.mrf.mxu1  ;;  %v761_v7 = vadd.f32 %v4987_v30, %v760_v4  ;;  %vm1146_vm5 = vcmp.gt.f32.partialorder %v1029_v6, %v1130_v0  ;;  %v1033_v8 = vsub.f32 1.0, %v1032_v3  ;;  %vm1051_vm12 = vweird.f32 %v876_v62  ;;  %v1134_v6 = vld [vmem:[%s4918_s18 + $0x68] sm:$0xff] }
 0x15f   : > { %vm3764_vm6 = vmpackc.low %vm1146_vm5, %vm1145_vm4  ;;  %v1058_v37 = vor.u32 1.1754944e-38, %v1057_v25  ;;  %vm1056_vm14 = vcmp.eq.f32.partialorder %v1055_v24, 8.507059e+37 }
 0x160   : > { %v810_v9 = vadd.f32 %v809_v5, %v761_v7  ;;  %3765 = vmatmul.msk.bf16.gmra.mxu2 %vm3764_vm6, %v4711_v49  ;;  %3781 = vmatmul.msk.bf16.gmra.mxu3 %vm3764_vm6, %v4711_v49  ;;  %v1034_v10 = vmul.f32 %v4188_v60, %v1033_v8  ;;  %v1133_v5 = vld [vmem:[%s4918_s18 + $0x60] sm:$0xff] }
 0x162   : > { %v4190_v11 = vpop.eup %4189  ;;  %v3689_v12 = vmul.f32 -1.442695, %v810_v9  ;;  %v1035_v15 = vadd.f32 %v4188_v60, %v1034_v10 }
 0x163   : > { %v4192_v13 = vpop.eup %4191  ;;  %v5128_v14 = vadd.f32 1.0, %v4190_v11 }
 0x164   : > { %4193 = vpow2.f32 %v3689_v12  ;;  %v1047_v16 = vmul.f32 %v4192_v13, %v876_v62  ;;  %v1039_v27 = vsel %vm5135_vm9, %v4188_v60, %v1035_v15  ;;  %vm1052_vm10 = vweird.f32 %v4192_v13 }
 0x165   : > { %4195 = vrcp.f32 %v5128_v14  ;;  %v763_v17 = vpop.f32.mrf.mxu0  ;;  %v1044_v36 = vsel %vm1041_vm11, %v1043_v29, %v1039_v27  ;;  %vm1053_vm13 = vmor %vm1051_vm12, %vm1052_vm10  ;;  %vm1066_vm3 = vweird.f32 %v5128_v14  ;;  %v1070_v56 = vand.u32 2147483647, %v5128_v14  ;;  %v1136_v27 = vld [vmem:[%s4918_s18 + $0x78] sm:$0xff] }
 0x166   : > { %v812_v18 = vpop.f32.mrf.mxu1  ;;  %v764_v20 = vadd.f32 %v4987_v30, %v763_v17  ;;  %v1048_v22 = vsub.f32 1.0, %v1047_v16  ;;  %vm1147_vm15 = vcmp.gt.f32.partialorder %v1044_v36, %v1131_v38 }
 0x167   : > { %vm1071_vm6 = vcmp.eq.f32.partialorder %v1070_v56, 8.507059e+37 }
 0x168   : > { %v813_v26 = vadd.f32 %v812_v18, %v764_v20  ;;  %v1049_v28 = vmul.f32 %v4192_v13, %v1048_v22 }
 0x16a   : > { %v4194_v31 = vpop.eup %4193  ;;  %v3690_v32 = vmul.f32 -1.442695, %v813_v26  ;;  %v1050_v33 = vadd.f32 %v4192_v13, %v1049_v28  ;;  %v1135_v26 = vld [vmem:[%s4918_s18 + $0x70] sm:$0xff] }
 0x16b   : > { %v4196_v34 = vpop.eup %4195  ;;  %v878_v35 = vadd.f32 1.0, %v4194_v31  ;;  %v521_v31 = vld [vmem:[%s6495_s4] sm:$0x3] }
 0x16c   : > { %4197 = vpow2.f32 %v3690_v32  ;;  %v1054_v40 = vsel %vm1053_vm13, %v4192_v13, %v1050_v33  ;;  %v1062_v41 = vmul.f32 %v4196_v34, %v5128_v14  ;;  %vm1067_vm2 = vweird.f32 %v4196_v34 }
 0x16d   : > { %4199 = vrcp.f32 %v878_v35  ;;  %v765_v42 = vpop.f32.mrf.mxu0  ;;  %v1059_v43 = vsel %vm1056_vm14, %v1058_v37, %v1054_v40  ;;  %vm1068_vm4 = vmor %vm1066_vm3, %vm1067_vm2  ;;  %v1087_v58 = vand.u32 2147483648, %v878_v35  ;;  %v1085_v62 = vand.u32 2147483647, %v878_v35 }
 0x16e   : > { %v766_v44 = vadd.f32 %v4987_v30, %v765_v42  ;;  %vm1148_vm0 = vcmp.gt.f32.partialorder %v1059_v43, %v1132_v39  ;;  %v1063_v45 = vsub.f32 1.0, %v1062_v41  ;;  %v814_v46 = vpop.f32.mrf.mxu1  ;;  %v1072_v30 = vand.u32 2147483648, %v5128_v14 }
 0x16f   : > { %vm3766_vm1 = vmpackc.low %vm1148_vm0, %vm1147_vm15  ;;  %vm1081_vm7 = vweird.f32 %v878_v35  ;;  %v1088_v4 = vor.u32 1.1754944e-38, %v1087_v58  ;;  %vm1086_vm9 = vcmp.eq.f32.partialorder %v1085_v62, 8.507059e+37  ;;  %v5161_v32 = vperm.slane %v521_v31, 0 }
 0x170   : > { %v815_v47 = vadd.f32 %v814_v46, %v766_v44  ;;  %3767 = vmatmul.msk.bf16.gmra.mxu2 %vm3766_vm1, %v4711_v49  ;;  %3783 = vmatmul.msk.bf16.gmra.mxu3 %vm3766_vm1, %v4711_v49  ;;  %v1064_v48 = vmul.f32 %v4196_v34, %v1063_v45  ;;  %v1073_v63 = vor.u32 1.1754944e-38, %v1072_v30  ;;  %v5163_v33 = vperm.slane %v521_v31, 1  ;;  %v5313_v31 = vld [vmem:[%s5233_s19 + $0x20] sm:$0xff] }
 0x172   : > { %v4198_v50 = vpop.eup %4197  ;;  %v3691_v51 = vmul.f32 -1.442695, %v815_v47  ;;  %v1065_v54 = vadd.f32 %v4196_v34, %v1064_v48 }
 0x173   : > { %v4200_v52 = vpop.eup %4199  ;;  %v879_v53 = vadd.f32 1.0, %v4198_v50 }
 0x174   : > { %4201 = vpow2.f32 %v3691_v51  ;;  %v1077_v55 = vmul.f32 %v4200_v52, %v878_v35  ;;  %v1069_v59 = vsel %vm1068_vm4, %v4196_v34, %v1065_v54  ;;  %vm1082_vm5 = vweird.f32 %v4200_v52 }
 0x175   : > { %4203 = vrcp.f32 %v879_v53  ;;  %v1074_v3 = vsel %vm1071_vm6, %v1073_v63, %v1069_v59  ;;  %vm1083_vm8 = vmor %vm1081_vm7, %vm1082_vm5  ;;  %v1102_v15 = vand.u32 2147483648, %v879_v53  ;;  %vm1096_vm14 = vweird.f32 %v879_v53 }
 0x176   : > { %v1078_v57 = vsub.f32 1.0, %v1077_v55  ;;  %vm1149_vm10 = vcmp.gt.f32.partialorder %v1074_v3, %v1133_v5  ;;  %v1100_v16 = vand.u32 2147483647, %v879_v53 }
 0x177   : > { %v1103_v22 = vor.u32 1.1754944e-38, %v1102_v15 }
 0x178   : > { %v1079_v60 = vmul.f32 %v4200_v52, %v1078_v57  ;;  %vm1101_vm1 = vcmp.eq.f32.partialorder %v1100_v16, 8.507059e+37 }
 0x17a   : > { %v4202_v1 = vpop.eup %4201  ;;  %v1080_v61 = vadd.f32 %v4200_v52, %v1079_v60 }
 0x17b   : > { %v4204_v0 = vpop.eup %4203  ;;  %v880_v2 = vadd.f32 1.0, %v4202_v1 }
 0x17c   : > { %v1084_v7 = vsel %vm1083_vm8, %v4200_v52, %v1080_v61  ;;  %v1092_v8 = vmul.f32 %v4204_v0, %v879_v53  ;;  %vm1097_vm13 = vweird.f32 %v4204_v0 }
 0x17d   : > { %4205 = vrcp.f32 %v880_v2  ;;  %v1089_v9 = vsel %vm1086_vm9, %v1088_v4, %v1084_v7  ;;  %vm1098_vm15 = vmor %vm1096_vm14, %vm1097_vm13  ;;  %v1117_v18 = vand.u32 2147483648, %v880_v2  ;;  %v1115_v21 = vand.u32 2147483647, %v880_v2 }
 0x17e   : > { %vm1150_vm11 = vcmp.gt.f32.partialorder %v1089_v9, %v1134_v6  ;;  %v1093_v10 = vsub.f32 1.0, %v1092_v8  ;;  %vm1111_vm2 = vweird.f32 %v880_v2 }
 0x17f   : > { %vm3768_vm12 = vmpackc.low %vm1150_vm11, %vm1149_vm10  ;;  %v1118_v25 = vor.u32 1.1754944e-38, %v1117_v18  ;;  %vm1116_vm4 = vcmp.eq.f32.partialorder %v1115_v21, 8.507059e+37 }
 0x180   : > { %3769 = vmatmul.msk.bf16.gmra.mxu2 %vm3768_vm12, %v4711_v49  ;;  %3785 = vmatmul.msk.bf16.gmra.mxu3 %vm3768_vm12, %v4711_v49  ;;  %v1094_v11 = vmul.f32 %v4204_v0, %v1093_v10 }
 0x182   : > { %v1095_v13 = vadd.f32 %v4204_v0, %v1094_v11 }
 0x183   : > { %v4206_v12 = vpop.eup %4205 }
 0x184   : > { %v1107_v14 = vmul.f32 %v4206_v12, %v880_v2  ;;  %v1099_v19 = vsel %vm1098_vm15, %v4204_v0, %v1095_v13  ;;  %vm1112_vm0 = vweird.f32 %v4206_v12 }
 0x185   : > { %v1104_v24 = vsel %vm1101_vm1, %v1103_v22, %v1099_v19  ;;  %vm1113_vm3 = vmor %vm1111_vm2, %vm1112_vm0 }
 0x186   : > { %v1108_v17 = vsub.f32 1.0, %v1107_v14  ;;  %vm1151_vm5 = vcmp.gt.f32.partialorder %v1104_v24, %v1135_v26 }
 0x188   : > { %v1109_v20 = vmul.f32 %v4206_v12, %v1108_v17 }
 0x18a   : > { %v1110_v23 = vadd.f32 %v4206_v12, %v1109_v20 }
 0x18c   : > { %v1114_v28 = vsel %vm1113_vm3, %v4206_v12, %v1110_v23 }
 0x18d   : > { %v1119_v29 = vsel %vm1116_vm4, %v1118_v25, %v1114_v28 }
 0x18e   : > { %vm1152_vm6 = vcmp.gt.f32.partialorder %v1119_v29, %v1136_v27 }
 0x18f   : > { %vm3770_vm7 = vmpackc.low %vm1152_vm6, %vm1151_vm5 }
 0x190   : > { %3771 = vmatmul.msk.bf16.gmra.mxu2 %vm3770_vm7, %v4711_v49  ;;  %3787 = vmatmul.msk.bf16.gmra.mxu3 %vm3770_vm7, %v4711_v49 }
 0x1a3   : > { %v1266_v34 = vpop.f32.mrf.mxu2  ;;  %v1315_v35 = vpop.f32.mrf.mxu3 }
 0x1a4   : > { %v1267_v36 = vadd.f32 %v1266_v34, %v5161_v32  ;;  %v1316_v37 = vadd.f32 %v1315_v35, %v5163_v33 }
 0x1a6   : > { %v3788_v38 = vmul.f32 -1.442695, %v1267_v36  ;;  %v3789_v39 = vmul.f32 -1.442695, %v1316_v37 }
 0x1a8   : > { %4207 = vpow2.f32 %v3788_v38 }
 0x1a9   : > { %4209 = vpow2.f32 %v3789_v39 }
 0x1ab   : > { %v1268_v40 = vpop.f32.mrf.mxu2  ;;  %v1317_v41 = vpop.f32.mrf.mxu3 }
 0x1ac   : > { %v1269_v42 = vadd.f32 %v1268_v40, %v5161_v32  ;;  %v1318_v43 = vadd.f32 %v1317_v41, %v5163_v33 }
 0x1ae   : > { %v4208_v44 = vpop.eup %4207  ;;  %v3790_v45 = vmul.f32 -1.442695, %v1269_v42  ;;  %v3791_v48 = vmul.f32 -1.442695, %v1318_v43  ;;  %v1963_v42 = vld [vmem:[%s5233_s19] sm:$0xff] }
 0x1af   : > { %v4210_v46 = vpop.eup %4209  ;;  %v1451_v47 = vadd.f32 1.0, %v4208_v44 }
 0x1b0   : > { %v1452_v50 = vadd.f32 1.0, %v4210_v46  ;;  %4211 = vpow2.f32 %v3790_v45 }
 0x1b1   : > { %4213 = vrcp.f32 %v1451_v47  ;;  %v1492_v57 = vand.u32 2147483647, %v1451_v47  ;;  %vm1488_vm8 = vweird.f32 %v1451_v47  ;;  %v1494_v63 = vand.u32 2147483648, %v1451_v47 }
 0x1b2   : > { %4215 = vrcp.f32 %v1452_v50  ;;  %vm1503_vm9 = vweird.f32 %v1452_v50  ;;  %v1507_v0 = vand.u32 2147483647, %v1452_v50  ;;  %v1509_v2 = vand.u32 2147483648, %v1452_v50 }
 0x1b3   : > { %4217 = vpow2.f32 %v3791_v48  ;;  %v1271_v51 = vpop.f32.mrf.mxu2  ;;  %v1320_v52 = vpop.f32.mrf.mxu3  ;;  %vm5179_vm10 = vcmp.eq.f32.partialorder %v1492_v57, 8.507059e+37  ;;  %v1495_v14 = vor.u32 1.1754944e-38, %v1494_v63  ;;  %v1964_v48 = vld [vmem:[%s5233_s19 + $0x8] sm:$0xff] }
 0x1b4   : > { %v1272_v53 = vadd.f32 %v1271_v51, %v5161_v32  ;;  %v1321_v54 = vadd.f32 %v1320_v52, %v5163_v33  ;;  %vm5191_vm13 = vcmp.eq.f32.partialorder %v1507_v0, 8.507059e+37  ;;  %v1510_v21 = vor.u32 1.1754944e-38, %v1509_v2 }
 0x1b6   : > { %v4212_v55 = vpop.eup %4211  ;;  %v3792_v30 = vmul.f32 -1.442695, %v1272_v53  ;;  %v3793_v56 = vmul.f32 -1.442695, %v1321_v54 }
 0x1b7   : > { %v4214_v58 = vpop.eup %4213  ;;  %v5171_v59 = vadd.f32 1.0, %v4212_v55 }
 0x1b8   : > { %v5173_v60 = vpop.eup %4215  ;;  %v1484_v62 = vmul.f32 %v4214_v58, %v1451_v47  ;;  %4219 = vpow2.f32 %v3792_v30  ;;  %vm1489_vm11 = vweird.f32 %v4214_v58 }
 0x1b9   : > { %v4218_v1 = vpop.eup %4217  ;;  %v1499_v61 = vmul.f32 %v5173_v60, %v1452_v50  ;;  %4221 = vrcp.f32 %v5171_v59  ;;  %v1522_v8 = vand.u32 2147483647, %v5171_v59  ;;  %v1524_v9 = vand.u32 2147483648, %v5171_v59  ;;  %vm5199_vm14 = vmor %vm1488_vm8, %vm1489_vm11 }
 0x1ba   : > { %v5177_v3 = vadd.f32 1.0, %v4218_v1  ;;  %4223 = vpow2.f32 %v3793_v56  ;;  %v1485_v4 = vsub.f32 1.0, %v1484_v62  ;;  %vm1504_vm12 = vweird.f32 %v5173_v60  ;;  %v1965_v62 = vld [vmem:[%s5233_s19 + $0x10] sm:$0xff] }
 0x1bb   : > { %v1273_v6 = vpop.f32.mrf.mxu2  ;;  %v1322_v7 = vpop.f32.mrf.mxu3  ;;  %v1500_v10 = vsub.f32 1.0, %v1499_v61  ;;  %vm1518_vm15 = vweird.f32 %v5171_v59  ;;  %vm5209_vm0 = vcmp.eq.f32.partialorder %v1522_v8, 8.507059e+37  ;;  %v1525_v34 = vor.u32 1.1754944e-38, %v1524_v9  ;;  %vm5216_vm1 = vmor %vm1503_vm9, %vm1504_vm12  ;;  %v1966_v9 = vld [vmem:[%s5233_s19 + $0x18] sm:$0xff] }
 0x1bc   : > { %4225 = vrcp.f32 %v5177_v3  ;;  %v1274_v11 = vadd.f32 %v1273_v6, %v5161_v32  ;;  %v1323_v12 = vadd.f32 %v1322_v7, %v5163_v33  ;;  %v1486_v13 = vmul.f32 %v4214_v58, %v1485_v4 }
 0x1bd   : > { %v1501_v15 = vmul.f32 %v5173_v60, %v1500_v10  ;;  %v1537_v26 = vand.u32 2147483647, %v5177_v3  ;;  %v1539_v38 = vand.u32 2147483648, %v5177_v3  ;;  %vm1533_vm2 = vweird.f32 %v5177_v3 }
 0x1be   : > { %v4220_v17 = vpop.eup %4219  ;;  %v3794_v18 = vmul.f32 -1.442695, %v1274_v11  ;;  %v3795_v19 = vmul.f32 -1.442695, %v1323_v12  ;;  %v1487_v20 = vadd.f32 %v4214_v58, %v1486_v13 }
 0x1bf   : > { %v4222_v22 = vpop.eup %4221  ;;  %v5195_v23 = vadd.f32 1.0, %v4220_v17  ;;  %v1502_v25 = vadd.f32 %v5173_v60, %v1501_v15  ;;  %vm5241_vm4 = vcmp.eq.f32.partialorder %v1537_v26, 8.507059e+37  ;;  %v1540_v54 = vor.u32 1.1754944e-38, %v1539_v38 }
 0x1c0   : > { %v4224_v27 = vpop.eup %4223  ;;  %4227 = vpow2.f32 %v3794_v18  ;;  %v1491_v28 = vsel %vm5199_vm14, %v4214_v58, %v1487_v20  ;;  %v1514_v29 = vmul.f32 %v4222_v22, %v5171_v59  ;;  %vm1519_vm3 = vweird.f32 %v4222_v22 }
 0x1c1   : > { %4229 = vrcp.f32 %v5195_v23  ;;  %v5221_v36 = vadd.f32 1.0, %v4224_v27  ;;  %v1506_v37 = vsel %vm5216_vm1, %v5173_v60, %v1502_v25  ;;  %v1496_v40 = vsel %vm5179_vm10, %v1495_v14, %v1491_v28  ;;  %vm1520_vm8 = vmor %vm1518_vm15, %vm1519_vm3 }
 0x1c2   : > { %v5227_v39 = vpop.eup %4225  ;;  %4231 = vpow2.f32 %v3795_v19  ;;  %v1515_v41 = vsub.f32 1.0, %v1514_v29  ;;  %v1511_v45 = vsel %vm5191_vm13, %v1510_v21, %v1506_v37  ;;  %vm1995_vm5 = vcmp.gt.f32.partialorder %v1496_v40, %v1963_v42 }
 0x1c3   : > { %v1276_v43 = vpop.f32.mrf.mxu2  ;;  %v1325_v44 = vpop.f32.mrf.mxu3  ;;  %v1529_v46 = vmul.f32 %v5227_v39, %v5177_v3  ;;  %4233 = vrcp.f32 %v5221_v36  ;;  %vm1534_vm6 = vweird.f32 %v5227_v39  ;;  %vm1996_vm7 = vcmp.gt.f32.partialorder %v1511_v45, %v1964_v48 }
 0x1c4   : > { %v1277_v50 = vadd.f32 %v1276_v43, %v5161_v32  ;;  %v1326_v51 = vadd.f32 %v1325_v44, %v5163_v33  ;;  %v1516_v52 = vmul.f32 %v4222_v22, %v1515_v41  ;;  %vm1548_vm9 = vweird.f32 %v5195_v23  ;;  %vm5276_vm11 = vmor %vm1533_vm2, %vm1534_vm6 }
 0x1c5   : > { %v1530_v53 = vsub.f32 1.0, %v1529_v46  ;;  %v1552_v1 = vand.u32 2147483647, %v5195_v23  ;;  %v1554_v4 = vand.u32 2147483648, %v5195_v23  ;;  %vm1563_vm14 = vweird.f32 %v5221_v36 }
 0x1c6   : > { %v4228_v55 = vpop.eup %4227  ;;  %v3796_v30 = vmul.f32 -1.442695, %v1277_v50  ;;  %v3797_v56 = vmul.f32 -1.442695, %v1326_v51  ;;  %v1517_v57 = vadd.f32 %v4222_v22, %v1516_v52  ;;  %v1567_v35 = vand.u32 2147483647, %v5221_v36 }
 0x1c7   : > { %v5250_v58 = vpop.eup %4229  ;;  %v5252_v60 = vadd.f32 1.0, %v4228_v55  ;;  %v1531_v63 = vmul.f32 %v5227_v39, %v1530_v53  ;;  %v1555_v20 = vor.u32 1.1754944e-38, %v1554_v4 }
 0x1c8   : > { %v4232_v61 = vpop.eup %4231  ;;  %4235 = vpow2.f32 %v3796_v30  ;;  %v1521_v0 = vsel %vm1520_vm8, %v4222_v22, %v1517_v57  ;;  %v1544_v2 = vmul.f32 %v5250_v58, %v5195_v23  ;;  %vm1549_vm12 = vweird.f32 %v5250_v58 }
 0x1c9   : > { %4237 = vrcp.f32 %v5252_v60  ;;  %v5265_v59 = vadd.f32 1.0, %v4232_v61  ;;  %v1526_v5 = vsel %vm5209_vm0, %v1525_v34, %v1521_v0  ;;  %v1532_v6 = vadd.f32 %v5227_v39, %v1531_v63  ;;  %v5270_v7 = vpop.eup %4233  ;;  %vm1550_vm3 = vmor %vm1548_vm9, %vm1549_vm12 }
 0x1ca   : > { %4239 = vpow2.f32 %v3797_v56  ;;  %vm1997_vm10 = vcmp.gt.f32.partialorder %v1526_v5, %v1965_v62  ;;  %v1545_v10 = vsub.f32 1.0, %v1544_v2  ;;  %v1582_v3 = vand.u32 2147483647, %v5252_v60  ;;  %v1969_v2 = vld [vmem:[%s5233_s19 + $0x30] sm:$0xff] }
 0x1cb   : > { %4241 = vrcp.f32 %v5265_v59  ;;  %v1278_v11 = vpop.f32.mrf.mxu2  ;;  %v1327_v12 = vpop.f32.mrf.mxu3  ;;  %vm3820_vm13 = vmpackc.low %vm1997_vm10, %vm1995_vm5  ;;  %v1536_v13 = vsel %vm5276_vm11, %v5227_v39, %v1532_v6  ;;  %v1584_v14 = vand.u32 2147483648, %v5252_v60  ;;  %vm5296_vm0 = vcmp.eq.f32.partialorder %v1552_v1, 8.507059e+37 }
 0x1cc   : > { %v1279_v15 = vadd.f32 %v1278_v11, %v5161_v32  ;;  %v1328_v16 = vadd.f32 %v1327_v12, %v5163_v33  ;;  %3821 = vmatmul.msk.bf16.vlgmr.msrb.gmra.mxu0 %vm3820_vm13, %v4711_v49  ;;  %v1541_v17 = vsel %vm5241_vm4, %v1540_v54, %v1536_v13  ;;  %v1546_v18 = vmul.f32 %v5250_v58, %v1545_v10  ;;  %v1968_v10 = vld [vmem:[%s5233_s19 + $0x28] sm:$0xff] }
 0x1cd   : > { %vm1998_vm15 = vcmp.gt.f32.partialorder %v1541_v17, %v1966_v9  ;;  %v1559_v21 = vmul.f32 %v5270_v7, %v5221_v36  ;;  %vm1578_vm2 = vweird.f32 %v5252_v60  ;;  %v1585_v27 = vor.u32 1.1754944e-38, %v1584_v14 }
 0x1ce   : > { %v4236_v22 = vpop.eup %4235  ;;  %v3798_v24 = vmul.f32 -1.442695, %v1279_v15  ;;  %v3799_v25 = vmul.f32 -1.442695, %v1328_v16  ;;  %vm3836_vm1 = vmpackc.low %vm1998_vm15, %vm1996_vm7  ;;  %v1547_v26 = vadd.f32 %v5250_v58, %v1546_v18  ;;  %vm1564_vm4 = vweird.f32 %v5270_v7  ;;  %v1970_v15 = vld [vmem:[%s5233_s19 + $0x38] sm:$0xff] }
 0x1cf   : > { %v4238_v28 = vpop.eup %4237  ;;  %v5305_v29 = vadd.f32 1.0, %v4236_v22  ;;  %3837 = vmatmul.msk.bf16.vlgmr.msrb.gmra.mxu1 %vm3836_vm1, %v4711_v49  ;;  %v1560_v34 = vsub.f32 1.0, %v1559_v21  ;;  %vm5319_vm5 = vcmp.eq.f32.partialorder %v1582_v3, 8.507059e+37  ;;  %v1569_v23 = vand.u32 2147483648, %v5221_v36  ;;  %vm5347_vm9 = vmor %vm1563_vm14, %vm1564_vm4 }
 0x1d0   : > { %v4240_v37 = vpop.eup %4239  ;;  %4243 = vpow2.f32 %v3798_v24  ;;  %v1551_v38 = vsel %vm1550_vm3, %v5250_v58, %v1547_v26  ;;  %v1574_v39 = vmul.f32 %v4238_v28, %v5252_v60  ;;  %vm1579_vm6 = vweird.f32 %v4238_v28 }
 0x1d1   : > { %v5324_v41 = vpop.eup %4241  ;;  %4245 = vrcp.f32 %v5305_v29  ;;  %v5327_v42 = vadd.f32 1.0, %v4240_v37  ;;  %v1556_v43 = vsel %vm5296_vm0, %v1555_v20, %v1551_v38  ;;  %v1561_v44 = vmul.f32 %v5270_v7, %v1560_v34  ;;  %vm1580_vm12 = vmor %vm1578_vm2, %vm1579_vm6 }
 0x1d2   : > { %4247 = vpow2.f32 %v3799_v25  ;;  %v1575_v45 = vsub.f32 1.0, %v1574_v39  ;;  %vm1999_vm7 = vcmp.gt.f32.partialorder %v1556_v43, %v5313_v31  ;;  %vm5335_vm8 = vcmp.eq.f32.partialorder %v1567_v35, 8.507059e+37 }
 0x1d3   : > { %4249 = vrcp.f32 %v5327_v42  ;;  %v1281_v46 = vpop.f32.mrf.mxu2  ;;  %v1330_v47 = vpop.f32.mrf.mxu3  ;;  %v1562_v48 = vadd.f32 %v5270_v7, %v1561_v44  ;;  %v1589_v51 = vmul.f32 %v5324_v41, %v5265_v59  ;;  %v1570_v30 = vor.u32 1.1754944e-38, %v1569_v23 }
 0x1d4   : > { %v1282_v52 = vadd.f32 %v1281_v46, %v5161_v32  ;;  %v1331_v53 = vadd.f32 %v1330_v47, %v5163_v33  ;;  %v1576_v54 = vmul.f32 %v4238_v28, %v1575_v45  ;;  %vm1593_vm10 = vweird.f32 %v5265_v59 }
 0x1d5   : > { %v1566_v56 = vsel %vm5347_vm9, %v5270_v7, %v1562_v48  ;;  %v1590_v57 = vsub.f32 1.0, %v1589_v51  ;;  %v1597_v58 = vand.u32 2147483647, %v5265_v59  ;;  %vm1594_vm11 = vweird.f32 %v5324_v41 }
 0x1d6   : > { %v4244_v62 = vpop.eup %4243  ;;  %v3800_v63 = vmul.f32 -1.442695, %v1282_v52  ;;  %v3801_v1 = vmul.f32 -1.442695, %v1331_v53  ;;  %v1577_v61 = vadd.f32 %v4238_v28, %v1576_v54  ;;  %v1571_v4 = vsel %vm5335_vm8, %v1570_v30, %v1566_v56  ;;  %vm1595_vm15 = vmor %vm1593_vm10, %vm1594_vm11 }
 0x1d7   : > { %v5357_v36 = vpop.eup %4245  ;;  %v5359_v0 = vadd.f32 1.0, %v4244_v62  ;;  %v1591_v5 = vmul.f32 %v5324_v41, %v1590_v57  ;;  %v1599_v6 = vand.u32 2147483648, %v5265_v59  ;;  %vm5369_vm13 = vcmp.eq.f32.partialorder %v1597_v58, 8.507059e+37 }
 0x1d8   : > { %v4248_v7 = vpop.eup %4247  ;;  %4251 = vpow2.f32 %v3800_v63  ;;  %v1581_v8 = vsel %vm1580_vm12, %v4238_v28, %v1577_v61  ;;  %v1604_v60 = vmul.f32 %v5357_v36, %v5305_v29  ;;  %vm2000_vm1 = vcmp.gt.f32.partialorder %v1571_v4, %v1968_v10  ;;  %v1973_v4 = vld [vmem:[%s5233_s19 + $0x50] sm:$0xff] }
 0x1d9   : > { %v5376_v11 = vpop.eup %4249  ;;  %4253 = vrcp.f32 %v5359_v0  ;;  %v5379_v12 = vadd.f32 1.0, %v4248_v7  ;;  %v1586_v13 = vsel %vm5319_vm5, %v1585_v27, %v1581_v8  ;;  %v1592_v3 = vadd.f32 %v5324_v41, %v1591_v5 }
 0x1da   : > { %4255 = vpow2.f32 %v3801_v1  ;;  %vm2001_vm14 = vcmp.gt.f32.partialorder %v1586_v13, %v1969_v2  ;;  %v1600_v14 = vor.u32 1.1754944e-38, %v1599_v6  ;;  %v1605_v16 = vsub.f32 1.0, %v1604_v60 }
 0x1db   : > { %4257 = vrcp.f32 %v5379_v12  ;;  %v1283_v17 = vpop.f32.mrf.mxu2  ;;  %v1332_v18 = vpop.f32.mrf.mxu3  ;;  %vm3822_vm0 = vmpackc.low %vm2001_vm14, %vm1999_vm7  ;;  %v1596_v19 = vsel %vm1595_vm15, %v5324_v41, %v1592_v3  ;;  %vm1609_vm2 = vweird.f32 %v5357_v36  ;;  %vm1608_vm4 = vweird.f32 %v5305_v29  ;;  %v1971_v41 = vld [vmem:[%s5233_s19 + $0x40] sm:$0xff] }
 0x1dc   : > { %v1284_v20 = vadd.f32 %v1283_v17, %v5161_v32  ;;  %v1333_v59 = vadd.f32 %v1332_v18, %v5163_v33  ;;  %3823 = vmatmul.msk.bf16.gmra.mxu0 %vm3822_vm0, %v4711_v49  ;;  %v1601_v21 = vsel %vm5369_vm13, %v1600_v14, %v1596_v19  ;;  %v1606_v22 = vmul.f32 %v5357_v36, %v1605_v16  ;;  %vm1610_vm6 = vmor %vm1608_vm4, %vm1609_vm2  ;;  %v1972_v16 = vld [vmem:[%s5233_s19 + $0x48] sm:$0xff] }
 0x1dd   : > { %vm2002_vm3 = vcmp.gt.f32.partialorder %v1601_v21, %v1970_v15  ;;  %v1612_v24 = vand.u32 2147483647, %v5305_v29  ;;  %v1614_v25 = vand.u32 2147483648, %v5305_v29  ;;  %v1642_v34 = vand.u32 2147483647, %v5359_v0 }
 0x1de   : > { %v4252_v26 = vpop.eup %4251  ;;  %v3802_v27 = vmul.f32 -1.442695, %v1284_v20  ;;  %v3803_v28 = vmul.f32 -1.442695, %v1333_v59  ;;  %vm3838_vm5 = vmpackc.low %vm2002_vm3, %vm2000_vm1  ;;  %v1607_v31 = vadd.f32 %v5357_v36, %v1606_v22  ;;  %vm1638_vm7 = vweird.f32 %v5359_v0 }
 0x1df   : > { %v4254_v35 = vpop.eup %4253  ;;  %v5405_v37 = vadd.f32 1.0, %v4252_v26  ;;  %3839 = vmatmul.msk.bf16.gmra.mxu1 %vm3838_vm5, %v4711_v49  ;;  %v1615_v38 = vor.u32 1.1754944e-38, %v1614_v25  ;;  %v1644_v29 = vand.u32 2147483648, %v5359_v0  ;;  %vm1613_vm8 = vcmp.eq.f32.partialorder %v1612_v24, 8.507059e+37  ;;  %v1974_v26 = vld [vmem:[%s5233_s19 + $0x58] sm:$0xff] }
 0x1e0   : > { %v4256_v39 = vpop.eup %4255  ;;  %4259 = vpow2.f32 %v3802_v27  ;;  %v1611_v40 = vsel %vm1610_vm6, %v5357_v36, %v1607_v31  ;;  %v1634_v23 = vmul.f32 %v4254_v35, %v5359_v0  ;;  %vm1639_vm9 = vweird.f32 %v4254_v35 }
 0x1e1   : > { %v5415_v43 = vpop.eup %4257  ;;  %4261 = vrcp.f32 %v5405_v37  ;;  %v5418_v44 = vadd.f32 1.0, %v4256_v39  ;;  %v1616_v45 = vsel %vm1613_vm8, %v1615_v38, %v1611_v40  ;;  %vm5420_vm10 = vcmp.eq.f32.partialorder %v1642_v34, 8.507059e+37  ;;  %vm1640_vm15 = vmor %vm1638_vm7, %vm1639_vm9 }
 0x1e2   : > { %4263 = vpow2.f32 %v3803_v28  ;;  %v1635_v46 = vsub.f32 1.0, %v1634_v23  ;;  %v1645_v48 = vor.u32 1.1754944e-38, %v1644_v29  ;;  %vm2003_vm11 = vcmp.gt.f32.partialorder %v1616_v45, %v1971_v41 }
 0x1e3   : > { %4265 = vrcp.f32 %v5418_v44  ;;  %v1286_v50 = vpop.f32.mrf.mxu2  ;;  %v1335_v51 = vpop.f32.mrf.mxu3  ;;  %v1619_v52 = vmul.f32 %v5376_v11, %v5327_v42  ;;  %vm1623_vm12 = vweird.f32 %v5327_v42  ;;  %v1627_v30 = vand.u32 2147483647, %v5327_v42 }
 0x1e4   : > { %v1287_v53 = vadd.f32 %v1286_v50, %v5161_v32  ;;  %v1336_v54 = vadd.f32 %v1335_v51, %v5163_v33  ;;  %v1636_v55 = vmul.f32 %v4254_v35, %v1635_v46  ;;  %vm1624_vm13 = vweird.f32 %v5376_v11 }
 0x1e5   : > { %v1620_v56 = vsub.f32 1.0, %v1619_v52  ;;  %v1629_v57 = vand.u32 2147483648, %v5327_v42  ;;  %v1649_v58 = vmul.f32 %v5415_v43, %v5379_v12  ;;  %vm1653_vm14 = vweird.f32 %v5379_v12  ;;  %vm1625_vm2 = vmor %vm1623_vm12, %vm1624_vm13 }
 0x1e6   : > { %v4260_v62 = vpop.eup %4259  ;;  %v3804_v63 = vmul.f32 -1.442695, %v1287_v53  ;;  %v3805_v1 = vmul.f32 -1.442695, %v1336_v54  ;;  %v1637_v61 = vadd.f32 %v4254_v35, %v1636_v55  ;;  %vm5445_vm0 = vcmp.eq.f32.partialorder %v1627_v30, 8.507059e+37 }
 0x1e7   : > { %v5436_v36 = vpop.eup %4261  ;;  %v5438_v2 = vadd.f32 1.0, %v4260_v62  ;;  %v1621_v5 = vmul.f32 %v5376_v11, %v1620_v56  ;;  %v1650_v7 = vsub.f32 1.0, %v1649_v58  ;;  %v1630_v10 = vor.u32 1.1754944e-38, %v1629_v57  ;;  %v1975_v57 = vld [vmem:[%s5233_s19 + $0x60] sm:$0xff] }
 0x1e8   : > { %v4264_v8 = vpop.eup %4263  ;;  %4267 = vpow2.f32 %v3804_v63  ;;  %v1641_v9 = vsel %vm1640_vm15, %v4254_v35, %v1637_v61  ;;  %v1657_v60 = vand.u32 2147483647, %v5379_v12  ;;  %vm1654_vm3 = vweird.f32 %v5415_v43 }
 0x1e9   : > { %v5450_v13 = vpop.eup %4265  ;;  %4269 = vrcp.f32 %v5438_v2  ;;  %v5453_v0 = vadd.f32 1.0, %v4264_v8  ;;  %v1646_v3 = vsel %vm5420_vm10, %v1645_v48, %v1641_v9  ;;  %v1622_v14 = vadd.f32 %v5376_v11, %v1621_v5  ;;  %vm1655_vm6 = vmor %vm1653_vm14, %vm1654_vm3  ;;  %v1977_v8 = vld [vmem:[%s5233_s19 + $0x70] sm:$0xff] }
 0x1ea   : > { %4271 = vpow2.f32 %v3805_v1  ;;  %vm2005_vm1 = vcmp.gt.f32.partialorder %v1646_v3, %v1973_v4  ;;  %v1651_v15 = vmul.f32 %v5415_v43, %v1650_v7  ;;  %vm5467_vm5 = vcmp.eq.f32.partialorder %v1657_v60, 8.507059e+37 }
 0x1eb   : > { %v1288_v17 = vpop.f32.mrf.mxu2  ;;  %v1337_v18 = vpop.f32.mrf.mxu3  ;;  %vm3824_vm4 = vmpackc.low %vm2005_vm1, %vm2003_vm11  ;;  %v1626_v19 = vsel %vm1625_vm2, %v5376_v11, %v1622_v14  ;;  %v1659_v59 = vand.u32 2147483648, %v5379_v12  ;;  %v1664_v42 = vmul.f32 %v5436_v36, %v5405_v37  ;;  %4273 = vrcp.f32 %v5453_v0 }
 0x1ec   : > { %v1289_v21 = vadd.f32 %v1288_v17, %v5161_v32  ;;  %v1338_v22 = vadd.f32 %v1337_v18, %v5163_v33  ;;  %3825 = vmatmul.msk.bf16.gmra.mxu0 %vm3824_vm4, %v4711_v49  ;;  %v1631_v24 = vsel %vm5445_vm0, %v1630_v10, %v1626_v19  ;;  %v1652_v11 = vadd.f32 %v5415_v43, %v1651_v15 }
 0x1ed   : > { %v1660_v25 = vor.u32 1.1754944e-38, %v1659_v59  ;;  %vm2004_vm7 = vcmp.gt.f32.partialorder %v1631_v24, %v1972_v16  ;;  %v1665_v27 = vsub.f32 1.0, %v1664_v42  ;;  %vm1669_vm8 = vweird.f32 %v5436_v36 }
 0x1ee   : > { %v4268_v28 = vpop.eup %4267  ;;  %v3806_v31 = vmul.f32 -1.442695, %v1289_v21  ;;  %v3807_v34 = vmul.f32 -1.442695, %v1338_v22  ;;  %v1656_v35 = vsel %vm1655_vm6, %v5415_v43, %v1652_v11  ;;  %v1672_v40 = vand.u32 2147483647, %v5405_v37 }
 0x1ef   : > { %v4270_v38 = vpop.eup %4269  ;;  %v5488_v29 = vadd.f32 1.0, %v4268_v28  ;;  %v1661_v39 = vsel %vm5467_vm5, %v1660_v25, %v1656_v35  ;;  %v1666_v12 = vmul.f32 %v5436_v36, %v1665_v27  ;;  %v1674_v41 = vand.u32 2147483648, %v5405_v37 }
 0x1f0   : > { %v4272_v23 = vpop.eup %4271  ;;  %4275 = vpow2.f32 %v3806_v31  ;;  %vm2006_vm9 = vcmp.gt.f32.partialorder %v1661_v39, %v1974_v26  ;;  %v1694_v45 = vmul.f32 %v4270_v38, %v5438_v2  ;;  %vm1668_vm11 = vweird.f32 %v5405_v37 }
 0x1f1   : > { %4277 = vrcp.f32 %v5488_v29  ;;  %v5497_v43 = vadd.f32 1.0, %v4272_v23  ;;  %vm3840_vm10 = vmpackc.low %vm2006_vm9, %vm2004_vm7  ;;  %v1667_v46 = vadd.f32 %v5436_v36, %v1666_v12  ;;  %vm1673_vm13 = vcmp.eq.f32.partialorder %v1672_v40, 8.507059e+37  ;;  %v5505_v50 = vpop.eup %4273 }
 0x1f2   : > { %4279 = vpow2.f32 %v3807_v34  ;;  %3841 = vmatmul.msk.bf16.gmra.mxu1 %vm3840_vm10, %v4711_v49  ;;  %vm1670_vm12 = vmor %vm1668_vm11, %vm1669_vm8  ;;  %v1675_v47 = vor.u32 1.1754944e-38, %v1674_v41  ;;  %v1695_v48 = vsub.f32 1.0, %v1694_v45  ;;  %vm1699_vm14 = vweird.f32 %v4270_v38 }
 0x1f3   : > { %4281 = vrcp.f32 %v5497_v43  ;;  %v1291_v51 = vpop.f32.mrf.mxu2  ;;  %v1340_v52 = vpop.f32.mrf.mxu3  ;;  %v1671_v53 = vsel %vm1670_vm12, %v5436_v36, %v1667_v46  ;;  %v1702_v37 = vand.u32 2147483647, %v5438_v2  ;;  %vm1698_vm15 = vweird.f32 %v5438_v2 }
 0x1f4   : > { %v1292_v54 = vadd.f32 %v1291_v51, %v5161_v32  ;;  %v1341_v55 = vadd.f32 %v1340_v52, %v5163_v33  ;;  %v1676_v30 = vsel %vm1673_vm13, %v1675_v47, %v1671_v53  ;;  %v1696_v56 = vmul.f32 %v4270_v38, %v1695_v48  ;;  %vm1700_vm1 = vmor %vm1698_vm15, %vm1699_vm14  ;;  %v1978_v53 = vld [vmem:[%s5233_s19 + $0x78] sm:$0xff] }
 0x1f5   : > { %v1704_v58 = vand.u32 2147483648, %v5438_v2  ;;  %v1679_v62 = vmul.f32 %v5450_v13, %v5418_v44  ;;  %vm5517_vm0 = vcmp.eq.f32.partialorder %v1702_v37, 8.507059e+37  ;;  %vm2007_vm2 = vcmp.gt.f32.partialorder %v1676_v30, %v1975_v57 }
 0x1f6   : > { %v4276_v63 = vpop.eup %4275  ;;  %v3808_v1 = vmul.f32 -1.442695, %v1292_v54  ;;  %v3809_v61 = vmul.f32 -1.442695, %v1341_v55  ;;  %v1697_v36 = vadd.f32 %v4270_v38, %v1696_v56  ;;  %vm1684_vm3 = vweird.f32 %v5450_v13 }
 0x1f7   : > { %v5521_v5 = vpop.eup %4277  ;;  %v5523_v6 = vadd.f32 1.0, %v4276_v63  ;;  %v1705_v7 = vor.u32 1.1754944e-38, %v1704_v58  ;;  %v1680_v2 = vsub.f32 1.0, %v1679_v62  ;;  %v1687_v60 = vand.u32 2147483647, %v5418_v44 }
 0x1f8   : > { %v4280_v9 = vpop.eup %4279  ;;  %4283 = vpow2.f32 %v3808_v1  ;;  %v1701_v10 = vsel %vm1700_vm1, %v4270_v38, %v1697_v36  ;;  %v1724_v17 = vmul.f32 %v5521_v5, %v5488_v29  ;;  %vm1683_vm5 = vweird.f32 %v5418_v44 }
 0x1f9   : > { %v5529_v3 = vpop.eup %4281  ;;  %4285 = vrcp.f32 %v5523_v6  ;;  %v5532_v14 = vadd.f32 1.0, %v4280_v9  ;;  %v1706_v15 = vsel %vm5517_vm0, %v1705_v7, %v1701_v10  ;;  %v1681_v16 = vmul.f32 %v5450_v13, %v1680_v2  ;;  %vm1685_vm7 = vmor %vm1683_vm5, %vm1684_vm3 }
 0x1fa   : > { %4287 = vpow2.f32 %v3809_v61  ;;  %vm2009_vm4 = vcmp.gt.f32.partialorder %v1706_v15, %v1977_v8  ;;  %v5542_v18 = vmul.f32 %v5529_v3, %v5497_v43  ;;  %v1689_v42 = vand.u32 2147483648, %v5418_v44  ;;  %v1979_v15 = vld [vmem:[%s5233_s19 + $0x80] sm:$0xff] }
 0x1fb   : > { %v1293_v19 = vpop.f32.mrf.mxu2  ;;  %v1342_v20 = vpop.f32.mrf.mxu3  ;;  %vm3826_vm6 = vmpackc.low %vm2009_vm4, %vm2007_vm2  ;;  %v1682_v59 = vadd.f32 %v5450_v13, %v1681_v16  ;;  %v1709_v21 = vmul.f32 %v5505_v50, %v5453_v0  ;;  %4289 = vrcp.f32 %v5532_v14  ;;  %vm1688_vm8 = vcmp.eq.f32.partialorder %v1687_v60, 8.507059e+37 }
 0x1fc   : > { %v1294_v22 = vadd.f32 %v1293_v19, %v5161_v32  ;;  %v1343_v24 = vadd.f32 %v1342_v20, %v5163_v33  ;;  %3827 = vmatmul.msk.bf16.gmra.mxu0 %vm3826_vm6, %v4711_v49  ;;  %v1690_v25 = vor.u32 1.1754944e-38, %v1689_v42  ;;  %v1717_v26 = vand.u32 2147483647, %v5453_v0 }
 0x1fd   : > { %v1686_v11 = vsel %vm1685_vm7, %v5450_v13, %v1682_v59  ;;  %v1710_v44 = vsub.f32 1.0, %v1709_v21  ;;  %v1719_v34 = vand.u32 2147483648, %v5453_v0  ;;  %v1725_v35 = vsub.f32 1.0, %v1724_v17  ;;  %v1976_v13 = vld [vmem:[%s5233_s19 + $0x68] sm:$0xff]  ;;  %v1981_v59 = vld [vmem:[%s5233_s19 + $0x90] sm:$0xff] }
 0x1fe   : > { %v4284_v27 = vpop.eup %4283  ;;  %v3810_v28 = vmul.f32 -1.442695, %v1294_v22  ;;  %v3811_v31 = vmul.f32 -1.442695, %v1343_v24  ;;  %v1691_v12 = vsel %vm1688_vm8, %v1690_v25, %v1686_v11  ;;  %vm1714_vm9 = vweird.f32 %v5505_v50 }
 0x1ff   : > { %v5558_v38 = vpop.eup %4285  ;;  %v5560_v39 = vadd.f32 1.0, %v4284_v27  ;;  %v1711_v40 = vmul.f32 %v5505_v50, %v1710_v44  ;;  %vm1713_vm10 = vweird.f32 %v5453_v0  ;;  %vm5568_vm11 = vcmp.eq.f32.partialorder %v1717_v26, 8.507059e+37 }
 0x200   : > { %v4288_v23 = vpop.eup %4287  ;;  %v1754_v41 = vmul.f32 %v5558_v38, %v5523_v6  ;;  %4291 = vpow2.f32 %v3810_v28  ;;  %v1726_v48 = vmul.f32 %v5521_v5, %v1725_v35  ;;  %vm1715_vm12 = vmor %vm1713_vm10, %vm1714_vm9  ;;  %v1720_v52 = vor.u32 1.1754944e-38, %v1719_v34 }
 0x201   : > { %4293 = vrcp.f32 %v5560_v39  ;;  %v5573_v46 = vadd.f32 1.0, %v4288_v23  ;;  %v1712_v47 = vadd.f32 %v5505_v50, %v1711_v40  ;;  %v5577_v51 = vpop.eup %4289  ;;  %vm2008_vm13 = vcmp.gt.f32.partialorder %v1691_v12, %v1976_v13 }
 0x202   : > { %4295 = vpow2.f32 %v3811_v31  ;;  %vm1729_vm14 = vweird.f32 %v5521_v5  ;;  %v1727_v55 = vadd.f32 %v5521_v5, %v1726_v48  ;;  %vm1728_vm15 = vweird.f32 %v5488_v29 }
 0x203   : > { %v1716_v0 = vsel %vm1715_vm12, %v5505_v50, %v1712_v47  ;;  %v1296_v37 = vpop.f32.mrf.mxu2  ;;  %v1345_v54 = vpop.f32.mrf.mxu3  ;;  %v1732_v30 = vand.u32 2147483647, %v5488_v29  ;;  %vm5589_vm0 = vmor %vm1728_vm15, %vm1729_vm14  ;;  %v1734_v50 = vand.u32 2147483648, %v5488_v29  ;;  %4297 = vrcp.f32 %v5573_v46 }
 0x204   : > { %v1721_v56 = vsel %vm5568_vm11, %v1720_v52, %v1716_v0  ;;  %v1297_v57 = vadd.f32 %v1296_v37, %v5161_v32  ;;  %v1346_v58 = vadd.f32 %v1345_v54, %v5163_v33  ;;  %v1731_v63 = vsel %vm5589_vm0, %v5521_v5, %v1727_v55 }
 0x205   : > { %vm2010_vm1 = vcmp.gt.f32.partialorder %v1721_v56, %v1978_v53  ;;  %v1755_v1 = vsub.f32 1.0, %v1754_v41  ;;  %vm1733_vm3 = vcmp.eq.f32.partialorder %v1732_v30, 8.507059e+37  ;;  %v1735_v7 = vor.u32 1.1754944e-38, %v1734_v50 }
 0x206   : > { %v4292_v61 = vpop.eup %4291  ;;  %vm3842_vm2 = vmpackc.low %vm2010_vm1, %vm2008_vm13  ;;  %v3812_v36 = vmul.f32 -1.442695, %v1297_v57  ;;  %v3813_v4 = vmul.f32 -1.442695, %v1346_v58  ;;  %vm1759_vm4 = vweird.f32 %v5558_v38  ;;  %v1762_v5 = vand.u32 2147483647, %v5523_v6 }
 0x207   : > { %v5599_v8 = vpop.eup %4293  ;;  %v5601_v2 = vadd.f32 1.0, %v4292_v61  ;;  %3843 = vmatmul.msk.bf16.gmra.mxu1 %vm3842_vm2, %v4711_v49  ;;  %v1756_v29 = vmul.f32 %v5558_v38, %v1755_v1  ;;  %v1736_v10 = vsel %vm1733_vm3, %v1735_v7, %v1731_v63  ;;  %v1764_v60 = vand.u32 2147483648, %v5523_v6  ;;  %v1980_v63 = vld [vmem:[%s5233_s19 + $0x88] sm:$0xff]  ;;  %v1982_v1 = vld [vmem:[%s5233_s19 + $0x98] sm:$0xff] }
 0x208   : > { %v4296_v9 = vpop.eup %4295  ;;  %4299 = vpow2.f32 %v3812_v36  ;;  %vm1758_vm5 = vweird.f32 %v5523_v6  ;;  %v1769_v17 = vmul.f32 %v5577_v51, %v5532_v14  ;;  %vm1763_vm7 = vcmp.eq.f32.partialorder %v1762_v5, 8.507059e+37 }
 0x209   : > { %4301 = vrcp.f32 %v5601_v2  ;;  %v1757_v16 = vadd.f32 %v5558_v38, %v1756_v29  ;;  %v5614_v19 = vadd.f32 1.0, %v4296_v9  ;;  %vm1760_vm6 = vmor %vm1758_vm5, %vm1759_vm4  ;;  %v1765_v20 = vor.u32 1.1754944e-38, %v1764_v60  ;;  %v5617_v42 = vpop.eup %4297 }
 0x20a   : > { %4303 = vpow2.f32 %v3813_v4  ;;  %vm2011_vm8 = vcmp.gt.f32.partialorder %v1736_v10, %v1979_v15  ;;  %v1740_v11 = vsub.f32 1.0, %v5542_v18  ;;  %vm1744_vm9 = vweird.f32 %v5529_v3 }
 0x20b   : > { %v1298_v21 = vpop.f32.mrf.mxu2  ;;  %v1347_v22 = vpop.f32.mrf.mxu3  ;;  %v1761_v24 = vsel %vm1760_vm6, %v5558_v38, %v1757_v16  ;;  %v1747_v27 = vand.u32 2147483647, %v5497_v43  ;;  %v1749_v28 = vand.u32 2147483648, %v5497_v43  ;;  %v1784_v34 = vmul.f32 %v5599_v8, %v5560_v39 }
 0x20c   : > { %v1299_v6 = vadd.f32 %v1298_v21, %v5161_v32  ;;  %v1348_v25 = vadd.f32 %v1347_v22, %v5163_v33  ;;  %v1766_v44 = vsel %vm1763_vm7, %v1765_v20, %v1761_v24  ;;  %v1741_v26 = vmul.f32 %v5529_v3, %v1740_v11 }
 0x20d   : > { %vm2013_vm10 = vcmp.gt.f32.partialorder %v1766_v44, %v1981_v59  ;;  %v1770_v38 = vsub.f32 1.0, %v1769_v17  ;;  %4305 = vrcp.f32 %v5614_v19  ;;  %vm1743_vm12 = vweird.f32 %v5497_v43 }
 0x20e   : > { %v4300_v31 = vpop.eup %4299  ;;  %v3814_v35 = vmul.f32 -1.442695, %v1299_v6  ;;  %v3815_v18 = vmul.f32 -1.442695, %v1348_v25  ;;  %vm3828_vm11 = vmpackc.low %vm2013_vm10, %vm2011_vm8  ;;  %v1742_v13 = vadd.f32 %v5529_v3, %v1741_v26  ;;  %v1750_v41 = vor.u32 1.1754944e-38, %v1749_v28 }
 0x20f   : > { %v5629_v12 = vpop.eup %4301  ;;  %v5632_v40 = vadd.f32 1.0, %v4300_v31  ;;  %3829 = vmatmul.msk.bf16.gmra.mxu0 %vm3828_vm11, %v4711_v49  ;;  %vm1745_vm13 = vmor %vm1743_vm12, %vm1744_vm9  ;;  %v1771_v45 = vmul.f32 %v5577_v51, %v1770_v38  ;;  %vm1774_vm14 = vweird.f32 %v5577_v51  ;;  %v1777_v52 = vand.u32 2147483647, %v5532_v14 }
 0x210   : > { %v4304_v23 = vpop.eup %4303  ;;  %4307 = vpow2.f32 %v3814_v35  ;;  %v1746_v48 = vsel %vm1745_vm13, %v5529_v3, %v1742_v13  ;;  %vm1748_vm15 = vcmp.eq.f32.partialorder %v1747_v27, 8.507059e+37  ;;  %vm1773_vm0 = vweird.f32 %v5532_v14  ;;  %v1983_v35 = vld [vmem:[%s5233_s19 + $0xa0] sm:$0xff] }
 0x211   : > { %4309 = vrcp.f32 %v5632_v40  ;;  %v5642_v47 = vadd.f32 1.0, %v4304_v23  ;;  %v1772_v43 = vadd.f32 %v5577_v51, %v1771_v45  ;;  %v1814_v53 = vmul.f32 %v5629_v12, %v5601_v2  ;;  %vm5651_vm1 = vmor %vm1773_vm0, %vm1774_vm14  ;;  %v1985_v45 = vld [vmem:[%s5233_s19 + $0xb0] sm:$0xff] }
 0x212   : > { %4311 = vpow2.f32 %v3815_v18  ;;  %v1751_v0 = vsel %vm1748_vm15, %v1750_v41, %v1746_v48  ;;  %v1779_v3 = vand.u32 2147483648, %v5532_v14  ;;  %v1785_v58 = vsub.f32 1.0, %v1784_v34 }
 0x213   : > { %4313 = vrcp.f32 %v5642_v47  ;;  %v1301_v54 = vpop.f32.mrf.mxu2  ;;  %v1350_v55 = vpop.f32.mrf.mxu3  ;;  %v1776_v30 = vsel %vm5651_vm1, %v5577_v51, %v1772_v43  ;;  %vm1778_vm2 = vcmp.eq.f32.partialorder %v1777_v52, 8.507059e+37  ;;  %vm1789_vm3 = vweird.f32 %v5599_v8 }
 0x214   : > { %v1302_v56 = vadd.f32 %v1301_v54, %v5161_v32  ;;  %v1351_v57 = vadd.f32 %v1350_v55, %v5163_v33  ;;  %v5661_v62 = vpop.eup %4305  ;;  %v1780_v50 = vor.u32 1.1754944e-38, %v1779_v3  ;;  %v1792_v14 = vand.u32 2147483647, %v5560_v39 }
 0x215   : > { %v1786_v51 = vmul.f32 %v5599_v8, %v1785_v58  ;;  %v1794_v7 = vand.u32 2147483648, %v5560_v39  ;;  %vm1788_vm4 = vweird.f32 %v5560_v39  ;;  %v1815_v10 = vsub.f32 1.0, %v1814_v53 }
 0x216   : > { %v4308_v61 = vpop.eup %4307  ;;  %v3816_v36 = vmul.f32 -1.442695, %v1302_v56  ;;  %v3817_v4 = vmul.f32 -1.442695, %v1351_v57  ;;  %v1781_v9 = vsel %vm1778_vm2, %v1780_v50, %v1776_v30  ;;  %vm2012_vm5 = vcmp.gt.f32.partialorder %v1751_v0, %v1980_v63  ;;  %vm5677_vm7 = vmor %vm1788_vm4, %vm1789_vm3 }
 0x217   : > { %v5669_v29 = vpop.eup %4309  ;;  %v5671_v5 = vadd.f32 1.0, %v4308_v61  ;;  %vm2014_vm6 = vcmp.gt.f32.partialorder %v1781_v9, %v1982_v1  ;;  %v1787_v15 = vadd.f32 %v5599_v8, %v1786_v51  ;;  %v1799_v20 = vmul.f32 %v5617_v42, %v5573_v46 }
 0x218   : > { %v4312_v60 = vpop.eup %4311  ;;  %4315 = vpow2.f32 %v3816_v36  ;;  %vm3844_vm8 = vmpackc.low %vm2014_vm6, %vm2012_vm5  ;;  %v1816_v59 = vmul.f32 %v5629_v12, %v1815_v10  ;;  %vm1793_vm9 = vcmp.eq.f32.partialorder %v1792_v14, 8.507059e+37  ;;  %v1795_v22 = vor.u32 1.1754944e-38, %v1794_v7  ;;  %v1984_v36 = vld [vmem:[%s5233_s19 + $0xa8] sm:$0xff] }
 0x219   : > { %v5681_v17 = vpop.eup %4313  ;;  %4317 = vrcp.f32 %v5671_v5  ;;  %v5686_v39 = vadd.f32 1.0, %v4312_v60  ;;  %3845 = vmatmul.msk.bf16.gmra.mxu1 %vm3844_vm8, %v4711_v49  ;;  %v1791_v21 = vsel %vm5677_vm7, %v5599_v8, %v1787_v15  ;;  %vm1818_vm10 = vweird.f32 %v5601_v2 }
 0x21a   : > { %4319 = vpow2.f32 %v3817_v4  ;;  %v1817_v6 = vadd.f32 %v5629_v12, %v1816_v59  ;;  %vm1819_vm11 = vweird.f32 %v5629_v12  ;;  %v1822_v26 = vand.u32 2147483647, %v5601_v2 }
 0x21b   : > { %4321 = vrcp.f32 %v5686_v39  ;;  %v1303_v24 = vpop.f32.mrf.mxu2  ;;  %v1352_v11 = vpop.f32.mrf.mxu3  ;;  %vm5699_vm12 = vmor %vm1818_vm10, %vm1819_vm11  ;;  %v1824_v27 = vand.u32 2147483648, %v5601_v2  ;;  %v1829_v28 = vmul.f32 %v5661_v62, %v5614_v19  ;;  %v1796_v31 = vsel %vm1793_vm9, %v1795_v22, %v1791_v21 }
 0x21c   : > { %v1304_v25 = vadd.f32 %v1303_v24, %v5161_v32  ;;  %v1353_v44 = vadd.f32 %v1352_v11, %v5163_v33  ;;  %v1821_v34 = vsel %vm5699_vm12, %v5629_v12, %v1817_v6  ;;  %v1800_v18 = vsub.f32 1.0, %v1799_v20  ;;  %v1986_v20 = vld [vmem:[%s5233_s19 + $0xb8] sm:$0xff] }
 0x21d   : > { %v1825_v41 = vor.u32 1.1754944e-38, %v1824_v27  ;;  %vm1803_vm13 = vweird.f32 %v5573_v46  ;;  %vm1823_vm14 = vcmp.eq.f32.partialorder %v1822_v26, 8.507059e+37  ;;  %vm1804_vm15 = vweird.f32 %v5617_v42 }
 0x21e   : > { %v4316_v38 = vpop.eup %4315  ;;  %v3818_v13 = vmul.f32 -1.442695, %v1304_v25  ;;  %v3819_v23 = vmul.f32 -1.442695, %v1353_v44  ;;  %v1801_v2 = vmul.f32 %v5617_v42, %v1800_v18  ;;  %v1807_v52 = vand.u32 2147483647, %v5573_v46  ;;  %vm1805_vm2 = vmor %vm1803_vm13, %vm1804_vm15 }
 0x21f   : > { %v5713_v48 = vpop.eup %4317  ;;  %v5718_v12 = vadd.f32 1.0, %v4316_v38  ;;  %v1826_v53 = vsel %vm1823_vm14, %v1825_v41, %v1821_v34  ;;  %v1809_v0 = vand.u32 2147483648, %v5573_v46  ;;  %v1844_v3 = vmul.f32 %v5669_v29, %v5632_v40  ;;  %v1989_v38 = vld [vmem:[%s5233_s19 + $0xd0] sm:$0xff] }
 0x220   : > { %v4320_v43 = vpop.eup %4319  ;;  %4323 = vpow2.f32 %v3818_v13  ;;  %vm2015_vm0 = vcmp.gt.f32.partialorder %v1796_v31, %v1983_v35  ;;  %vm2017_vm1 = vcmp.gt.f32.partialorder %v1826_v53, %v1985_v45  ;;  %v1802_v54 = vadd.f32 %v5617_v42, %v1801_v2  ;;  %v1987_v31 = vld [vmem:[%s5233_s19 + $0xc0] sm:$0xff] }
 0x221   : > { %v5721_v37 = vpop.eup %4321  ;;  %v5730_v55 = vmul.f32 %v5681_v17, %v5642_v47  ;;  %v5732_v30 = vadd.f32 1.0, %v4320_v43  ;;  %4325 = vpow2.f32 %v3819_v23  ;;  %vm3830_vm3 = vmpackc.low %vm2017_vm1, %vm2015_vm0  ;;  %v1810_v56 = vor.u32 1.1754944e-38, %v1809_v0 }
 0x222   : > { %v1874_v57 = vmul.f32 %v5713_v48, %v5671_v5  ;;  %3831 = vmatmul.msk.bf16.gmra.mxu0 %vm3830_vm3, %v4711_v49  ;;  %v1806_v58 = vsel %vm1805_vm2, %v5617_v42, %v1802_v54  ;;  %vm1808_vm4 = vcmp.eq.f32.partialorder %v1807_v52, 8.507059e+37  ;;  %v1830_v46 = vsub.f32 1.0, %v1829_v28 }
 0x223   : > { %v5740_v50 = vmul.f32 %v5721_v37, %v5686_v39  ;;  %4327 = vrcp.f32 %v5718_v12  ;;  %v1811_v63 = vsel %vm1808_vm4, %v1810_v56, %v1806_v58  ;;  %v1839_v1 = vand.u32 2147483648, %v5614_v19 }
 0x224   : > { %v1831_v14 = vmul.f32 %v5661_v62, %v1830_v46  ;;  %vm1834_vm5 = vweird.f32 %v5661_v62  ;;  %v1837_v61 = vand.u32 2147483647, %v5614_v19  ;;  %v1845_v42 = vsub.f32 1.0, %v1844_v3 }
 0x225   : > { %4329 = vrcp.f32 %v5732_v30  ;;  %vm1833_vm6 = vweird.f32 %v5614_v19  ;;  %vm1849_vm7 = vweird.f32 %v5669_v29  ;;  %v1852_v51 = vand.u32 2147483647, %v5632_v40 }
 0x226   : > { %v4324_v4 = vpop.eup %4323  ;;  %v1832_v9 = vadd.f32 %v5661_v62, %v1831_v14  ;;  %v1846_v10 = vmul.f32 %v5669_v29, %v1845_v42  ;;  %v1854_v60 = vand.u32 2147483648, %v5632_v40  ;;  %vm1835_vm8 = vmor %vm1833_vm6, %vm1834_vm5  ;;  %v1840_v16 = vor.u32 1.1754944e-38, %v1839_v1 }
 0x227   : > { %v5752_v7 = vadd.f32 1.0, %v4324_v4  ;;  %v4326_v15 = vpop.eup %4325  ;;  %vm2016_vm9 = vcmp.gt.f32.partialorder %v1811_v63, %v1984_v36  ;;  %vm1848_vm10 = vweird.f32 %v5632_v40  ;;  %v1875_v19 = vsub.f32 1.0, %v1874_v57 }
 0x228   : > { %v1836_v59 = vsel %vm1835_vm8, %v5661_v62, %v1832_v9  ;;  %vm1838_vm11 = vcmp.eq.f32.partialorder %v1837_v61, 8.507059e+37  ;;  %v1847_v21 = vadd.f32 %v5669_v29, %v1846_v10  ;;  %v5764_v24 = vadd.f32 1.0, %v4326_v15  ;;  %vm5768_vm12 = vmor %vm1848_vm10, %vm1849_vm7  ;;  %v1988_v61 = vld [vmem:[%s5233_s19 + $0xc8] sm:$0xff] }
 0x229   : > { %4331 = vrcp.f32 %v5752_v7  ;;  %v5762_v22 = vpop.eup %4327  ;;  %v1841_v11 = vsel %vm1838_vm11, %v1840_v16, %v1836_v59  ;;  %vm1853_vm13 = vcmp.eq.f32.partialorder %v1852_v51, 8.507059e+37  ;;  %v1876_v40 = vmul.f32 %v5713_v48, %v1875_v19  ;;  %v1993_v59 = vld [vmem:[%s5233_s19 + $0xf0] sm:$0xff] }
 0x22a   : > { %vm2018_vm14 = vcmp.gt.f32.partialorder %v1841_v11, %v1986_v20  ;;  %v1851_v62 = vsel %vm5768_vm12, %v5669_v29, %v1847_v21  ;;  %v1855_v25 = vor.u32 1.1754944e-38, %v1854_v60  ;;  %vm1879_vm15 = vweird.f32 %v5713_v48 }
 0x22b   : > { %v5777_v44 = vpop.eup %4329  ;;  %vm3846_vm0 = vmpackc.low %vm2018_vm14, %vm2016_vm9  ;;  %v1877_v8 = vadd.f32 %v5713_v48, %v1876_v40  ;;  %vm1878_vm1 = vweird.f32 %v5671_v5  ;;  %v1882_v26 = vand.u32 2147483647, %v5671_v5  ;;  %v1884_v27 = vand.u32 2147483648, %v5671_v5 }
 0x22c   : > { %v1904_v28 = vmul.f32 %v5762_v22, %v5718_v12  ;;  %3847 = vmatmul.msk.bf16.gmra.mxu1 %vm3846_vm0, %v4711_v49  ;;  %v1856_v29 = vsel %vm1853_vm13, %v1855_v25, %v1851_v62  ;;  %vm1880_vm2 = vmor %vm1878_vm1, %vm1879_vm15  ;;  %v1860_v34 = vsub.f32 1.0, %v5730_v55  ;;  %4333 = vrcp.f32 %v5764_v24  ;;  %v1991_v62 = vld [vmem:[%s5233_s19 + $0xe0] sm:$0xff] }
 0x22d   : > { %v1881_v35 = vsel %vm1880_vm2, %v5713_v48, %v1877_v8  ;;  %v1885_v18 = vor.u32 1.1754944e-38, %v1884_v27  ;;  %vm1864_vm3 = vweird.f32 %v5681_v17  ;;  %vm1883_vm4 = vcmp.eq.f32.partialorder %v1882_v26, 8.507059e+37 }
 0x22e   : > { %v1861_v5 = vmul.f32 %v5681_v17, %v1860_v34  ;;  %v1869_v23 = vand.u32 2147483648, %v5642_v47  ;;  %v1890_v41 = vsub.f32 1.0, %v5740_v50  ;;  %vm2019_vm5 = vcmp.gt.f32.partialorder %v1856_v29, %v1987_v31  ;;  %v1990_v50 = vld [vmem:[%s5233_s19 + $0xd8] sm:$0xff] }
 0x22f   : > { %v5793_v13 = vpop.eup %4331  ;;  %v1886_v45 = vsel %vm1883_vm4, %v1885_v18, %v1881_v35  ;;  %vm1863_vm6 = vweird.f32 %v5642_v47  ;;  %v1867_v2 = vand.u32 2147483647, %v5642_v47  ;;  %vm1894_vm9 = vweird.f32 %v5721_v37 }
 0x230   : > { %vm2021_vm7 = vcmp.gt.f32.partialorder %v1886_v45, %v1989_v38  ;;  %v1862_v48 = vadd.f32 %v5681_v17, %v1861_v5  ;;  %vm5801_vm8 = vmor %vm1863_vm6, %vm1864_vm3  ;;  %v1891_v43 = vmul.f32 %v5721_v37, %v1890_v41  ;;  %v1934_v53 = vmul.f32 %v5793_v13, %v5752_v7 }
 0x231   : > { %vm3832_vm10 = vmpackc.low %vm2021_vm7, %vm2019_vm5  ;;  %v1897_v0 = vand.u32 2147483647, %v5686_v39  ;;  %v1899_v47 = vand.u32 2147483648, %v5686_v39  ;;  %v1905_v3 = vsub.f32 1.0, %v1904_v28  ;;  %v1870_v55 = vor.u32 1.1754944e-38, %v1869_v23 }
 0x232   : > { %3833 = vmatmul.msk.bf16.gmra.mxu0 %vm3832_vm10, %v4711_v49  ;;  %v1866_v54 = vsel %vm5801_vm8, %v5681_v17, %v1862_v48  ;;  %v1892_v56 = vadd.f32 %v5721_v37, %v1891_v43  ;;  %vm1893_vm11 = vweird.f32 %v5686_v39  ;;  %v5817_v57 = vpop.eup %4333  ;;  %v1919_v58 = vmul.f32 %v5777_v44, %v5732_v30 }
 0x233   : > { %vm1868_vm12 = vcmp.eq.f32.partialorder %v1867_v2, 8.507059e+37  ;;  %vm1895_vm13 = vmor %vm1893_vm11, %vm1894_vm9  ;;  %v1900_v46 = vor.u32 1.1754944e-38, %v1899_v47  ;;  %v1906_v63 = vmul.f32 %v5762_v22, %v1905_v3  ;;  %vm1898_vm14 = vcmp.eq.f32.partialorder %v1897_v0, 8.507059e+37 }
 0x234   : > { %v1871_v1 = vsel %vm1868_vm12, %v1870_v55, %v1866_v54  ;;  %v1896_v17 = vsel %vm1895_vm13, %v5721_v37, %v1892_v56  ;;  %vm1909_vm15 = vweird.f32 %v5762_v22  ;;  %v1914_v36 = vand.u32 2147483648, %v5718_v12 }
 0x235   : > { %v1901_v14 = vsel %vm1898_vm14, %v1900_v46, %v1896_v17  ;;  %v1907_v39 = vadd.f32 %v5762_v22, %v1906_v63  ;;  %v1935_v42 = vsub.f32 1.0, %v1934_v53  ;;  %v1949_v4 = vmul.f32 %v5817_v57, %v5764_v24 }
 0x236   : > { %vm2022_vm0 = vcmp.gt.f32.partialorder %v1901_v14, %v1990_v50  ;;  %vm1908_vm1 = vweird.f32 %v5718_v12  ;;  %v1912_v51 = vand.u32 2147483647, %v5718_v12  ;;  %vm1939_vm3 = vweird.f32 %v5793_v13 }
 0x237   : > { %vm5832_vm2 = vmor %vm1908_vm1, %vm1909_vm15  ;;  %v1936_v9 = vmul.f32 %v5793_v13, %v1935_v42  ;;  %v1942_v10 = vand.u32 2147483647, %v5752_v7  ;;  %v1944_v60 = vand.u32 2147483648, %v5752_v7  ;;  %vm2020_vm4 = vcmp.gt.f32.partialorder %v1871_v1, %v1988_v61 }
 0x238   : > { %v1911_v15 = vsel %vm5832_vm2, %v5762_v22, %v1907_v39  ;;  %v1920_v12 = vsub.f32 1.0, %v1919_v58  ;;  %vm3848_vm5 = vmpackc.low %vm2022_vm0, %vm2020_vm4  ;;  %v1915_v16 = vor.u32 1.1754944e-38, %v1914_v36  ;;  %vm1938_vm6 = vweird.f32 %v5752_v7 }
 0x239   : > { %v1937_v20 = vadd.f32 %v5793_v13, %v1936_v9  ;;  %vm1913_vm7 = vcmp.eq.f32.partialorder %v1912_v51, 8.507059e+37  ;;  %vm1940_vm8 = vmor %vm1938_vm6, %vm1939_vm3  ;;  %v1945_v19 = vor.u32 1.1754944e-38, %v1944_v60  ;;  %v1950_v11 = vsub.f32 1.0, %v1949_v4 }
 0x23a   : > { %v1921_v21 = vmul.f32 %v5777_v44, %v1920_v12  ;;  %v1916_v6 = vsel %vm1913_vm7, %v1915_v16, %v1911_v15  ;;  %vm1943_vm9 = vcmp.eq.f32.partialorder %v1942_v10, 8.507059e+37  ;;  %vm1954_vm11 = vweird.f32 %v5817_v57 }
 0x23b   : > { %v1941_v40 = vsel %vm1940_vm8, %v5793_v13, %v1937_v20  ;;  %v1951_v25 = vmul.f32 %v5817_v57, %v1950_v11  ;;  %v1959_v7 = vand.u32 2147483648, %v5764_v24  ;;  %vm2023_vm12 = vcmp.gt.f32.partialorder %v1916_v6, %v1991_v62  ;;  %v1994_v13 = vld [vmem:[%s5233_s19 + $0xf8] sm:$0xff] }
 0x23c   : > { %3849 = vmatmul.msk.bf16.gmra.mxu1 %vm3848_vm5, %v4711_v49  ;;  %v1946_v22 = vsel %vm1943_vm9, %v1945_v19, %v1941_v40  ;;  %v1922_v8 = vadd.f32 %v5777_v44, %v1921_v21  ;;  %vm1924_vm13 = vweird.f32 %v5777_v44  ;;  %v1957_v26 = vand.u32 2147483647, %v5764_v24 }
 0x23d   : > { %vm2025_vm10 = vcmp.gt.f32.partialorder %v1946_v22, %v1993_v59  ;;  %v1929_v27 = vand.u32 2147483648, %v5732_v30  ;;  %v1952_v28 = vadd.f32 %v5817_v57, %v1951_v25  ;;  %vm1953_vm15 = vweird.f32 %v5764_v24  ;;  %v1992_v24 = vld [vmem:[%s5233_s19 + $0xe8] sm:$0xff] }
 0x23e   : > { %vm3834_vm14 = vmpackc.low %vm2025_vm10, %vm2023_vm12  ;;  %vm1923_vm0 = vweird.f32 %v5732_v30  ;;  %v1927_v29 = vand.u32 2147483647, %v5732_v30  ;;  %v1960_v34 = vor.u32 1.1754944e-38, %v1959_v7  ;;  %vm1958_vm3 = vcmp.eq.f32.partialorder %v1957_v26, 8.507059e+37  ;;  %v5869_v30 = vld [vmem:[%s6494_s3] ss:$0 sm:$0xff] }
 0x23f   : > { %vm1955_vm1 = vmor %vm1953_vm15, %vm1954_vm11  ;;  %v1930_v18 = vor.u32 1.1754944e-38, %v1929_v27 }
 0x240   : > { %vm1925_vm2 = vmor %vm1923_vm0, %vm1924_vm13  ;;  %v1956_v31 = vsel %vm1955_vm1, %v5817_v57, %v1952_v28  ;;  %vm1928_vm4 = vcmp.eq.f32.partialorder %v1927_v29, 8.507059e+37 }
 0x241   : > { %v1926_v35 = vsel %vm1925_vm2, %v5777_v44, %v1922_v8  ;;  %v1961_v38 = vsel %vm1958_vm3, %v1960_v34, %v1956_v31  ;;  %v3868_v31 = vld [vmem:[%s4918_s18 + $0x80] sm:$0xff]  ;;  %v3869_v34 = vld [vmem:[%s4918_s18 + $0x88] sm:$0xff] }
 0x242   : > { %3835 = vmatmul.msk.bf16.gmra.mxu0 %vm3834_vm14, %v4711_v49  ;;  %v1931_v5 = vsel %vm1928_vm4, %v1930_v18, %v1926_v35  ;;  %vm2026_vm5 = vcmp.gt.f32.partialorder %v1961_v38, %v1994_v13 }
 0x243   : > { %vm2024_vm6 = vcmp.gt.f32.partialorder %v1931_v5, %v1992_v24 }
 0x244   : > { %vm3850_vm7 = vmpackc.low %vm2026_vm5, %vm2024_vm6 }
 0x249   : > { %v2084_v23 = vpop.f32.mrf.mxu0 }
 0x24a   : > { %v2085_v41 = vadd.f32 %v5869_v30, %v2084_v23 }
 0x24c   : > { %v2133_v45 = vpop.f32.mrf.mxu1  ;;  %3851 = vmatmul.msk.bf16.gmra.mxu1 %vm3850_vm7, %v4711_v49 }
 0x24d   : > { %v2134_v44 = vadd.f32 %v2133_v45, %v2085_v41 }
 0x24f   : > { %v3852_v2 = vmul.f32 -1.442695, %v2134_v44 }
 0x251   : > { %4335 = vpow2.f32 %v3852_v2  ;;  %v2086_v48 = vpop.f32.mrf.mxu0 }
 0x252   : > { %v2087_v52 = vadd.f32 %v5869_v30, %v2086_v48 }
 0x254   : > { %v2135_v43 = vpop.f32.mrf.mxu1 }
 0x255   : > { %v2136_v53 = vadd.f32 %v2135_v43, %v2087_v52 }
 0x257   : > { %v4336_v0 = vpop.eup %4335  ;;  %v3853_v47 = vmul.f32 -1.442695, %v2136_v53 }
 0x258   : > { %v2221_v3 = vadd.f32 1.0, %v4336_v0 }
 0x259   : > { %4337 = vpow2.f32 %v3853_v47  ;;  %v2089_v54 = vpop.f32.mrf.mxu0 }
 0x25a   : > { %4339 = vrcp.f32 %v2221_v3  ;;  %v2090_v55 = vadd.f32 %v5869_v30, %v2089_v54  ;;  %v2248_v12 = vand.u32 2147483648, %v2221_v3  ;;  %vm2242_vm9 = vweird.f32 %v2221_v3 }
 0x25b   : > { %v2246_v16 = vand.u32 2147483647, %v2221_v3 }
 0x25c   : > { %v2138_v56 = vpop.f32.mrf.mxu1  ;;  %v2249_v62 = vor.u32 1.1754944e-38, %v2248_v12 }
 0x25d   : > { %v2139_v57 = vadd.f32 %v2138_v56, %v2090_v55  ;;  %vm2247_vm12 = vcmp.eq.f32.partialorder %v2246_v16, 8.507059e+37 }
 0x25f   : > { %v4338_v58 = vpop.eup %4337  ;;  %v3854_v46 = vmul.f32 -1.442695, %v2139_v57 }
 0x260   : > { %v4340_v50 = vpop.eup %4339  ;;  %v2222_v63 = vadd.f32 1.0, %v4338_v58 }
 0x261   : > { %v2238_v1 = vmul.f32 %v4340_v50, %v2221_v3  ;;  %4341 = vpow2.f32 %v3854_v46  ;;  %v2091_v17 = vpop.f32.mrf.mxu0  ;;  %vm2243_vm8 = vweird.f32 %v4340_v50 }
 0x262   : > { %4343 = vrcp.f32 %v2222_v63  ;;  %v2092_v14 = vadd.f32 %v5869_v30, %v2091_v17  ;;  %vm5880_vm10 = vmor %vm2242_vm9, %vm2243_vm8  ;;  %v2263_v21 = vand.u32 2147483648, %v2222_v63  ;;  %v2261_v40 = vand.u32 2147483647, %v2222_v63 }
 0x263   : > { %v2239_v61 = vsub.f32 1.0, %v2238_v1  ;;  %vm2257_vm13 = vweird.f32 %v2222_v63 }
 0x264   : > { %v2140_v39 = vpop.f32.mrf.mxu1  ;;  %v2264_v29 = vor.u32 1.1754944e-38, %v2263_v21  ;;  %vm2262_vm15 = vcmp.eq.f32.partialorder %v2261_v40, 8.507059e+37 }
 0x265   : > { %v2141_v36 = vadd.f32 %v2140_v39, %v2092_v14  ;;  %v2240_v42 = vmul.f32 %v4340_v50, %v2239_v61  ;;  %v3870_v14 = vld [vmem:[%s4918_s18 + $0x90] sm:$0xff]  ;;  %v3871_v61 = vld [vmem:[%s4918_s18 + $0x98] sm:$0xff] }
 0x267   : > { %v4342_v4 = vpop.eup %4341  ;;  %v3855_v51 = vmul.f32 -1.442695, %v2141_v36  ;;  %v2241_v15 = vadd.f32 %v4340_v50, %v2240_v42 }
 0x268   : > { %v4344_v37 = vpop.eup %4343  ;;  %v5876_v9 = vadd.f32 1.0, %v4342_v4 }
 0x269   : > { %v2253_v10 = vmul.f32 %v4344_v37, %v2222_v63  ;;  %4345 = vpow2.f32 %v3855_v51  ;;  %v2094_v60 = vpop.f32.mrf.mxu0  ;;  %v2245_v11 = vsel %vm5880_vm10, %v4340_v50, %v2241_v15  ;;  %vm2258_vm11 = vweird.f32 %v4344_v37 }
 0x26a   : > { %4347 = vrcp.f32 %v5876_v9  ;;  %v2095_v19 = vadd.f32 %v5869_v30, %v2094_v60  ;;  %v2250_v28 = vsel %vm2247_vm12, %v2249_v62, %v2245_v11  ;;  %vm2259_vm14 = vmor %vm2257_vm13, %vm2258_vm11  ;;  %v2278_v47 = vand.u32 2147483648, %v5876_v9 }
 0x26b   : > { %v2254_v20 = vsub.f32 1.0, %v2253_v10  ;;  %vm2494_vm0 = vcmp.gt.f32.partialorder %v2250_v28, %v3868_v31  ;;  %vm2272_vm4 = vweird.f32 %v5876_v9  ;;  %v2276_v54 = vand.u32 2147483647, %v5876_v9 }
 0x26c   : > { %v2279_v50 = vor.u32 1.1754944e-38, %v2278_v47 }
 0x26d   : > { %v2255_v6 = vmul.f32 %v4344_v37, %v2254_v20  ;;  %vm2277_vm7 = vcmp.eq.f32.partialorder %v2276_v54, 8.507059e+37 }
 0x26f   : > { %v4346_v22 = vpop.eup %4345  ;;  %v2143_v25 = vpop.f32.mrf.mxu1  ;;  %v2256_v7 = vadd.f32 %v4344_v37, %v2255_v6 }
 0x270   : > { %v4348_v8 = vpop.eup %4347  ;;  %v2224_v26 = vadd.f32 1.0, %v4346_v22  ;;  %v2144_v27 = vadd.f32 %v2143_v25, %v2095_v19 }
 0x271   : > { %v2096_v35 = vpop.f32.mrf.mxu0  ;;  %v2260_v18 = vsel %vm2259_vm14, %v4344_v37, %v2256_v7  ;;  %v2268_v38 = vmul.f32 %v4348_v8, %v5876_v9  ;;  %vm2273_vm3 = vweird.f32 %v4348_v8 }
 0x272   : > { %4349 = vrcp.f32 %v2224_v26  ;;  %v3856_v13 = vmul.f32 -1.442695, %v2144_v27  ;;  %v2265_v5 = vsel %vm2262_vm15, %v2264_v29, %v2260_v18  ;;  %v2097_v23 = vadd.f32 %v5869_v30, %v2096_v35  ;;  %vm2274_vm5 = vmor %vm2272_vm4, %vm2273_vm3 }
 0x273   : > { %vm2495_vm1 = vcmp.gt.f32.partialorder %v2265_v5, %v3869_v34  ;;  %v2269_v24 = vsub.f32 1.0, %v2268_v38  ;;  %v2291_v56 = vand.u32 2147483647, %v2224_v26  ;;  %v2293_v57 = vand.u32 2147483648, %v2224_v26  ;;  %v3872_v5 = vld [vmem:[%s4918_s18 + $0xa0] sm:$0xff] }
 0x274   : > { %4351 = vpow2.f32 %v3856_v13  ;;  %vm3884_vm2 = vmpackc.low %vm2495_vm1, %vm2494_vm0  ;;  %vm2287_vm8 = vweird.f32 %v2224_v26 }
 0x275   : > { %3885 = vmatmul.msk.bf16.vlgmr.msrb.gmra.mxu2 %vm3884_vm2, %v4711_v49  ;;  %3901 = vmatmul.msk.bf16.vlgmr.msrb.gmra.mxu3 %vm3884_vm2, %v4711_v49  ;;  %v2270_v41 = vmul.f32 %v4348_v8, %v2269_v24  ;;  %v2294_v17 = vor.u32 1.1754944e-38, %v2293_v57  ;;  %vm2292_vm10 = vcmp.eq.f32.partialorder %v2291_v56, 8.507059e+37  ;;  %v3873_v24 = vld [vmem:[%s4918_s18 + $0xa8] sm:$0xff] }
 0x277   : > { %v2145_v45 = vpop.f32.mrf.mxu1  ;;  %v2271_v52 = vadd.f32 %v4348_v8, %v2270_v41 }
 0x278   : > { %v4350_v44 = vpop.eup %4349  ;;  %v2146_v2 = vadd.f32 %v2145_v45, %v2097_v23 }
 0x279   : > { %v2099_v48 = vpop.f32.mrf.mxu0  ;;  %v2283_v43 = vmul.f32 %v4350_v44, %v2224_v26  ;;  %v2275_v58 = vsel %vm2274_vm5, %v4348_v8, %v2271_v52  ;;  %vm2288_vm6 = vweird.f32 %v4350_v44 }
 0x27a   : > { %v4352_v53 = vpop.eup %4351  ;;  %v3857_v0 = vmul.f32 -1.442695, %v2146_v2  ;;  %v2280_v1 = vsel %vm2277_vm7, %v2279_v50, %v2275_v58  ;;  %vm2289_vm9 = vmor %vm2287_vm8, %vm2288_vm6  ;;  %v2100_v39 = vadd.f32 %v5869_v30, %v2099_v48 }
 0x27b   : > { %v5893_v3 = vadd.f32 1.0, %v4352_v53  ;;  %v2284_v55 = vsub.f32 1.0, %v2283_v43  ;;  %vm2496_vm11 = vcmp.gt.f32.partialorder %v2280_v1, %v3870_v14 }
 0x27c   : > { %4353 = vpow2.f32 %v3857_v0 }
 0x27d   : > { %4355 = vrcp.f32 %v5893_v3  ;;  %v2285_v46 = vmul.f32 %v4350_v44, %v2284_v55  ;;  %v2308_v22 = vand.u32 2147483648, %v5893_v3  ;;  %vm2302_vm15 = vweird.f32 %v5893_v3 }
 0x27e   : > { %v2306_v25 = vand.u32 2147483647, %v5893_v3 }
 0x27f   : > { %v2286_v63 = vadd.f32 %v4350_v44, %v2285_v46  ;;  %v2309_v35 = vor.u32 1.1754944e-38, %v2308_v22 }
 0x280   : > { %vm2307_vm2 = vcmp.eq.f32.partialorder %v2306_v25, 8.507059e+37 }
 0x281   : > { %v2290_v36 = vsel %vm2289_vm9, %v4350_v44, %v2286_v63  ;;  %v2101_v4 = vpop.f32.mrf.mxu0 }
 0x282   : > { %v4354_v42 = vpop.eup %4353  ;;  %v2295_v51 = vsel %vm2292_vm10, %v2294_v17, %v2290_v36  ;;  %v2102_v19 = vadd.f32 %v5869_v30, %v2101_v4 }
 0x283   : > { %v4356_v37 = vpop.eup %4355  ;;  %v2226_v9 = vadd.f32 1.0, %v4354_v42  ;;  %vm2497_vm12 = vcmp.gt.f32.partialorder %v2295_v51, %v3871_v61 }
 0x284   : > { %v2148_v10 = vpop.f32.mrf.mxu1  ;;  %vm3886_vm13 = vmpackc.low %vm2497_vm12, %vm2496_vm11  ;;  %v2298_v60 = vmul.f32 %v4356_v37, %v5893_v3  ;;  %vm2303_vm14 = vweird.f32 %v4356_v37 }
 0x285   : > { %4357 = vrcp.f32 %v2226_v9  ;;  %v2149_v15 = vadd.f32 %v2148_v10, %v2100_v39  ;;  %3887 = vmatmul.msk.bf16.gmra.mxu2 %vm3886_vm13, %v4711_v49  ;;  %3903 = vmatmul.msk.bf16.gmra.mxu3 %vm3886_vm13, %v4711_v49  ;;  %vm2304_vm0 = vmor %vm2302_vm15, %vm2303_vm14  ;;  %v2321_v27 = vand.u32 2147483647, %v2226_v9  ;;  %v2323_v28 = vand.u32 2147483648, %v2226_v9 }
 0x286   : > { %v2299_v12 = vsub.f32 1.0, %v2298_v60  ;;  %vm2317_vm3 = vweird.f32 %v2226_v9 }
 0x287   : > { %v3858_v16 = vmul.f32 -1.442695, %v2149_v15  ;;  %v2324_v13 = vor.u32 1.1754944e-38, %v2323_v28  ;;  %vm2322_vm5 = vcmp.eq.f32.partialorder %v2321_v27, 8.507059e+37 }
 0x288   : > { %v2300_v20 = vmul.f32 %v4356_v37, %v2299_v12 }
 0x289   : > { %4359 = vpow2.f32 %v3858_v16 }
 0x28a   : > { %v2301_v6 = vadd.f32 %v4356_v37, %v2300_v20  ;;  %v3874_v20 = vld [vmem:[%s4918_s18 + $0xb0] sm:$0xff] }
 0x28b   : > { %v4358_v59 = vpop.eup %4357 }
 0x28c   : > { %v2150_v21 = vpop.f32.mrf.mxu1  ;;  %v2104_v11 = vpop.f32.mrf.mxu0  ;;  %v2313_v40 = vmul.f32 %v4358_v59, %v2226_v9  ;;  %v2305_v31 = vsel %vm2304_vm0, %v4356_v37, %v2301_v6  ;;  %vm2318_vm1 = vweird.f32 %v4358_v59 }
 0x28d   : > { %v2151_v62 = vadd.f32 %v2150_v21, %v2102_v19  ;;  %v2310_v38 = vsel %vm2307_vm2, %v2309_v35, %v2305_v31  ;;  %vm2319_vm4 = vmor %vm2317_vm3, %vm2318_vm1  ;;  %v2105_v23 = vadd.f32 %v5869_v30, %v2104_v11  ;;  %v3875_v19 = vld [vmem:[%s4918_s18 + $0xb8] sm:$0xff] }
 0x28e   : > { %v2314_v7 = vsub.f32 1.0, %v2313_v40  ;;  %vm2498_vm6 = vcmp.gt.f32.partialorder %v2310_v38, %v3872_v5 }
 0x28f   : > { %v4360_v8 = vpop.eup %4359  ;;  %v3859_v26 = vmul.f32 -1.442695, %v2151_v62 }
 0x290   : > { %v2227_v29 = vadd.f32 1.0, %v4360_v8  ;;  %v2315_v34 = vmul.f32 %v4358_v59, %v2314_v7 }
 0x291   : > { %4361 = vpow2.f32 %v3859_v26 }
 0x292   : > { %4363 = vrcp.f32 %v2227_v29  ;;  %v2316_v18 = vadd.f32 %v4358_v59, %v2315_v34  ;;  %v2338_v14 = vand.u32 2147483648, %v2227_v29  ;;  %vm2332_vm10 = vweird.f32 %v2227_v29 }
 0x293   : > { %v2336_v39 = vand.u32 2147483647, %v2227_v29 }
 0x294   : > { %v2320_v41 = vsel %vm2319_vm4, %v4358_v59, %v2316_v18  ;;  %v2106_v44 = vpop.f32.mrf.mxu0  ;;  %v2339_v9 = vor.u32 1.1754944e-38, %v2338_v14 }
 0x295   : > { %v2325_v45 = vsel %vm2322_vm5, %v2324_v13, %v2320_v41  ;;  %v2107_v54 = vadd.f32 %v5869_v30, %v2106_v44  ;;  %vm2337_vm13 = vcmp.eq.f32.partialorder %v2336_v39, 8.507059e+37 }
 0x296   : > { %vm2499_vm7 = vcmp.gt.f32.partialorder %v2325_v45, %v3873_v24  ;;  %v2153_v48 = vpop.f32.mrf.mxu1 }
 0x297   : > { %v4362_v2 = vpop.eup %4361  ;;  %vm3888_vm8 = vmpackc.low %vm2499_vm7, %vm2498_vm6  ;;  %v2154_v53 = vadd.f32 %v2153_v48, %v2105_v23 }
 0x298   : > { %v4364_v52 = vpop.eup %4363  ;;  %v2228_v43 = vadd.f32 1.0, %v4362_v2  ;;  %3889 = vmatmul.msk.bf16.gmra.mxu2 %vm3888_vm8, %v4711_v49  ;;  %3905 = vmatmul.msk.bf16.gmra.mxu3 %vm3888_vm8, %v4711_v49 }
 0x299   : > { %v2328_v0 = vmul.f32 %v4364_v52, %v2227_v29  ;;  %v3860_v47 = vmul.f32 -1.442695, %v2154_v53  ;;  %vm2333_vm9 = vweird.f32 %v4364_v52 }
 0x29a   : > { %4365 = vrcp.f32 %v2228_v43  ;;  %vm2334_vm11 = vmor %vm2332_vm10, %vm2333_vm9  ;;  %v2351_v42 = vand.u32 2147483647, %v2228_v43  ;;  %v2353_v4 = vand.u32 2147483648, %v2228_v43  ;;  %vm2347_vm14 = vweird.f32 %v2228_v43 }
 0x29b   : > { %v2329_v3 = vsub.f32 1.0, %v2328_v0  ;;  %4367 = vpow2.f32 %v3860_v47 }
 0x29c   : > { %v2354_v16 = vor.u32 1.1754944e-38, %v2353_v4  ;;  %vm2352_vm0 = vcmp.eq.f32.partialorder %v2351_v42, 8.507059e+37 }
 0x29d   : > { %v2330_v55 = vmul.f32 %v4364_v52, %v2329_v3 }
 0x29e   : > { %v2155_v56 = vpop.f32.mrf.mxu1 }
 0x29f   : > { %v2156_v58 = vadd.f32 %v2155_v56, %v2107_v54  ;;  %v2109_v46 = vpop.f32.mrf.mxu0  ;;  %v2331_v50 = vadd.f32 %v4364_v52, %v2330_v55  ;;  %v3876_v56 = vld [vmem:[%s4918_s18 + $0xc0] sm:$0xff] }
 0x2a0   : > { %v4366_v57 = vpop.eup %4365  ;;  %v2110_v10 = vadd.f32 %v5869_v30, %v2109_v46 }
 0x2a1   : > { %v2343_v63 = vmul.f32 %v4366_v57, %v2228_v43  ;;  %v4368_v1 = vpop.eup %4367  ;;  %v3861_v17 = vmul.f32 -1.442695, %v2156_v58  ;;  %v2335_v51 = vsel %vm2334_vm11, %v4364_v52, %v2331_v50  ;;  %vm2348_vm12 = vweird.f32 %v4366_v57 }
 0x2a2   : > { %v5914_v61 = vadd.f32 1.0, %v4368_v1  ;;  %v2340_v12 = vsel %vm2337_vm13, %v2339_v9, %v2335_v51  ;;  %vm2349_vm15 = vmor %vm2347_vm14, %vm2348_vm12 }
 0x2a3   : > { %v2344_v36 = vsub.f32 1.0, %v2343_v63  ;;  %4369 = vpow2.f32 %v3861_v17  ;;  %vm2500_vm1 = vcmp.gt.f32.partialorder %v2340_v12, %v3874_v20 }
 0x2a4   : > { %4371 = vrcp.f32 %v5914_v61  ;;  %v2368_v5 = vand.u32 2147483648, %v5914_v61  ;;  %vm2362_vm5 = vweird.f32 %v5914_v61  ;;  %v2366_v23 = vand.u32 2147483647, %v5914_v61 }
 0x2a5   : > { %v2345_v37 = vmul.f32 %v4366_v57, %v2344_v36 }
 0x2a6   : > { %v2369_v53 = vor.u32 1.1754944e-38, %v2368_v5  ;;  %vm2367_vm8 = vcmp.eq.f32.partialorder %v2366_v23, 8.507059e+37 }
 0x2a7   : > { %v2346_v60 = vadd.f32 %v4366_v57, %v2345_v37  ;;  %v2111_v15 = vpop.f32.mrf.mxu0 }
 0x2a8   : > { %v2112_v26 = vadd.f32 %v5869_v30, %v2111_v15 }
 0x2a9   : > { %v2350_v59 = vsel %vm2349_vm15, %v4366_v57, %v2346_v60  ;;  %v4370_v21 = vpop.eup %4369  ;;  %v2158_v11 = vpop.f32.mrf.mxu1  ;;  %v3877_v57 = vld [vmem:[%s4918_s18 + $0xc8] sm:$0xff] }
 0x2aa   : > { %v2355_v6 = vsel %vm2352_vm0, %v2354_v16, %v2350_v59  ;;  %v4372_v40 = vpop.eup %4371  ;;  %v2230_v62 = vadd.f32 1.0, %v4370_v21  ;;  %v2159_v22 = vadd.f32 %v2158_v11, %v2110_v10 }
 0x2ab   : > { %vm2501_vm2 = vcmp.gt.f32.partialorder %v2355_v6, %v3875_v19  ;;  %v2358_v25 = vmul.f32 %v4372_v40, %v5914_v61  ;;  %vm2363_vm4 = vweird.f32 %v4372_v40 }
 0x2ac   : > { %vm3890_vm3 = vmpackc.low %vm2501_vm2, %vm2500_vm1  ;;  %4373 = vrcp.f32 %v2230_v62  ;;  %v3862_v7 = vmul.f32 -1.442695, %v2159_v22  ;;  %v2381_v44 = vand.u32 2147483647, %v2230_v62  ;;  %v2383_v2 = vand.u32 2147483648, %v2230_v62 }
 0x2ad   : > { %3891 = vmatmul.msk.bf16.gmra.mxu2 %vm3890_vm3, %v4711_v49  ;;  %3907 = vmatmul.msk.bf16.gmra.mxu3 %vm3890_vm3, %v4711_v49  ;;  %v2359_v8 = vsub.f32 1.0, %v2358_v25  ;;  %vm2364_vm6 = vmor %vm2362_vm5, %vm2363_vm4  ;;  %vm2377_vm9 = vweird.f32 %v2230_v62 }
 0x2ae   : > { %4375 = vpow2.f32 %v3862_v7  ;;  %v2384_v55 = vor.u32 1.1754944e-38, %v2383_v2  ;;  %vm2382_vm11 = vcmp.eq.f32.partialorder %v2381_v44, 8.507059e+37 }
 0x2af   : > { %v2114_v27 = vpop.f32.mrf.mxu0  ;;  %v2360_v28 = vmul.f32 %v4372_v40, %v2359_v8 }
 0x2b0   : > { %v2115_v45 = vadd.f32 %v5869_v30, %v2114_v27 }
 0x2b1   : > { %v2160_v29 = vpop.f32.mrf.mxu1  ;;  %v2361_v18 = vadd.f32 %v4372_v40, %v2360_v28 }
 0x2b2   : > { %v4374_v31 = vpop.eup %4373  ;;  %v2161_v34 = vadd.f32 %v2160_v29, %v2112_v26 }
 0x2b3   : > { %v2373_v35 = vmul.f32 %v4374_v31, %v2230_v62  ;;  %v2365_v52 = vsel %vm2364_vm6, %v4372_v40, %v2361_v18  ;;  %vm2378_vm7 = vweird.f32 %v4374_v31  ;;  %v3878_v18 = vld [vmem:[%s4918_s18 + $0xd0] sm:$0xff] }
 0x2b4   : > { %v4376_v38 = vpop.eup %4375  ;;  %v3863_v13 = vmul.f32 -1.442695, %v2161_v34  ;;  %v2370_v54 = vsel %vm2367_vm8, %v2369_v53, %v2365_v52  ;;  %vm2379_vm10 = vmor %vm2377_vm9, %vm2378_vm7 }
 0x2b5   : > { %v5925_v24 = vadd.f32 1.0, %v4376_v38  ;;  %v2374_v41 = vsub.f32 1.0, %v2373_v35  ;;  %vm2502_vm12 = vcmp.gt.f32.partialorder %v2370_v54, %v3876_v56  ;;  %v3879_v38 = vld [vmem:[%s4918_s18 + $0xd8] sm:$0xff] }
 0x2b6   : > { %4377 = vpow2.f32 %v3863_v13 }
 0x2b7   : > { %4379 = vrcp.f32 %v5925_v24  ;;  %v2116_v48 = vpop.f32.mrf.mxu0  ;;  %v2375_v43 = vmul.f32 %v4374_v31, %v2374_v41  ;;  %v2398_v20 = vand.u32 2147483648, %v5925_v24  ;;  %vm2392_vm0 = vweird.f32 %v5925_v24 }
 0x2b8   : > { %v2117_v61 = vadd.f32 %v5869_v30, %v2116_v48  ;;  %v2396_v19 = vand.u32 2147483647, %v5925_v24 }
 0x2b9   : > { %v2163_v0 = vpop.f32.mrf.mxu1  ;;  %v2376_v47 = vadd.f32 %v4374_v31, %v2375_v43  ;;  %v2399_v8 = vor.u32 1.1754944e-38, %v2398_v20 }
 0x2ba   : > { %v2164_v3 = vadd.f32 %v2163_v0, %v2115_v45  ;;  %vm2397_vm3 = vcmp.eq.f32.partialorder %v2396_v19, 8.507059e+37 }
 0x2bb   : > { %v2380_v58 = vsel %vm2379_vm10, %v4374_v31, %v2376_v47 }
 0x2bc   : > { %v4378_v46 = vpop.eup %4377  ;;  %v3864_v50 = vmul.f32 -1.442695, %v2164_v3  ;;  %v2385_v63 = vsel %vm2382_vm11, %v2384_v55, %v2380_v58 }
 0x2bd   : > { %v4380_v1 = vpop.eup %4379  ;;  %v2232_v17 = vadd.f32 1.0, %v4378_v46  ;;  %vm2503_vm13 = vcmp.gt.f32.partialorder %v2385_v63, %v3877_v57 }
 0x2be   : > { %v2388_v14 = vmul.f32 %v4380_v1, %v5925_v24  ;;  %4381 = vpow2.f32 %v3864_v50  ;;  %vm3892_vm14 = vmpackc.low %vm2503_vm13, %vm2502_vm12  ;;  %vm2393_vm15 = vweird.f32 %v4380_v1 }
 0x2bf   : > { %4383 = vrcp.f32 %v2232_v17  ;;  %3893 = vmatmul.msk.bf16.gmra.mxu2 %vm3892_vm14, %v4711_v49  ;;  %3909 = vmatmul.msk.bf16.gmra.mxu3 %vm3892_vm14, %v4711_v49  ;;  %v2119_v42 = vpop.f32.mrf.mxu0  ;;  %vm5944_vm1 = vmor %vm2392_vm0, %vm2393_vm15  ;;  %v2411_v6 = vand.u32 2147483647, %v2232_v17  ;;  %v2413_v40 = vand.u32 2147483648, %v2232_v17  ;;  %vm2407_vm4 = vweird.f32 %v2232_v17 }
 0x2c0   : > { %v2389_v39 = vsub.f32 1.0, %v2388_v14  ;;  %v2120_v12 = vadd.f32 %v5869_v30, %v2119_v42 }
 0x2c1   : > { %v2165_v36 = vpop.f32.mrf.mxu1  ;;  %vm2412_vm6 = vcmp.eq.f32.partialorder %v2411_v6, 8.507059e+37  ;;  %v2414_v35 = vor.u32 1.1754944e-38, %v2413_v40 }
 0x2c2   : > { %v2166_v4 = vadd.f32 %v2165_v36, %v2117_v61  ;;  %v2390_v51 = vmul.f32 %v4380_v1, %v2389_v39  ;;  %v3880_v39 = vld [vmem:[%s4918_s18 + $0xe0] sm:$0xff]  ;;  %v3881_v36 = vld [vmem:[%s4918_s18 + $0xe8] sm:$0xff] }
 0x2c4   : > { %v4382_v37 = vpop.eup %4381  ;;  %v3865_v9 = vmul.f32 -1.442695, %v2166_v4  ;;  %v2391_v16 = vadd.f32 %v4380_v1, %v2390_v51 }
 0x2c5   : > { %v4384_v10 = vpop.eup %4383  ;;  %v5937_v60 = vadd.f32 1.0, %v4382_v37 }
 0x2c6   : > { %v2403_v15 = vmul.f32 %v4384_v10, %v2232_v17  ;;  %4385 = vpow2.f32 %v3865_v9  ;;  %v2395_v22 = vsel %vm5944_vm1, %v4380_v1, %v2391_v16  ;;  %vm2408_vm2 = vweird.f32 %v4384_v10 }
 0x2c7   : > { %4387 = vrcp.f32 %v5937_v60  ;;  %v2121_v7 = vpop.f32.mrf.mxu0  ;;  %v2400_v34 = vsel %vm2397_vm3, %v2399_v8, %v2395_v22  ;;  %vm2409_vm5 = vmor %vm2407_vm4, %vm2408_vm2  ;;  %v2428_v47 = vand.u32 2147483648, %v5937_v60  ;;  %vm2422_vm11 = vweird.f32 %v5937_v60 }
 0x2c8   : > { %v2404_v59 = vsub.f32 1.0, %v2403_v15  ;;  %v2122_v5 = vadd.f32 %v5869_v30, %v2121_v7  ;;  %vm2504_vm7 = vcmp.gt.f32.partialorder %v2400_v34, %v3878_v18  ;;  %v2426_v3 = vand.u32 2147483647, %v5937_v60  ;;  %v3883_v7 = vld [vmem:[%s4918_s18 + $0xf8] sm:$0xff] }
 0x2c9   : > { %v2168_v21 = vpop.f32.mrf.mxu1  ;;  %v2429_v46 = vor.u32 1.1754944e-38, %v2428_v47 }
 0x2ca   : > { %v2169_v62 = vadd.f32 %v2168_v21, %v2120_v12  ;;  %v2405_v25 = vmul.f32 %v4384_v10, %v2404_v59  ;;  %vm2427_vm14 = vcmp.eq.f32.partialorder %v2426_v3, 8.507059e+37 }
 0x2cc   : > { %v4386_v26 = vpop.eup %4385  ;;  %v3866_v27 = vmul.f32 -1.442695, %v2169_v62  ;;  %v2406_v28 = vadd.f32 %v4384_v10, %v2405_v25  ;;  %v3882_v25 = vld [vmem:[%s4918_s18 + $0xf0] sm:$0xff] }
 0x2cd   : > { %v4388_v29 = vpop.eup %4387  ;;  %v2234_v31 = vadd.f32 1.0, %v4386_v26 }
 0x2ce   : > { %v2418_v13 = vmul.f32 %v4388_v29, %v5937_v60  ;;  %4389 = vpow2.f32 %v3866_v27  ;;  %v2410_v24 = vsel %vm2409_vm5, %v4384_v10, %v2406_v28  ;;  %vm2423_vm10 = vweird.f32 %v4388_v29 }
 0x2cf   : > { %4391 = vrcp.f32 %v2234_v31  ;;  %v2415_v23 = vsel %vm2412_vm6, %v2414_v35, %v2410_v24  ;;  %vm2424_vm12 = vmor %vm2422_vm11, %vm2423_vm10  ;;  %v2443_v55 = vand.u32 2147483648, %v2234_v31  ;;  %v2441_v58 = vand.u32 2147483647, %v2234_v31 }
 0x2d0   : > { %vm2505_vm8 = vcmp.gt.f32.partialorder %v2415_v23, %v3879_v38  ;;  %v2419_v41 = vsub.f32 1.0, %v2418_v13  ;;  %vm2437_vm15 = vweird.f32 %v2234_v31 }
 0x2d1   : > { %v2170_v45 = vpop.f32.mrf.mxu1  ;;  %vm3894_vm9 = vmpackc.low %vm2505_vm8, %vm2504_vm7  ;;  %v2444_v61 = vor.u32 1.1754944e-38, %v2443_v55  ;;  %vm2442_vm1 = vcmp.eq.f32.partialorder %v2441_v58, 8.507059e+37 }
 0x2d2   : > { %v2171_v44 = vadd.f32 %v2170_v45, %v2122_v5  ;;  %3895 = vmatmul.msk.bf16.gmra.mxu2 %vm3894_vm9, %v4711_v49  ;;  %3911 = vmatmul.msk.bf16.gmra.mxu3 %vm3894_vm9, %v4711_v49  ;;  %v2420_v2 = vmul.f32 %v4388_v29, %v2419_v41 }
 0x2d4   : > { %v4390_v48 = vpop.eup %4389  ;;  %v3867_v52 = vmul.f32 -1.442695, %v2171_v44  ;;  %v2421_v30 = vadd.f32 %v4388_v29, %v2420_v2 }
 0x2d5   : > { %v4392_v43 = vpop.eup %4391  ;;  %v2235_v53 = vadd.f32 1.0, %v4390_v48 }
 0x2d6   : > { %v2433_v0 = vmul.f32 %v4392_v43, %v2234_v31  ;;  %4393 = vpow2.f32 %v3867_v52  ;;  %v2425_v56 = vsel %vm2424_vm12, %v4388_v29, %v2421_v30  ;;  %vm2438_vm13 = vweird.f32 %v4392_v43 }
 0x2d7   : > { %4395 = vrcp.f32 %v2235_v53  ;;  %v2430_v14 = vsel %vm2427_vm14, %v2429_v46, %v2425_v56  ;;  %vm2439_vm0 = vmor %vm2437_vm15, %vm2438_vm13  ;;  %v2458_v12 = vand.u32 2147483648, %v2235_v53  ;;  %vm2452_vm6 = vweird.f32 %v2235_v53 }
 0x2d8   : > { %v2434_v54 = vsub.f32 1.0, %v2433_v0  ;;  %vm2506_vm2 = vcmp.gt.f32.partialorder %v2430_v14, %v3880_v39  ;;  %v2456_v16 = vand.u32 2147483647, %v2235_v53 }
 0x2d9   : > { %v2459_v6 = vor.u32 1.1754944e-38, %v2458_v12 }
 0x2da   : > { %v2435_v57 = vmul.f32 %v4392_v43, %v2434_v54  ;;  %vm2457_vm9 = vcmp.eq.f32.partialorder %v2456_v16, 8.507059e+37 }
 0x2dc   : > { %v4394_v50 = vpop.eup %4393  ;;  %v2436_v63 = vadd.f32 %v4392_v43, %v2435_v57 }
 0x2dd   : > { %v4396_v1 = vpop.eup %4395  ;;  %v2236_v17 = vadd.f32 1.0, %v4394_v50 }
 0x2de   : > { %v2448_v42 = vmul.f32 %v4396_v1, %v2235_v53  ;;  %v2440_v4 = vsel %vm2439_vm0, %v4392_v43, %v2436_v63  ;;  %vm2453_vm5 = vweird.f32 %v4396_v1 }
 0x2df   : > { %4397 = vrcp.f32 %v2236_v17  ;;  %v2445_v51 = vsel %vm2442_vm1, %v2444_v61, %v2440_v4  ;;  %vm2454_vm7 = vmor %vm2452_vm6, %vm2453_vm5  ;;  %v2473_v19 = vand.u32 2147483648, %v2236_v17  ;;  %v2471_v11 = vand.u32 2147483647, %v2236_v17 }
 0x2e0   : > { %vm2507_vm3 = vcmp.gt.f32.partialorder %v2445_v51, %v3881_v36  ;;  %v2449_v37 = vsub.f32 1.0, %v2448_v42  ;;  %vm2467_vm10 = vweird.f32 %v2236_v17 }
 0x2e1   : > { %vm3896_vm4 = vmpackc.low %vm2507_vm3, %vm2506_vm2  ;;  %v2474_v22 = vor.u32 1.1754944e-38, %v2473_v19  ;;  %vm2472_vm12 = vcmp.eq.f32.partialorder %v2471_v11, 8.507059e+37 }
 0x2e2   : > { %3897 = vmatmul.msk.bf16.gmra.mxu2 %vm3896_vm4, %v4711_v49  ;;  %3913 = vmatmul.msk.bf16.gmra.mxu3 %vm3896_vm4, %v4711_v49  ;;  %v2450_v9 = vmul.f32 %v4396_v1, %v2449_v37 }
 0x2e4   : > { %v2451_v15 = vadd.f32 %v4396_v1, %v2450_v9 }
 0x2e5   : > { %v4398_v10 = vpop.eup %4397 }
 0x2e6   : > { %v2463_v60 = vmul.f32 %v4398_v10, %v2236_v17  ;;  %v2455_v59 = vsel %vm2454_vm7, %v4396_v1, %v2451_v15  ;;  %vm2468_vm8 = vweird.f32 %v4398_v10  ;;  %v3948_v15 = vld [vmem:[%s5233_s19 + $0x100] sm:$0xff] }
 0x2e7   : > { %v2460_v62 = vsel %vm2457_vm9, %v2459_v6, %v2455_v59  ;;  %vm2469_vm11 = vmor %vm2467_vm10, %vm2468_vm8 }
 0x2e8   : > { %v2464_v20 = vsub.f32 1.0, %v2463_v60  ;;  %vm2508_vm13 = vcmp.gt.f32.partialorder %v2460_v62, %v3882_v25 }
 0x2ea   : > { %v2465_v21 = vmul.f32 %v4398_v10, %v2464_v20 }
 0x2ec   : > { %v2466_v40 = vadd.f32 %v4398_v10, %v2465_v21  ;;  %v3949_v21 = vld [vmem:[%s5233_s19 + $0x108] sm:$0xff] }
 0x2ee   : > { %v2470_v8 = vsel %vm2469_vm11, %v4398_v10, %v2466_v40 }
 0x2ef   : > { %v2475_v26 = vsel %vm2472_vm12, %v2474_v22, %v2470_v8 }
 0x2f0   : > { %vm2509_vm14 = vcmp.gt.f32.partialorder %v2475_v26, %v3883_v7 }
 0x2f1   : > { %vm3898_vm15 = vmpackc.low %vm2509_vm14, %vm2508_vm13 }
 0x2f2   : > { %3899 = vmatmul.msk.bf16.gmra.mxu2 %vm3898_vm15, %v4711_v49  ;;  %3915 = vmatmul.msk.bf16.gmra.mxu3 %vm3898_vm15, %v4711_v49 }
 0x2f8   : > { %v2543_v27 = vpop.f32.mrf.mxu2  ;;  %v2592_v28 = vpop.f32.mrf.mxu3 }
 0x2f9   : > { %v2544_v29 = vadd.f32 %v2543_v27, %v5161_v32  ;;  %v2593_v31 = vadd.f32 %v2592_v28, %v5163_v33 }
 0x2fb   : > { %v3916_v34 = vmul.f32 -1.442695, %v2544_v29  ;;  %v3917_v35 = vmul.f32 -1.442695, %v2593_v31  ;;  %v4712_v29 = vmov 0.0  }
 0x2fd   : > { %4399 = vpow2.f32 %v3916_v34 }
 0x2fe   : > { %4401 = vpow2.f32 %v3917_v35 }
 0x300   : > { %v2545_v18 = vpop.f32.mrf.mxu2  ;;  %v2594_v38 = vpop.f32.mrf.mxu3 }
 0x301   : > { %v2546_v13 = vadd.f32 %v2545_v18, %v5161_v32  ;;  %v2595_v5 = vadd.f32 %v2594_v38, %v5163_v33 }
 0x303   : > { %v4400_v24 = vpop.eup %4399  ;;  %v3918_v23 = vmul.f32 -1.442695, %v2546_v13  ;;  %v3919_v45 = vmul.f32 -1.442695, %v2595_v5 }
 0x304   : > { %v4402_v41 = vpop.eup %4401  ;;  %v2728_v49 = vadd.f32 1.0, %v4400_v24 }
 0x305   : > { %v2729_v44 = vadd.f32 1.0, %v4402_v41  ;;  %4403 = vpow2.f32 %v3918_v23 }
 0x306   : > { %4405 = vrcp.f32 %v2728_v49  ;;  %v2769_v46 = vand.u32 2147483647, %v2728_v49  ;;  %v2771_v50 = vand.u32 2147483648, %v2728_v49  ;;  %vm2765_vm1 = vweird.f32 %v2728_v49 }
 0x307   : > { %4407 = vrcp.f32 %v2729_v44  ;;  %v2784_v17 = vand.u32 2147483647, %v2729_v44  ;;  %v2786_v14 = vand.u32 2147483648, %v2729_v44  ;;  %vm2780_vm2 = vweird.f32 %v2729_v44 }
 0x308   : > { %4409 = vpow2.f32 %v3919_v45  ;;  %v2548_v2 = vpop.f32.mrf.mxu2  ;;  %v2597_v48 = vpop.f32.mrf.mxu3  ;;  %vm5979_vm4 = vcmp.eq.f32.partialorder %v2769_v46, 8.507059e+37  ;;  %v2772_v9 = vor.u32 1.1754944e-38, %v2771_v50 }
 0x309   : > { %v2549_v52 = vadd.f32 %v2548_v2, %v5161_v32  ;;  %v2598_v43 = vadd.f32 %v2597_v48, %v5163_v33  ;;  %vm5985_vm6 = vcmp.eq.f32.partialorder %v2784_v17, 8.507059e+37  ;;  %v2787_v20 = vor.u32 1.1754944e-38, %v2786_v14  ;;  %v3950_v2 = vld [vmem:[%s5233_s19 + $0x110] sm:$0xff] }
 0x30b   : > { %v4404_v53 = vpop.eup %4403  ;;  %v3920_v0 = vmul.f32 -1.442695, %v2549_v52  ;;  %v3921_v3 = vmul.f32 -1.442695, %v2598_v43 }
 0x30c   : > { %v4406_v30 = vpop.eup %4405  ;;  %v5973_v47 = vadd.f32 1.0, %v4404_v53 }
 0x30d   : > { %v4408_v54 = vpop.eup %4407  ;;  %v2761_v55 = vmul.f32 %v4406_v30, %v2728_v49  ;;  %4411 = vpow2.f32 %v3920_v0  ;;  %vm2766_vm0 = vweird.f32 %v4406_v30 }
 0x30e   : > { %v4410_v56 = vpop.eup %4409  ;;  %v2776_v57 = vmul.f32 %v4408_v54, %v2729_v44  ;;  %4413 = vrcp.f32 %v5973_v47  ;;  %vm2781_vm3 = vweird.f32 %v4408_v54  ;;  %vm2767_vm5 = vmor %vm2765_vm1, %vm2766_vm0  ;;  %v2799_v6 = vand.u32 2147483647, %v5973_v47 }
 0x30f   : > { %v2762_v58 = vsub.f32 1.0, %v2761_v55  ;;  %v5976_v63 = vadd.f32 1.0, %v4410_v56  ;;  %4415 = vpow2.f32 %v3921_v3  ;;  %vm2782_vm7 = vmor %vm2780_vm2, %vm2781_vm3  ;;  %v2801_v28 = vand.u32 2147483648, %v5973_v47  ;;  %v3951_v55 = vld [vmem:[%s5233_s19 + $0x118] sm:$0xff] }
 0x310   : > { %v2777_v1 = vsub.f32 1.0, %v2776_v57  ;;  %v2550_v61 = vpop.f32.mrf.mxu2  ;;  %v2599_v42 = vpop.f32.mrf.mxu3  ;;  %vm2795_vm11 = vweird.f32 %v5973_v47  ;;  %vm2800_vm12 = vcmp.eq.f32.partialorder %v2799_v6, 8.507059e+37 }
 0x311   : > { %v2763_v39 = vmul.f32 %v4406_v30, %v2762_v58  ;;  %4417 = vrcp.f32 %v5976_v63  ;;  %v2551_v10 = vadd.f32 %v2550_v61, %v5161_v32  ;;  %v2600_v40 = vadd.f32 %v2599_v42, %v5163_v33 }
 0x312   : > { %v2778_v36 = vmul.f32 %v4408_v54, %v2777_v1  ;;  %v2814_v35 = vand.u32 2147483647, %v5976_v63  ;;  %v2816_v13 = vand.u32 2147483648, %v5976_v63  ;;  %v2802_v49 = vor.u32 1.1754944e-38, %v2801_v28 }
 0x313   : > { %v4412_v4 = vpop.eup %4411  ;;  %v2764_v51 = vadd.f32 %v4406_v30, %v2763_v39  ;;  %v3922_v7 = vmul.f32 -1.442695, %v2551_v10  ;;  %v3923_v23 = vmul.f32 -1.442695, %v2600_v40  ;;  %vm2810_vm14 = vweird.f32 %v5976_v63 }
 0x314   : > { %v4414_v60 = vpop.eup %4413  ;;  %v2779_v12 = vadd.f32 %v4408_v54, %v2778_v36  ;;  %v5989_v19 = vadd.f32 1.0, %v4412_v4  ;;  %vm6020_vm0 = vcmp.eq.f32.partialorder %v2814_v35, 8.507059e+37  ;;  %v2817_v0 = vor.u32 1.1754944e-38, %v2816_v13 }
 0x315   : > { %v2768_v59 = vsel %vm2767_vm5, %v4406_v30, %v2764_v51  ;;  %v2791_v11 = vmul.f32 %v4414_v60, %v5973_v47  ;;  %v4416_v62 = vpop.eup %4415  ;;  %vm2796_vm10 = vweird.f32 %v4414_v60 }
 0x316   : > { %v2773_v22 = vsel %vm5979_vm4, %v2772_v9, %v2768_v59  ;;  %v2783_v25 = vsel %vm2782_vm7, %v4408_v54, %v2779_v12  ;;  %4419 = vrcp.f32 %v5989_v19  ;;  %v6014_v24 = vadd.f32 1.0, %v4416_v62  ;;  %vm2797_vm13 = vmor %vm2795_vm11, %vm2796_vm10 }
 0x317   : > { %v4418_v8 = vpop.eup %4417  ;;  %vm3273_vm8 = vcmp.gt.f32.partialorder %v2773_v22, %v3948_v15  ;;  %v2788_v26 = vsel %vm5985_vm6, %v2787_v20, %v2783_v25  ;;  %v2792_v27 = vsub.f32 1.0, %v2791_v11  ;;  %4421 = vpow2.f32 %v3922_v7  ;;  %v3953_v25 = vld [vmem:[%s5233_s19 + $0x128] sm:$0xff] }
 0x318   : > { %v3305_v31 = vsel %vm3273_vm8, 1.0, %v4712_v29  ;;  %vm3274_vm9 = vcmp.gt.f32.partialorder %v2788_v26, %v3949_v21  ;;  %v2806_v34 = vmul.f32 %v4418_v8, %v5976_v63  ;;  %vm2811_vm15 = vweird.f32 %v4418_v8 }
 0x319   : > { %3337 = vst [vmem:[%s6008_s26] sm:$0xff] %v3305_v31  ;;  %v3306_v18 = vsel %vm3274_vm9, 1.0, %v4712_v29  ;;  %v2793_v38 = vmul.f32 %v4414_v60, %v2792_v27  ;;  %4423 = vrcp.f32 %v6014_v24  ;;  %v2829_v54 = vand.u32 2147483647, %v5989_v19  ;;  %vm2812_vm2 = vmor %vm2810_vm14, %vm2811_vm15 }
 0x31a   : > { %3338 = vst [vmem:[%s6008_s26 + $0x8] sm:$0xff] %v3306_v18  ;;  %v2807_v5 = vsub.f32 1.0, %v2806_v34  ;;  %4425 = vpow2.f32 %v3923_v23  ;;  %v2831_v57 = vand.u32 2147483648, %v5989_v19  ;;  %vm2825_vm5 = vweird.f32 %v5989_v19 }
 0x31b   : > { %v2794_v41 = vadd.f32 %v4414_v60, %v2793_v38  ;;  %v2553_v45 = vpop.f32.mrf.mxu2  ;;  %v2602_v52 = vpop.f32.mrf.mxu3  ;;  %vm2830_vm7 = vcmp.eq.f32.partialorder %v2829_v54, 8.507059e+37  ;;  %v2844_v59 = vand.u32 2147483647, %v6014_v24  ;;  %v2846_v21 = vand.u32 2147483648, %v6014_v24 }
 0x31c   : > { %v4420_v44 = vpop.eup %4419  ;;  %v2808_v48 = vmul.f32 %v4418_v8, %v2807_v5  ;;  %v2554_v58 = vadd.f32 %v2553_v45, %v5161_v32  ;;  %v2603_v1 = vadd.f32 %v2602_v52, %v5163_v33  ;;  %v2832_v10 = vor.u32 1.1754944e-38, %v2831_v57 }
 0x31d   : > { %v2798_v43 = vsel %vm2797_vm13, %v4414_v60, %v2794_v41  ;;  %v2821_v30 = vmul.f32 %v4420_v44, %v5989_v19  ;;  %v4422_v46 = vpop.eup %4421  ;;  %vm2826_vm3 = vweird.f32 %v4420_v44  ;;  %v3952_v60 = vld [vmem:[%s5233_s19 + $0x120] sm:$0xff]  ;;  %vm2840_vm10 = vweird.f32 %v6014_v24 }
 0x31e   : > { %v2803_v47 = vsel %vm2800_vm12, %v2802_v49, %v2798_v43  ;;  %v2809_v3 = vadd.f32 %v4418_v8, %v2808_v48  ;;  %v6034_v61 = vadd.f32 1.0, %v4422_v46  ;;  %v3924_v39 = vmul.f32 -1.442695, %v2554_v58  ;;  %vm2827_vm6 = vmor %vm2825_vm5, %vm2826_vm3 }
 0x31f   : > { %vm3275_vm1 = vcmp.gt.f32.partialorder %v2803_v47, %v3950_v2  ;;  %v2822_v56 = vsub.f32 1.0, %v2821_v30  ;;  %v4424_v36 = vpop.eup %4423  ;;  %v3925_v42 = vmul.f32 -1.442695, %v2603_v1  ;;  %vm2845_vm12 = vcmp.eq.f32.partialorder %v2844_v59, 8.507059e+37 }
 0x320   : > { %v3307_v50 = vsel %vm3275_vm1, 1.0, %v4712_v29  ;;  %v2813_v63 = vsel %vm2812_vm2, %v4418_v8, %v2809_v3  ;;  %v2836_v37 = vmul.f32 %v4424_v36, %v6014_v24  ;;  %v4426_v9 = vpop.eup %4425  ;;  %4427 = vrcp.f32 %v6034_v61 }
 0x321   : > { %3339 = vst [vmem:[%s6008_s26 + $0x10] sm:$0xff] %v3307_v50  ;;  %v2818_v17 = vsel %vm6020_vm0, %v2817_v0, %v2813_v63  ;;  %v2823_v14 = vmul.f32 %v4420_v44, %v2822_v56  ;;  %v6043_v16 = vadd.f32 1.0, %v4426_v9  ;;  %4429 = vpow2.f32 %v3924_v39  ;;  %v3954_v56 = vld [vmem:[%s5233_s19 + $0x130] sm:$0xff] }
 0x322   : > { %vm3276_vm4 = vcmp.gt.f32.partialorder %v2818_v17, %v3951_v55  ;;  %v2837_v12 = vsub.f32 1.0, %v2836_v37  ;;  %4431 = vpow2.f32 %v3925_v42  ;;  %vm2841_vm9 = vweird.f32 %v4424_v36 }
 0x323   : > { %v3308_v4 = vsel %vm3276_vm4, 1.0, %v4712_v29  ;;  %v2824_v51 = vadd.f32 %v4420_v44, %v2823_v14  ;;  %v2555_v20 = vpop.f32.mrf.mxu2  ;;  %v2604_v11 = vpop.f32.mrf.mxu3  ;;  %4433 = vrcp.f32 %v6043_v16  ;;  %vm2842_vm11 = vmor %vm2840_vm10, %vm2841_vm9  ;;  %v2847_v26 = vor.u32 1.1754944e-38, %v2846_v21 }
 0x324   : > { %3340 = vst [vmem:[%s6008_s26 + $0x18] sm:$0xff] %v3308_v4  ;;  %v2838_v6 = vmul.f32 %v4424_v36, %v2837_v12  ;;  %v2556_v62 = vadd.f32 %v2555_v20, %v5161_v32  ;;  %v2605_v7 = vadd.f32 %v2604_v11, %v5163_v33  ;;  %v2859_v27 = vand.u32 2147483647, %v6034_v61  ;;  %v3955_v4 = vld [vmem:[%s5233_s19 + $0x138] sm:$0xff] }
 0x325   : > { %v2828_v15 = vsel %vm2827_vm6, %v4420_v44, %v2824_v51  ;;  %v2861_v18 = vand.u32 2147483648, %v6034_v61  ;;  %v2874_v24 = vand.u32 2147483647, %v6043_v16  ;;  %v2876_v48 = vand.u32 2147483648, %v6043_v16 }
 0x326   : > { %v2833_v19 = vsel %vm2830_vm7, %v2832_v10, %v2828_v15  ;;  %v2839_v22 = vadd.f32 %v4424_v36, %v2838_v6  ;;  %v4428_v8 = vpop.eup %4427  ;;  %v3926_v28 = vmul.f32 -1.442695, %v2556_v62  ;;  %v3927_v38 = vmul.f32 -1.442695, %v2605_v7 }
 0x327   : > { %vm3277_vm8 = vcmp.gt.f32.partialorder %v2833_v19, %v3952_v60  ;;  %v4430_v31 = vpop.eup %4429  ;;  %v2851_v35 = vmul.f32 %v4428_v8, %v6034_v61  ;;  %vm2856_vm14 = vweird.f32 %v4428_v8  ;;  %vm2855_vm15 = vweird.f32 %v6034_v61 }
 0x328   : > { %v3309_v40 = vsel %vm3277_vm8, 1.0, %v4712_v29  ;;  %v2843_v34 = vsel %vm2842_vm11, %v4424_v36, %v2839_v22  ;;  %v4432_v13 = vpop.eup %4431  ;;  %v6058_v23 = vadd.f32 1.0, %v4430_v31  ;;  %4435 = vpow2.f32 %v3926_v28  ;;  %vm2857_vm3 = vmor %vm2855_vm15, %vm2856_vm14 }
 0x329   : > { %3341 = vst [vmem:[%s6008_s26 + $0x20] sm:$0xff] %v3309_v40  ;;  %v2848_v5 = vsel %vm2845_vm12, %v2847_v26, %v2843_v34  ;;  %v4434_v41 = vpop.eup %4433  ;;  %v2852_v49 = vsub.f32 1.0, %v2851_v35  ;;  %v6060_v45 = vadd.f32 1.0, %v4432_v13  ;;  %4437 = vpow2.f32 %v3927_v38  ;;  %v3956_v34 = vld [vmem:[%s5233_s19 + $0x140] sm:$0xff] }
 0x32a   : > { %vm3278_vm13 = vcmp.gt.f32.partialorder %v2848_v5, %v3953_v25  ;;  %v2866_v2 = vmul.f32 %v4434_v41, %v6043_v16  ;;  %4439 = vrcp.f32 %v6058_v23  ;;  %vm6068_vm0 = vcmp.eq.f32.partialorder %v2859_v27, 8.507059e+37 }
 0x32b   : > { %v3310_v44 = vsel %vm3278_vm13, 1.0, %v4712_v29  ;;  %v2853_v52 = vmul.f32 %v4428_v8, %v2852_v49  ;;  %4441 = vrcp.f32 %v6060_v45  ;;  %v2862_v3 = vor.u32 1.1754944e-38, %v2861_v18 }
 0x32c   : > { %3342 = vst [vmem:[%s6008_s26 + $0x28] sm:$0xff] %v3310_v44  ;;  %v2867_v53 = vsub.f32 1.0, %v2866_v2  ;;  %vm2870_vm1 = vweird.f32 %v6043_v16  ;;  %vm6074_vm2 = vcmp.eq.f32.partialorder %v2874_v24, 8.507059e+37  ;;  %vm2871_vm4 = vweird.f32 %v4434_v41 }
 0x32d   : > { %v2854_v47 = vadd.f32 %v4428_v8, %v2853_v52  ;;  %v2877_v58 = vor.u32 1.1754944e-38, %v2876_v48  ;;  %vm2885_vm5 = vweird.f32 %v6058_v23  ;;  %v2889_v1 = vand.u32 2147483647, %v6058_v23  ;;  %vm2872_vm7 = vmor %vm2870_vm1, %vm2871_vm4 }
 0x32e   : > { %v4436_v55 = vpop.eup %4435  ;;  %v2868_v57 = vmul.f32 %v4434_v41, %v2867_v53  ;;  %v2891_v36 = vand.u32 2147483648, %v6058_v23  ;;  %vm2900_vm8 = vweird.f32 %v6060_v45  ;;  %v2904_v60 = vand.u32 2147483647, %v6060_v45 }
 0x32f   : > { %v4438_v50 = vpop.eup %4437  ;;  %v2858_v63 = vsel %vm2857_vm3, %v4428_v8, %v2854_v47  ;;  %v6082_v17 = vadd.f32 1.0, %v4436_v55  ;;  %vm6102_vm10 = vcmp.eq.f32.partialorder %v2889_v1, 8.507059e+37  ;;  %v2906_v21 = vand.u32 2147483648, %v6060_v45 }
 0x330   : > { %v2558_v0 = vpop.f32.mrf.mxu2  ;;  %v2607_v30 = vpop.f32.mrf.mxu3  ;;  %v2863_v61 = vsel %vm6068_vm0, %v2862_v3, %v2858_v63  ;;  %v2869_v39 = vadd.f32 %v4434_v41, %v2868_v57  ;;  %v6087_v42 = vadd.f32 1.0, %v4438_v50  ;;  %v2892_v25 = vor.u32 1.1754944e-38, %v2891_v36  ;;  %v3958_v50 = vld [vmem:[%s5233_s19 + $0x150] sm:$0xff] }
 0x331   : > { %v2559_v46 = vadd.f32 %v2558_v0, %v5161_v32  ;;  %v4440_v14 = vpop.eup %4439  ;;  %vm3279_vm6 = vcmp.gt.f32.partialorder %v2863_v61, %v3954_v56  ;;  %4443 = vrcp.f32 %v6082_v17  ;;  %v2608_v19 = vadd.f32 %v2607_v30, %v5163_v33 }
 0x332   : > { %v2881_v51 = vmul.f32 %v4440_v14, %v6058_v23  ;;  %v4442_v37 = vpop.eup %4441  ;;  %v3311_v9 = vsel %vm3279_vm6, 1.0, %v4712_v29  ;;  %v2873_v10 = vsel %vm2872_vm7, %v4434_v41, %v2869_v39  ;;  %4445 = vrcp.f32 %v6087_v42  ;;  %v3957_v23 = vld [vmem:[%s5233_s19 + $0x148] sm:$0xff] }
 0x333   : > { %v3928_v15 = vmul.f32 -1.442695, %v2559_v46  ;;  %3343 = vst [vmem:[%s6008_s26 + $0x30] sm:$0xff] %v3311_v9  ;;  %v2878_v12 = vsel %vm6074_vm2, %v2877_v58, %v2873_v10  ;;  %v2896_v20 = vmul.f32 %v4442_v37, %v6060_v45  ;;  %vm2886_vm11 = vweird.f32 %v4440_v14  ;;  %v3959_v10 = vld [vmem:[%s5233_s19 + $0x158] sm:$0xff] }
 0x334   : > { %v2882_v16 = vsub.f32 1.0, %v2881_v51  ;;  %vm3280_vm9 = vcmp.gt.f32.partialorder %v2878_v12, %v3955_v4  ;;  %vm2901_vm12 = vweird.f32 %v4442_v37  ;;  %vm6110_vm13 = vcmp.eq.f32.partialorder %v2904_v60, 8.507059e+37  ;;  %vm2887_vm14 = vmor %vm2885_vm5, %vm2886_vm11 }
 0x335   : > { %v3312_v6 = vsel %vm3280_vm9, 1.0, %v4712_v29  ;;  %v2897_v62 = vsub.f32 1.0, %v2896_v20  ;;  %4447 = vpow2.f32 %v3928_v15  ;;  %v3929_v28 = vmul.f32 -1.442695, %v2608_v19  ;;  %vm2902_vm0 = vmor %vm2900_vm8, %vm2901_vm12 }
 0x336   : > { %v2883_v40 = vmul.f32 %v4440_v14, %v2882_v16  ;;  %3344 = vst [vmem:[%s6008_s26 + $0x38] sm:$0xff] %v3312_v6  ;;  %v2907_v35 = vor.u32 1.1754944e-38, %v2906_v21  ;;  %vm2915_vm15 = vweird.f32 %v6082_v17  ;;  %v2919_v38 = vand.u32 2147483647, %v6082_v17 }
 0x337   : > { %v4444_v8 = vpop.eup %4443  ;;  %v2898_v27 = vmul.f32 %v4442_v37, %v2897_v62  ;;  %4449 = vpow2.f32 %v3929_v28  ;;  %v2921_v2 = vand.u32 2147483648, %v6082_v17  ;;  %v2936_v58 = vand.u32 2147483648, %v6087_v42 }
 0x338   : > { %v2560_v11 = vpop.f32.mrf.mxu2  ;;  %v2609_v22 = vpop.f32.mrf.mxu3  ;;  %v2884_v26 = vadd.f32 %v4440_v14, %v2883_v40  ;;  %v2911_v18 = vmul.f32 %v4444_v8, %v6082_v17  ;;  %vm2916_vm2 = vweird.f32 %v4444_v8  ;;  %v2934_v1 = vand.u32 2147483647, %v6087_v42 }
 0x339   : > { %v2561_v31 = vadd.f32 %v2560_v11, %v5161_v32  ;;  %v2899_v5 = vadd.f32 %v4442_v37, %v2898_v27  ;;  %v4446_v41 = vpop.eup %4445  ;;  %v2610_v48 = vadd.f32 %v2609_v22, %v5163_v33  ;;  %v2922_v57 = vor.u32 1.1754944e-38, %v2921_v2  ;;  %vm2917_vm4 = vmor %vm2915_vm15, %vm2916_vm2  ;;  %v3960_v2 = vld [vmem:[%s5233_s19 + $0x160] sm:$0xff] }
 0x33a   : > { %v2888_v13 = vsel %vm2887_vm14, %v4440_v14, %v2884_v26  ;;  %v2912_v44 = vsub.f32 1.0, %v2911_v18  ;;  %v2926_v43 = vmul.f32 %v4446_v41, %v6087_v42  ;;  %vm2931_vm5 = vweird.f32 %v4446_v41 }
 0x33b   : > { %v3930_v24 = vmul.f32 -1.442695, %v2561_v31  ;;  %v2893_v49 = vsel %vm6102_vm10, %v2892_v25, %v2888_v13  ;;  %v2903_v52 = vsel %vm2902_vm0, %v4442_v37, %v2899_v5  ;;  %v4448_v53 = vpop.eup %4447  ;;  %v3931_v54 = vmul.f32 -1.442695, %v2610_v48 }
 0x33c   : > { %vm3281_vm1 = vcmp.gt.f32.partialorder %v2893_v49, %v3956_v34  ;;  %v2908_v45 = vsel %vm6110_vm13, %v2907_v35, %v2903_v52  ;;  %v2913_v30 = vmul.f32 %v4444_v8, %v2912_v44  ;;  %v2927_v47 = vsub.f32 1.0, %v2926_v43 }
 0x33d   : > { %v3313_v0 = vsel %vm3281_vm1, 1.0, %v4712_v29  ;;  %4451 = vpow2.f32 %v3930_v24  ;;  %vm3282_vm3 = vcmp.gt.f32.partialorder %v2908_v45, %v3957_v23  ;;  %v6134_v3 = vadd.f32 1.0, %v4448_v53  ;;  %v4450_v46 = vpop.eup %4449 }
 0x33e   : > { %3345 = vst [vmem:[%s6008_s26 + $0x40] sm:$0xff] %v3313_v0  ;;  %v3314_v55 = vsel %vm3282_vm3, 1.0, %v4712_v29  ;;  %v2914_v56 = vadd.f32 %v4444_v8, %v2913_v30  ;;  %v2928_v63 = vmul.f32 %v4446_v41, %v2927_v47  ;;  %vm2920_vm6 = vcmp.eq.f32.partialorder %v2919_v38, 8.507059e+37 }
 0x33f   : > { %3346 = vst [vmem:[%s6008_s26 + $0x48] sm:$0xff] %v3314_v55  ;;  %4453 = vrcp.f32 %v6134_v3  ;;  %v6145_v36 = vadd.f32 1.0, %v4450_v46  ;;  %vm2930_vm7 = vweird.f32 %v6087_v42  ;;  %v2937_v9 = vor.u32 1.1754944e-38, %v2936_v58 }
 0x340   : > { %v2918_v39 = vsel %vm2917_vm4, %v4444_v8, %v2914_v56  ;;  %4455 = vpow2.f32 %v3931_v54  ;;  %v2929_v51 = vadd.f32 %v4446_v41, %v2928_v63  ;;  %vm2932_vm9 = vmor %vm2930_vm7, %vm2931_vm5  ;;  %vm2935_vm10 = vcmp.eq.f32.partialorder %v2934_v1, 8.507059e+37 }
 0x341   : > { %v2923_v4 = vsel %vm2920_vm6, %v2922_v57, %v2918_v39  ;;  %4457 = vrcp.f32 %v6145_v36  ;;  %v2949_v59 = vand.u32 2147483647, %v6134_v3  ;;  %v2951_v40 = vand.u32 2147483648, %v6134_v3  ;;  %v3961_v57 = vld [vmem:[%s5233_s19 + $0x168] sm:$0xff] }
 0x342   : > { %v2563_v14 = vpop.f32.mrf.mxu2  ;;  %v2612_v61 = vpop.f32.mrf.mxu3  ;;  %vm3283_vm8 = vcmp.gt.f32.partialorder %v2923_v4, %v3958_v50  ;;  %v2933_v15 = vsel %vm2932_vm9, %v4446_v41, %v2929_v51  ;;  %v2964_v62 = vand.u32 2147483647, %v6145_v36  ;;  %v2966_v22 = vand.u32 2147483648, %v6145_v36 }
 0x343   : > { %v2564_v17 = vadd.f32 %v2563_v14, %v5161_v32  ;;  %v4452_v37 = vpop.eup %4451  ;;  %v3315_v60 = vsel %vm3283_vm8, 1.0, %v4712_v29  ;;  %v2938_v12 = vsel %vm2935_vm10, %v2937_v9, %v2933_v15  ;;  %v2613_v20 = vadd.f32 %v2612_v61, %v5163_v33 }
 0x344   : > { %3347 = vst [vmem:[%s6008_s26 + $0x50] sm:$0xff] %v3315_v60  ;;  %v6154_v16 = vadd.f32 1.0, %v4452_v37  ;;  %vm3284_vm11 = vcmp.gt.f32.partialorder %v2938_v12, %v3959_v10  ;;  %vm2945_vm12 = vweird.f32 %v6134_v3  ;;  %vm6169_vm13 = vcmp.eq.f32.partialorder %v2949_v59, 8.507059e+37  ;;  %v3962_v60 = vld [vmem:[%s5233_s19 + $0x170] sm:$0xff] }
 0x345   : > { %v3932_v42 = vmul.f32 -1.442695, %v2564_v17  ;;  %v4454_v19 = vpop.eup %4453  ;;  %v3316_v11 = vsel %vm3284_vm11, 1.0, %v4712_v29  ;;  %v3933_v27 = vmul.f32 -1.442695, %v2613_v20  ;;  %v2952_v38 = vor.u32 1.1754944e-38, %v2951_v40 }
 0x346   : > { %v4456_v21 = vpop.eup %4455  ;;  %v2941_v6 = vmul.f32 %v4454_v19, %v6134_v3  ;;  %4459 = vrcp.f32 %v6154_v16  ;;  %3348 = vst [vmem:[%s6008_s26 + $0x58] sm:$0xff] %v3316_v11  ;;  %vm2946_vm14 = vweird.f32 %v4454_v19  ;;  %vm2960_vm15 = vweird.f32 %v6145_v36 }
 0x347   : > { %v6165_v25 = vadd.f32 1.0, %v4456_v21  ;;  %v4458_v8 = vpop.eup %4457  ;;  %4461 = vpow2.f32 %v3932_v42  ;;  %vm6176_vm0 = vcmp.eq.f32.partialorder %v2964_v62, 8.507059e+37  ;;  %v2967_v23 = vor.u32 1.1754944e-38, %v2966_v22  ;;  %vm2947_vm1 = vmor %vm2945_vm12, %vm2946_vm14 }
 0x348   : > { %v2942_v26 = vsub.f32 1.0, %v2941_v6  ;;  %v2956_v35 = vmul.f32 %v4458_v8, %v6145_v36  ;;  %vm2961_vm2 = vweird.f32 %v4458_v8  ;;  %v2979_v43 = vand.u32 2147483647, %v6154_v16 }
 0x349   : > { %4463 = vrcp.f32 %v6165_v25  ;;  %v2981_v45 = vand.u32 2147483648, %v6154_v16  ;;  %vm2962_vm4 = vmor %vm2960_vm15, %vm2961_vm2  ;;  %vm2975_vm5 = vweird.f32 %v6154_v16  ;;  %v2994_v37 = vand.u32 2147483647, %v6165_v25 }
 0x34a   : > { %v2565_v7 = vpop.f32.mrf.mxu2  ;;  %v2614_v31 = vpop.f32.mrf.mxu3  ;;  %v2943_v18 = vmul.f32 %v4454_v19, %v2942_v26  ;;  %v2957_v13 = vsub.f32 1.0, %v2956_v35  ;;  %4465 = vpow2.f32 %v3933_v27  ;;  %vm6200_vm7 = vcmp.eq.f32.partialorder %v2979_v43, 8.507059e+37 }
 0x34b   : > { %v2566_v28 = vadd.f32 %v2565_v7, %v5161_v32  ;;  %v2615_v44 = vadd.f32 %v2614_v31, %v5163_v33  ;;  %v2982_v39 = vor.u32 1.1754944e-38, %v2981_v45  ;;  %v2996_v15 = vand.u32 2147483648, %v6165_v25 }
 0x34c   : > { %v4460_v24 = vpop.eup %4459  ;;  %v2944_v41 = vadd.f32 %v4454_v19, %v2943_v18  ;;  %v2958_v48 = vmul.f32 %v4458_v8, %v2957_v13  ;;  %vm2990_vm12 = vweird.f32 %v6165_v25  ;;  %vm2995_vm14 = vcmp.eq.f32.partialorder %v2994_v37, 8.507059e+37  ;;  %v3965_v37 = vld [vmem:[%s5233_s19 + $0x188] sm:$0xff] }
 0x34d   : > { %v3934_v5 = vmul.f32 -1.442695, %v2566_v28  ;;  %v2971_v52 = vmul.f32 %v4460_v24, %v6154_v16  ;;  %v4462_v53 = vpop.eup %4461  ;;  %v3935_v30 = vmul.f32 -1.442695, %v2615_v44  ;;  %vm2976_vm6 = vweird.f32 %v4460_v24 }
 0x34e   : > { %v2948_v0 = vsel %vm2947_vm1, %v4454_v19, %v2944_v41  ;;  %v2959_v3 = vadd.f32 %v4458_v8, %v2958_v48  ;;  %v6189_v55 = vadd.f32 1.0, %v4462_v53  ;;  %vm2977_vm9 = vmor %vm2975_vm5, %vm2976_vm6  ;;  %v2997_v7 = vor.u32 1.1754944e-38, %v2996_v15 }
 0x34f   : > { %4467 = vpow2.f32 %v3934_v5  ;;  %v2953_v47 = vsel %vm6169_vm13, %v2952_v38, %v2948_v0  ;;  %v2972_v54 = vsub.f32 1.0, %v2971_v52  ;;  %v4464_v56 = vpop.eup %4463 }
 0x350   : > { %vm3285_vm3 = vcmp.gt.f32.partialorder %v2953_v47, %v3960_v2  ;;  %4469 = vpow2.f32 %v3935_v30  ;;  %v4466_v58 = vpop.eup %4465  ;;  %v2963_v50 = vsel %vm2962_vm4, %v4458_v8, %v2959_v3  ;;  %v2986_v1 = vmul.f32 %v4464_v56, %v6165_v25  ;;  %v3963_v8 = vld [vmem:[%s5233_s19 + $0x178] sm:$0xff]  ;;  %v3964_v3 = vld [vmem:[%s5233_s19 + $0x180] sm:$0xff] }
 0x351   : > { %v3317_v46 = vsel %vm3285_vm3, 1.0, %v4712_v29  ;;  %v2973_v63 = vmul.f32 %v4460_v24, %v2972_v54  ;;  %v2968_v14 = vsel %vm6176_vm0, %v2967_v23, %v2963_v50  ;;  %4471 = vrcp.f32 %v6189_v55 }
 0x352   : > { %3349 = vst [vmem:[%s6008_s26 + $0x60] sm:$0xff] %v3317_v46  ;;  %vm3286_vm8 = vcmp.gt.f32.partialorder %v2968_v14, %v3961_v57  ;;  %v2987_v17 = vsub.f32 1.0, %v2986_v1  ;;  %vm2991_vm10 = vweird.f32 %v4464_v56  ;;  %v6212_v12 = vadd.f32 1.0, %v4466_v58 }
 0x353   : > { %v2974_v51 = vadd.f32 %v4460_v24, %v2973_v63  ;;  %v3318_v10 = vsel %vm3286_vm8, 1.0, %v4712_v29  ;;  %v3009_v19 = vand.u32 2147483647, %v6189_v55  ;;  %v3011_v11 = vand.u32 2147483648, %v6189_v55  ;;  %vm2992_vm13 = vmor %vm2990_vm12, %vm2991_vm10 }
 0x354   : > { %3350 = vst [vmem:[%s6008_s26 + $0x68] sm:$0xff] %v3318_v10  ;;  %v2988_v20 = vmul.f32 %v4464_v56, %v2987_v17  ;;  %4473 = vrcp.f32 %v6212_v12  ;;  %vm3005_vm15 = vweird.f32 %v6189_v55  ;;  %v3024_v34 = vand.u32 2147483647, %v6212_v12 }
 0x355   : > { %v2568_v36 = vpop.f32.mrf.mxu2  ;;  %v2617_v4 = vpop.f32.mrf.mxu3  ;;  %v2978_v42 = vsel %vm2977_vm9, %v4460_v24, %v2974_v51  ;;  %vm6231_vm0 = vcmp.eq.f32.partialorder %v3009_v19, 8.507059e+37  ;;  %v3012_v31 = vor.u32 1.1754944e-38, %v3011_v11  ;;  %v3026_v35 = vand.u32 2147483648, %v6212_v12 }
 0x356   : > { %v4468_v9 = vpop.eup %4467  ;;  %v2983_v16 = vsel %vm6200_vm7, %v2982_v39, %v2978_v42  ;;  %v2989_v6 = vadd.f32 %v4464_v56, %v2988_v20  ;;  %v2569_v40 = vadd.f32 %v2568_v36, %v5161_v32  ;;  %vm3020_vm2 = vweird.f32 %v6212_v12 }
 0x357   : > { %v6216_v59 = vadd.f32 1.0, %v4468_v9  ;;  %v4470_v21 = vpop.eup %4469  ;;  %vm3287_vm11 = vcmp.gt.f32.partialorder %v2983_v16, %v3962_v60  ;;  %v2618_v23 = vadd.f32 %v2617_v4, %v5163_v33  ;;  %vm6246_vm4 = vcmp.eq.f32.partialorder %v3024_v34, 8.507059e+37 }
 0x358   : > { %v4472_v62 = vpop.eup %4471  ;;  %v3319_v22 = vsel %vm3287_vm11, 1.0, %v4712_v29  ;;  %v2993_v26 = vsel %vm2992_vm13, %v4464_v56, %v2989_v6  ;;  %v6237_v5 = vadd.f32 1.0, %v4470_v21  ;;  %v3936_v24 = vmul.f32 -1.442695, %v2569_v40 }
 0x359   : > { %4475 = vrcp.f32 %v6216_v59  ;;  %3351 = vst [vmem:[%s6008_s26 + $0x70] sm:$0xff] %v3319_v22  ;;  %v3001_v27 = vmul.f32 %v4472_v62, %v6189_v55  ;;  %v2998_v28 = vsel %vm2995_vm14, %v2997_v7, %v2993_v26  ;;  %vm3006_vm3 = vweird.f32 %v4472_v62 }
 0x35a   : > { %vm3288_vm1 = vcmp.gt.f32.partialorder %v2998_v28, %v3963_v8  ;;  %v4474_v41 = vpop.eup %4473  ;;  %4477 = vrcp.f32 %v6237_v5  ;;  %vm3035_vm5 = vweird.f32 %v6216_v59  ;;  %v3039_v53 = vand.u32 2147483647, %v6216_v59  ;;  %vm3007_vm6 = vmor %vm3005_vm15, %vm3006_vm3 }
 0x35b   : > { %v3002_v13 = vsub.f32 1.0, %v3001_v27  ;;  %v3320_v49 = vsel %vm3288_vm1, 1.0, %v4712_v29  ;;  %v3016_v48 = vmul.f32 %v4474_v41, %v6212_v12  ;;  %4479 = vpow2.f32 %v3936_v24  ;;  %v3966_v12 = vld [vmem:[%s5233_s19 + $0x190] sm:$0xff] }
 0x35c   : > { %3352 = vst [vmem:[%s6008_s26 + $0x78] sm:$0xff] %v3320_v49  ;;  %v3027_v30 = vor.u32 1.1754944e-38, %v3026_v35  ;;  %vm3021_vm7 = vweird.f32 %v4474_v41  ;;  %v3041_v54 = vand.u32 2147483648, %v6216_v59  ;;  %v3937_v56 = vmul.f32 -1.442695, %v2618_v23 }
 0x35d   : > { %v2570_v18 = vpop.f32.mrf.mxu2  ;;  %v2619_v38 = vpop.f32.mrf.mxu3  ;;  %v3003_v2 = vmul.f32 %v4472_v62, %v3002_v13  ;;  %v3017_v45 = vsub.f32 1.0, %v3016_v48  ;;  %vm6260_vm9 = vcmp.eq.f32.partialorder %v3039_v53, 8.507059e+37  ;;  %vm3022_vm11 = vmor %vm3020_vm2, %vm3021_vm7  ;;  %v3054_v20 = vand.u32 2147483647, %v6237_v5  ;;  %v3971_v48 = vld [vmem:[%s5233_s19 + $0x1b8] sm:$0xff] }
 0x35e   : > { %v2571_v44 = vadd.f32 %v2570_v18, %v5161_v32  ;;  %v2620_v63 = vadd.f32 %v2619_v38, %v5163_v33  ;;  %4481 = vpow2.f32 %v3937_v56  ;;  %v3042_v9 = vor.u32 1.1754944e-38, %v3041_v54  ;;  %v3967_v38 = vld [vmem:[%s5233_s19 + $0x198] sm:$0xff] }
 0x35f   : > { %v4476_v52 = vpop.eup %4475  ;;  %v3004_v0 = vadd.f32 %v4472_v62, %v3003_v2  ;;  %v3018_v46 = vmul.f32 %v4474_v41, %v3017_v45  ;;  %v3056_v11 = vand.u32 2147483648, %v6237_v5  ;;  %vm3055_vm2 = vcmp.eq.f32.partialorder %v3054_v20, 8.507059e+37 }
 0x360   : > { %v3031_v47 = vmul.f32 %v4476_v52, %v6216_v59  ;;  %v3938_v57 = vmul.f32 -1.442695, %v2571_v44  ;;  %vm3036_vm8 = vweird.f32 %v4476_v52  ;;  %v4478_v61 = vpop.eup %4477  ;;  %v3939_v60 = vmul.f32 -1.442695, %v2620_v63 }
 0x361   : > { %v3008_v58 = vsel %vm3007_vm6, %v4472_v62, %v3004_v0  ;;  %v3019_v39 = vadd.f32 %v4474_v41, %v3018_v46  ;;  %v4480_v51 = vpop.eup %4479  ;;  %v3046_v10 = vmul.f32 %v4478_v61, %v6237_v5  ;;  %vm3037_vm12 = vmor %vm3035_vm5, %vm3036_vm8  ;;  %vm3051_vm14 = vweird.f32 %v4478_v61 }
 0x362   : > { %v3032_v50 = vsub.f32 1.0, %v3031_v47  ;;  %v3013_v1 = vsel %vm6231_vm0, %v3012_v31, %v3008_v58  ;;  %4483 = vpow2.f32 %v3938_v57  ;;  %v6272_v19 = vadd.f32 1.0, %v4480_v51 }
 0x363   : > { %vm3289_vm10 = vcmp.gt.f32.partialorder %v3013_v1, %v3964_v3  ;;  %v3023_v15 = vsel %vm3022_vm11, %v4474_v41, %v3019_v39  ;;  %v3047_v16 = vsub.f32 1.0, %v3046_v10  ;;  %4485 = vpow2.f32 %v3939_v60 }
 0x364   : > { %v3033_v36 = vmul.f32 %v4476_v52, %v3032_v50  ;;  %v3321_v17 = vsel %vm3289_vm10, 1.0, %v4712_v29  ;;  %v3028_v21 = vsel %vm6246_vm4, %v3027_v30, %v3023_v15  ;;  %4487 = vrcp.f32 %v6272_v19  ;;  %v4482_v40 = vpop.eup %4481 }
 0x365   : > { %v2573_v55 = vpop.f32.mrf.mxu2  ;;  %v2622_v4 = vpop.f32.mrf.mxu3  ;;  %3353 = vst [vmem:[%s6008_s26 + $0x80] sm:$0xff] %v3321_v17  ;;  %vm3290_vm13 = vcmp.gt.f32.partialorder %v3028_v21, %v3965_v37  ;;  %v3048_v59 = vmul.f32 %v4478_v61, %v3047_v16  ;;  %vm3050_vm0 = vweird.f32 %v6237_v5  ;;  %v3069_v26 = vand.u32 2147483647, %v6272_v19  ;;  %v3968_v17 = vld [vmem:[%s5233_s19 + $0x1a0] sm:$0xff] }
 0x366   : > { %v3034_v42 = vadd.f32 %v4476_v52, %v3033_v36  ;;  %v3322_v62 = vsel %vm3290_vm13, 1.0, %v4712_v29  ;;  %v2574_v7 = vadd.f32 %v2573_v55, %v5161_v32  ;;  %v6289_v27 = vadd.f32 1.0, %v4482_v40  ;;  %vm3052_vm1 = vmor %vm3050_vm0, %vm3051_vm14 }
 0x367   : > { %3354 = vst [vmem:[%s6008_s26 + $0x88] sm:$0xff] %v3322_v62  ;;  %v3049_v28 = vadd.f32 %v4478_v61, %v3048_v59  ;;  %v3071_v31 = vand.u32 2147483648, %v6272_v19  ;;  %v3057_v18 = vor.u32 1.1754944e-38, %v3056_v11  ;;  %v2623_v41 = vadd.f32 %v2622_v4, %v5163_v33 }
 0x368   : > { %v3038_v6 = vsel %vm3037_vm12, %v4476_v52, %v3034_v42  ;;  %v4484_v8 = vpop.eup %4483  ;;  %4489 = vrcp.f32 %v6289_v27  ;;  %v3940_v24 = vmul.f32 -1.442695, %v2574_v7  ;;  %vm3065_vm3 = vweird.f32 %v6272_v19  ;;  %v3969_v7 = vld [vmem:[%s5233_s19 + $0x1a8] sm:$0xff] }
 0x369   : > { %v3043_v22 = vsel %vm6260_vm9, %v3042_v9, %v3038_v6  ;;  %v6293_v34 = vadd.f32 1.0, %v4484_v8  ;;  %v4486_v13 = vpop.eup %4485  ;;  %v3053_v5 = vsel %vm3052_vm1, %v4478_v61, %v3049_v28  ;;  %vm6303_vm5 = vcmp.eq.f32.partialorder %v3069_v26, 8.507059e+37  ;;  %v3970_v28 = vld [vmem:[%s5233_s19 + $0x1b0] sm:$0xff] }
 0x36a   : > { %vm3291_vm15 = vcmp.gt.f32.partialorder %v3043_v22, %v3966_v12  ;;  %v4488_v49 = vpop.eup %4487  ;;  %v3058_v23 = vsel %vm3055_vm2, %v3057_v18, %v3053_v5  ;;  %v3072_v52 = vor.u32 1.1754944e-38, %v3071_v31  ;;  %v3084_v43 = vand.u32 2147483647, %v6289_v27 }
 0x36b   : > { %v3323_v25 = vsel %vm3291_vm15, 1.0, %v4712_v29  ;;  %4491 = vrcp.f32 %v6293_v34  ;;  %vm3292_vm4 = vcmp.gt.f32.partialorder %v3058_v23, %v3967_v38  ;;  %v3061_v2 = vmul.f32 %v4488_v49, %v6272_v19 }
 0x36c   : > { %3355 = vst [vmem:[%s6008_s26 + $0x90] sm:$0xff] %v3323_v25  ;;  %v3324_v53 = vsel %vm3292_vm4, 1.0, %v4712_v29  ;;  %v3086_v0 = vand.u32 2147483648, %v6289_v27  ;;  %v3099_v45 = vand.u32 2147483647, %v6293_v34  ;;  %v6311_v30 = vadd.f32 1.0, %v4486_v13 }
 0x36d   : > { %v2575_v35 = vpop.f32.mrf.mxu2  ;;  %v2624_v44 = vpop.f32.mrf.mxu3  ;;  %3356 = vst [vmem:[%s6008_s26 + $0x98] sm:$0xff] %v3324_v53  ;;  %v3062_v47 = vsub.f32 1.0, %v3061_v2  ;;  %4493 = vpow2.f32 %v3940_v24  ;;  %v3941_v3 = vmul.f32 -1.442695, %v2623_v41  ;;  %vm3080_vm6 = vweird.f32 %v6289_v27 }
 0x36e   : > { %v2576_v54 = vadd.f32 %v2575_v35, %v5161_v32  ;;  %v4490_v56 = vpop.eup %4489  ;;  %vm3095_vm7 = vweird.f32 %v6293_v34  ;;  %v3101_v57 = vand.u32 2147483648, %v6293_v34  ;;  %4495 = vrcp.f32 %v6311_v30 }
 0x36f   : > { %v3063_v46 = vmul.f32 %v4488_v49, %v3062_v47  ;;  %vm3066_vm8 = vweird.f32 %v4488_v49  ;;  %v3076_v50 = vmul.f32 %v4490_v56, %v6289_v27  ;;  %4497 = vpow2.f32 %v3941_v3 }
 0x370   : > { %vm6320_vm9 = vcmp.eq.f32.partialorder %v3084_v43, 8.507059e+37  ;;  %v3087_v1 = vor.u32 1.1754944e-38, %v3086_v0  ;;  %vm6325_vm10 = vcmp.eq.f32.partialorder %v3099_v45, 8.507059e+37  ;;  %v3942_v4 = vmul.f32 -1.442695, %v2576_v54  ;;  %vm3067_vm11 = vmor %vm3065_vm3, %vm3066_vm8 }
 0x371   : > { %v4492_v58 = vpop.eup %4491  ;;  %v3064_v39 = vadd.f32 %v4488_v49, %v3063_v46  ;;  %v3077_v36 = vsub.f32 1.0, %v3076_v50  ;;  %v2625_v51 = vadd.f32 %v2624_v44, %v5163_v33  ;;  %vm3081_vm12 = vweird.f32 %v4490_v56 }
 0x372   : > { %v3091_v14 = vmul.f32 %v4492_v58, %v6293_v34  ;;  %vm3096_vm13 = vweird.f32 %v4492_v58  ;;  %v3102_v9 = vor.u32 1.1754944e-38, %v3101_v57  ;;  %4499 = vpow2.f32 %v3942_v4  ;;  %vm3082_vm15 = vmor %vm3080_vm6, %vm3081_vm12 }
 0x373   : > { %v4494_v10 = vpop.eup %4493  ;;  %v3068_v60 = vsel %vm3067_vm11, %v4488_v49, %v3064_v39  ;;  %v3078_v15 = vmul.f32 %v4490_v56, %v3077_v36  ;;  %v3943_v16 = vmul.f32 -1.442695, %v2625_v51  ;;  %v3114_v22 = vand.u32 2147483647, %v6311_v30  ;;  %vm3097_vm0 = vmor %vm3095_vm7, %vm3096_vm13 }
 0x374   : > { %v3092_v37 = vsub.f32 1.0, %v3091_v14  ;;  %v4496_v20 = vpop.eup %4495  ;;  %v3073_v21 = vsel %vm6303_vm5, %v3072_v52, %v3068_v60  ;;  %v6336_v19 = vadd.f32 1.0, %v4494_v10  ;;  %v3116_v26 = vand.u32 2147483648, %v6311_v30 }
 0x375   : > { %v2578_v61 = vpop.f32.mrf.mxu2  ;;  %v2627_v11 = vpop.f32.mrf.mxu3  ;;  %vm3293_vm14 = vcmp.gt.f32.partialorder %v3073_v21, %v3968_v17  ;;  %v3079_v40 = vadd.f32 %v4490_v56, %v3078_v15  ;;  %v3106_v62 = vmul.f32 %v4496_v20, %v6311_v30  ;;  %vm3111_vm2 = vweird.f32 %v4496_v20 }
 0x376   : > { %v2579_v42 = vadd.f32 %v2578_v61, %v5161_v32  ;;  %v3093_v12 = vmul.f32 %v4492_v58, %v3092_v37  ;;  %v4498_v6 = vpop.eup %4497  ;;  %v3325_v59 = vsel %vm3293_vm14, 1.0, %v4712_v29  ;;  %4501 = vrcp.f32 %v6336_v19  ;;  %v3972_v37 = vld [vmem:[%s5233_s19 + $0x1c0] sm:$0xff] }
 0x377   : > { %3357 = vst [vmem:[%s6008_s26 + $0xa0] sm:$0xff] %v3325_v59  ;;  %v3083_v25 = vsel %vm3082_vm15, %v4490_v56, %v3079_v40  ;;  %v3107_v31 = vsub.f32 1.0, %v3106_v62  ;;  %v2628_v18 = vadd.f32 %v2627_v11, %v5163_v33  ;;  %v6355_v13 = vadd.f32 1.0, %v4498_v6  ;;  %v3973_v59 = vld [vmem:[%s5233_s19 + $0x1c8] sm:$0xff] }
 0x378   : > { %v3094_v8 = vadd.f32 %v4492_v58, %v3093_v12  ;;  %v3944_v35 = vmul.f32 -1.442695, %v2579_v42  ;;  %v3088_v27 = vsel %vm6320_vm9, %v3087_v1, %v3083_v25  ;;  %4503 = vpow2.f32 %v3943_v16  ;;  %v4500_v5 = vpop.eup %4499 }
 0x379   : > { %vm3294_vm1 = vcmp.gt.f32.partialorder %v3088_v27, %v3969_v7  ;;  %v3108_v24 = vmul.f32 %v4496_v20, %v3107_v31  ;;  %4505 = vrcp.f32 %v6355_v13  ;;  %vm3110_vm4 = vweird.f32 %v6311_v30  ;;  %v3974_v27 = vld [vmem:[%s5233_s19 + $0x1d0] sm:$0xff] }
 0x37a   : > { %v3098_v38 = vsel %vm3097_vm0, %v4492_v58, %v3094_v8  ;;  %v3326_v41 = vsel %vm3294_vm1, 1.0, %v4712_v29  ;;  %vm3112_vm5 = vmor %vm3110_vm4, %vm3111_vm2  ;;  %v3117_v2 = vor.u32 1.1754944e-38, %v3116_v26  ;;  %v6366_v52 = vadd.f32 1.0, %v4500_v5 }
 0x37b   : > { %v3103_v34 = vsel %vm6325_vm10, %v3102_v9, %v3098_v38  ;;  %3358 = vst [vmem:[%s6008_s26 + $0xa8] sm:$0xff] %v3326_v41  ;;  %v3109_v23 = vadd.f32 %v4496_v20, %v3108_v24  ;;  %4507 = vpow2.f32 %v3944_v35  ;;  %v3945_v43 = vmul.f32 -1.442695, %v2628_v18 }
 0x37c   : > { %vm3295_vm3 = vcmp.gt.f32.partialorder %v3103_v34, %v3970_v28  ;;  %v4502_v44 = vpop.eup %4501  ;;  %vm3115_vm6 = vcmp.eq.f32.partialorder %v3114_v22, 8.507059e+37  ;;  %v3129_v54 = vand.u32 2147483647, %v6336_v19  ;;  %4509 = vrcp.f32 %v6366_v52 }
 0x37d   : > { %v3327_v49 = vsel %vm3295_vm3, 1.0, %v4712_v29  ;;  %v3113_v53 = vsel %vm3112_vm5, %v4496_v20, %v3109_v23  ;;  %v3121_v0 = vmul.f32 %v4502_v44, %v6336_v19  ;;  %v2580_v45 = vpop.f32.mrf.mxu2  ;;  %v3131_v56 = vand.u32 2147483648, %v6336_v19  ;;  %v2629_v20 = vpop.f32.mrf.mxu3 }
 0x37e   : > { %3359 = vst [vmem:[%s6008_s26 + $0xb0] sm:$0xff] %v3327_v49  ;;  %v4504_v47 = vpop.eup %4503  ;;  %v3118_v3 = vsel %vm3115_vm6, %v3117_v2, %v3113_v53  ;;  %v3144_v57 = vand.u32 2147483647, %v6355_v13  ;;  %4511 = vpow2.f32 %v3945_v43  ;;  %v2581_v63 = vadd.f32 %v2580_v45, %v5161_v32 }
 0x37f   : > { %vm3296_vm7 = vcmp.gt.f32.partialorder %v3118_v3, %v3971_v48  ;;  %v3122_v30 = vsub.f32 1.0, %v3121_v0  ;;  %v4506_v58 = vpop.eup %4505  ;;  %v6374_v50 = vadd.f32 1.0, %v4504_v47  ;;  %vm3126_vm8 = vweird.f32 %v4502_v44 }
 0x380   : > { %v3328_v46 = vsel %vm3296_vm7, 1.0, %v4712_v29  ;;  %v3136_v14 = vmul.f32 %v4506_v58, %v6355_v13  ;;  %vm3125_vm9 = vweird.f32 %v6336_v19  ;;  %v3146_v61 = vand.u32 2147483648, %v6355_v13 }
 0x381   : > { %3360 = vst [vmem:[%s6008_s26 + $0xb8] sm:$0xff] %v3328_v46  ;;  %v3123_v1 = vmul.f32 %v4502_v44, %v3122_v30  ;;  %v4508_v55 = vpop.eup %4507  ;;  %4513 = vrcp.f32 %v6374_v50  ;;  %vm6382_vm10 = vcmp.eq.f32.partialorder %v3129_v54, 8.507059e+37  ;;  %vm3127_vm11 = vmor %vm3125_vm9, %vm3126_vm8  ;;  %v3132_v17 = vor.u32 1.1754944e-38, %v3131_v56  ;;  %v3975_v54 = vld [vmem:[%s5233_s19 + $0x1d8] sm:$0xff] }
 0x382   : > { %v3137_v4 = vsub.f32 1.0, %v3136_v14  ;;  %v6386_v32 = vadd.f32 1.0, %v4508_v55  ;;  %v4510_v51 = vpop.eup %4509  ;;  %vm3140_vm12 = vweird.f32 %v6355_v13  ;;  %vm6390_vm13 = vcmp.eq.f32.partialorder %v3144_v57, 8.507059e+37 }
 0x383   : > { %v3124_v39 = vadd.f32 %v4502_v44, %v3123_v1  ;;  %v3946_v10 = vmul.f32 -1.442695, %v2581_v63  ;;  %vm3141_vm14 = vweird.f32 %v4506_v58  ;;  %v3151_v42 = vmul.f32 %v4510_v51, %v6366_v52 }
 0x384   : > { %v3138_v15 = vmul.f32 %v4506_v58, %v3137_v4  ;;  %v4512_v21 = vpop.eup %4511  ;;  %v3147_v19 = vor.u32 1.1754944e-38, %v3146_v61  ;;  %v3159_v16 = vand.u32 2147483647, %v6366_v52  ;;  %4515 = vrcp.f32 %v6386_v32  ;;  %vm3142_vm0 = vmor %vm3140_vm12, %vm3141_vm14  ;;  %v3976_v61 = vld [vmem:[%s5233_s19 + $0x1e0] sm:$0xff] }
 0x385   : > { %v3128_v60 = vsel %vm3127_vm11, %v4502_v44, %v3124_v39  ;;  %v3152_v6 = vsub.f32 1.0, %v3151_v42  ;;  %v3161_v40 = vand.u32 2147483648, %v6366_v52  ;;  %v6404_v7 = vadd.f32 1.0, %v4512_v21 }
 0x386   : > { %v3133_v12 = vsel %vm6382_vm10, %v3132_v17, %v3128_v60  ;;  %v3139_v11 = vadd.f32 %v4506_v58, %v3138_v15  ;;  %4517 = vpow2.f32 %v3946_v10  ;;  %v2630_v8 = vadd.f32 %v2629_v20, %v5163_v33  ;;  %v3977_v15 = vld [vmem:[%s5233_s19 + $0x1e8] sm:$0xff] }
 0x387   : > { %vm3297_vm15 = vcmp.gt.f32.partialorder %v3133_v12, %v3972_v37  ;;  %v4514_v62 = vpop.eup %4513  ;;  %v3153_v25 = vmul.f32 %v4510_v51, %v3152_v6  ;;  %vm3156_vm1 = vweird.f32 %v4510_v51  ;;  %vm3155_vm2 = vweird.f32 %v6366_v52 }
 0x388   : > { %v3329_v22 = vsel %vm3297_vm15, 1.0, %v4712_v29  ;;  %v3143_v26 = vsel %vm3142_vm0, %v4506_v58, %v3139_v11  ;;  %v3166_v28 = vmul.f32 %v4514_v62, %v6374_v50  ;;  %vm6412_vm3 = vcmp.eq.f32.partialorder %v3159_v16, 8.507059e+37  ;;  %vm3157_vm5 = vmor %vm3155_vm2, %vm3156_vm1 }
 0x389   : > { %3361 = vst [vmem:[%s6008_s26 + $0xc0] sm:$0xff] %v3329_v22  ;;  %v3148_v31 = vsel %vm6390_vm13, %v3147_v19, %v3143_v26  ;;  %4519 = vrcp.f32 %v6404_v7  ;;  %v3154_v33 = vadd.f32 %v4510_v51, %v3153_v25  ;;  %v3162_v18 = vor.u32 1.1754944e-38, %v3161_v40 }
 0x38a   : > { %vm3298_vm4 = vcmp.gt.f32.partialorder %v3148_v31, %v3973_v59  ;;  %v3167_v38 = vsub.f32 1.0, %v3166_v28  ;;  %v4516_v13 = vpop.eup %4515  ;;  %v3174_v34 = vand.u32 2147483647, %v6374_v50  ;;  %v3176_v24 = vand.u32 2147483648, %v6374_v50 }
 0x38b   : > { %v3330_v5 = vsel %vm3298_vm4, 1.0, %v4712_v29  ;;  %v3947_v41 = vmul.f32 -1.442695, %v2630_v8  ;;  %v3158_v49 = vsel %vm3157_vm5, %v4510_v51, %v3154_v33  ;;  %vm3171_vm6 = vweird.f32 %v4514_v62 }
 0x38c   : > { %3362 = vst [vmem:[%s6008_s26 + $0xc8] sm:$0xff] %v3330_v5  ;;  %v3168_v23 = vmul.f32 %v4514_v62, %v3167_v38  ;;  %v3181_v44 = vmul.f32 %v4516_v13, %v6386_v32  ;;  %v4518_v2 = vpop.eup %4517  ;;  %v3163_v48 = vsel %vm6412_vm3, %v3162_v18, %v3158_v49  ;;  %vm3170_vm7 = vweird.f32 %v6374_v50  ;;  %v3979_v38 = vld [vmem:[%s5233_s19 + $0x1f8] sm:$0xff] }
 0x38d   : > { %v3189_v52 = vand.u32 2147483647, %v6386_v32  ;;  %4521 = vpow2.f32 %v3947_v41  ;;  %vm3299_vm8 = vcmp.gt.f32.partialorder %v3163_v48, %v3974_v27  ;;  %v6427_v0 = vadd.f32 1.0, %v4518_v2  ;;  %vm3172_vm9 = vmor %vm3170_vm7, %vm3171_vm6 }
 0x38e   : > { %v3169_v43 = vadd.f32 %v4514_v62, %v3168_v23  ;;  %v3182_v53 = vsub.f32 1.0, %v3181_v44  ;;  %v3331_v47 = vsel %vm3299_vm8, 1.0, %v4712_v29  ;;  %vm3175_vm10 = vcmp.eq.f32.partialorder %v3174_v34, 8.507059e+37 }
 0x38f   : > { %v4520_v45 = vpop.eup %4519  ;;  %v3177_v3 = vor.u32 1.1754944e-38, %v3176_v24  ;;  %v3191_v30 = vand.u32 2147483648, %v6386_v32  ;;  %3363 = vst [vmem:[%s6008_s26 + $0xd0] sm:$0xff] %v3331_v47  ;;  %vm3186_vm11 = vweird.f32 %v4516_v13  ;;  %vm3185_vm12 = vweird.f32 %v6386_v32 }
 0x390   : > { %v3173_v56 = vsel %vm3172_vm9, %v4514_v62, %v3169_v43  ;;  %v3183_v57 = vmul.f32 %v4516_v13, %v3182_v53  ;;  %v3196_v58 = vmul.f32 %v4520_v45, %v6404_v7  ;;  %4523 = vrcp.f32 %v6427_v0  ;;  %vm3187_vm15 = vmor %vm3185_vm12, %vm3186_vm11 }
 0x391   : > { %v3178_v46 = vsel %vm3175_vm10, %v3177_v3, %v3173_v56  ;;  %vm3190_vm14 = vcmp.eq.f32.partialorder %v3189_v52, 8.507059e+37  ;;  %v3192_v55 = vor.u32 1.1754944e-38, %v3191_v30  ;;  %v3204_v39 = vand.u32 2147483647, %v6404_v7 }
 0x392   : > { %vm3300_vm13 = vcmp.gt.f32.partialorder %v3178_v46, %v3975_v54  ;;  %v3184_v50 = vadd.f32 %v4516_v13, %v3183_v57  ;;  %v3197_v63 = vsub.f32 1.0, %v3196_v58  ;;  %v3206_v36 = vand.u32 2147483648, %v6404_v7 }
 0x393   : > { %v4522_v1 = vpop.eup %4521  ;;  %v3332_v14 = vsel %vm3300_vm13, 1.0, %v4712_v29  ;;  %vm3201_vm0 = vweird.f32 %v4520_v45  ;;  %vm3200_vm2 = vweird.f32 %v6404_v7  ;;  %vm3205_vm4 = vcmp.eq.f32.partialorder %v3204_v39, 8.507059e+37  ;;  %v3978_v7 = vld [vmem:[%s5233_s19 + $0x1f0] sm:$0xff] }
 0x394   : > { %3364 = vst [vmem:[%s6008_s26 + $0xd8] sm:$0xff] %v3332_v14  ;;  %v3188_v4 = vsel %vm3187_vm15, %v4516_v13, %v3184_v50  ;;  %v3198_v32 = vmul.f32 %v4520_v45, %v3197_v63  ;;  %v2759_v51 = vadd.f32 1.0, %v4522_v1  ;;  %vm3202_vm3 = vmor %vm3200_vm2, %vm3201_vm0  ;;  %v3207_v60 = vor.u32 1.1754944e-38, %v3206_v36 }
 0x395   : > { %v3193_v17 = vsel %vm3190_vm14, %v3192_v55, %v3188_v4  ;;  %v3221_v16 = vand.u32 2147483648, %v6427_v0  ;;  %v3219_v40 = vand.u32 2147483647, %v6427_v0  ;;  %vm3215_vm7 = vweird.f32 %v6427_v0 }
 0x396   : > { %vm3301_vm1 = vcmp.gt.f32.partialorder %v3193_v17, %v3976_v61  ;;  %v3199_v37 = vadd.f32 %v4520_v45, %v3198_v32  ;;  %4525 = vrcp.f32 %v2759_v51  ;;  %v4524_v9 = vpop.eup %4523  ;;  %v3236_v25 = vand.u32 2147483648, %v2759_v51 }
 0x397   : > { %v3333_v10 = vsel %vm3301_vm1, 1.0, %v4712_v29  ;;  %v3211_v20 = vmul.f32 %v4524_v9, %v6427_v0  ;;  %vm3216_vm6 = vweird.f32 %v4524_v9  ;;  %v3222_v59 = vor.u32 1.1754944e-38, %v3221_v16 }
 0x398   : > { %3365 = vst [vmem:[%s6008_s26 + $0xe0] sm:$0xff] %v3333_v10  ;;  %v3203_v42 = vsel %vm3202_vm3, %v4520_v45, %v3199_v37  ;;  %vm3217_vm8 = vmor %vm3215_vm7, %vm3216_vm6  ;;  %vm3220_vm9 = vcmp.eq.f32.partialorder %v3219_v40, 8.507059e+37  ;;  %v3234_v35 = vand.u32 2147483647, %v2759_v51  ;;  %vm3230_vm12 = vweird.f32 %v2759_v51 }
 0x399   : > { %v3208_v21 = vsel %vm3205_vm4, %v3207_v60, %v3203_v42  ;;  %v3212_v12 = vsub.f32 1.0, %v3211_v20  ;;  %v3237_v27 = vor.u32 1.1754944e-38, %v3236_v25 }
 0x39a   : > { %vm3302_vm5 = vcmp.gt.f32.partialorder %v3208_v21, %v3977_v15  ;;  %vm3235_vm14 = vcmp.eq.f32.partialorder %v3234_v35, 8.507059e+37 }
 0x39b   : > { %v3334_v19 = vsel %vm3302_vm5, 1.0, %v4712_v29  ;;  %v3213_v6 = vmul.f32 %v4524_v9, %v3212_v12 }
 0x39c   : > { %v4526_v11 = vpop.eup %4525  ;;  %3366 = vst [vmem:[%s6008_s26 + $0xe8] sm:$0xff] %v3334_v19 }
 0x39d   : > { %v3226_v62 = vmul.f32 %v4526_v11, %v2759_v51  ;;  %v3214_v22 = vadd.f32 %v4524_v9, %v3213_v6  ;;  %vm3231_vm10 = vweird.f32 %v4526_v11 }
 0x39e   : > { %vm3232_vm13 = vmor %vm3230_vm12, %vm3231_vm10 }
 0x39f   : > { %v3227_v8 = vsub.f32 1.0, %v3226_v62  ;;  %v3218_v26 = vsel %vm3217_vm8, %v4524_v9, %v3214_v22 }
 0x3a0   : > { %v3223_v28 = vsel %vm3220_vm9, %v3222_v59, %v3218_v26 }
 0x3a1   : > { %v3228_v31 = vmul.f32 %v4526_v11, %v3227_v8  ;;  %vm3303_vm11 = vcmp.gt.f32.partialorder %v3223_v28, %v3978_v7 }
 0x3a2   : > { %v3335_v33 = vsel %vm3303_vm11, 1.0, %v4712_v29 }
 0x3a3   : > { %v3229_v18 = vadd.f32 %v4526_v11, %v3228_v31  ;;  %3367 = vst [vmem:[%s6008_s26 + $0xf0] sm:$0xff] %v3335_v33 }
 0x3a5   : > { %v3233_v13 = vsel %vm3232_vm13, %v4526_v11, %v3229_v18 }
 0x3a6   : > { %v3238_v5 = vsel %vm3235_vm14, %v3237_v27, %v3233_v13 }
 0x3a7   : > { %vm3304_vm15 = vcmp.gt.f32.partialorder %v3238_v5, %v3979_v38 }
 0x3a8   : > { %v3336_v34 = vsel %vm3304_vm15, 1.0, %v4712_v29 }
 0x3a9   : > { %3368 = vst [vmem:[%s6008_s26 + $0xf8] sm:$0xff] %v3336_v34 }
 0x3aa   : > { %4643 = shalt.err (!%p4640_p8)
}
 0x3ab   : > { %s4713_s8 = smov 256   ;;  %s4714_s22 = smov 16  }
 0x3ac   : > { %4069 = dma.vmem_to_hbm [thread:$0]  (%p4807_p11), %s3384_s28, 4096, %s3386_s2, %s3370_s11, %s4713_s8, %s4713_s8, %s4714_s22  }
 0x3ad PF: > { %s3400_s19 = sand.u32 1, %s4678_s24   ;;  %p4079_p9 = pnand %p3525_p2, %p4811_p12 }
 0x3ae   : > { %s3401_s10 = scalar_lea.sflag [#allocation4], %s3400_s19 }
 0x3af   : > { %p4080_p10 = pneg %p4079_p9 }
 0x3b1   : > { %4673 = dma.done.wait (%p4080_p10), %s3401_s10, 4096  }
 0x3b2   : > { %4675 = vsyncadd (%p4080_p10), %s3401_s10, 4294963200  ;;  %s6616_s27 = sld [smem:[#allocation23_spill]]  ;;  %s6619_s24 = smov %s4682_s25 }
 0x3b3   : > { %s6617_s29 = sld [smem:[#allocation22_spill]] }
 0x3b4   : > { %s6618_s26 = sld [smem:[#allocation24_spill]] }
 0x3b8   : > { %p24_p1 = scmp.ge.s32.totalorder %s6616_s27, 4  }
 0x3b9   : > { %s6620_s25 = smov %s6617_s29 }
 0x3ba   :  { %26 = sbr.rel (!%p24_p1) target bundleno = 11 (0xb), region = 137 }
 0x3bf   :  { %3407 = vsyncpa [#allocation3], 1 }
 0x3c0   :  { %3409 = vsyncpa [#allocation3 + $0x1], 1 }
 0x3c1   :  { %3410 = vsyncpa [#allocation6], 1 }
 0x3c2   :  { %3411 = vsyncpa [#allocation9], 1 }
 0x3c3   :  { %3413 = vsyncpa [#allocation9 + $0x1], 1 }
 0x3c4   :  { %3414 = vsyncpa [#allocation4], 1 }
 0x3c5   :  { %3416 = vsyncpa [#allocation4 + $0x1], 1 }

</bundles_post_ra>
